<compile_context>
chip_gen: v7x
topology: tpu7x:2x2x1
jax: 0.10.0
libtpu: 0.0.40
codegen_flags: <defaults>
</compile_context>

<pallas_src>
import math
import jax
import jax.numpy as jnp
from jax.experimental import pallas as pl
from jax.experimental.pallas import tpu as pltpu

# ------------------------- small config -------------------------
HIDDEN_SIZE = 32
MULTI_HEAD = 4
HIDDEN_SIZE_HEAD = HIDDEN_SIZE // MULTI_HEAD
FF_SIZE = 64
B = 2
SX = 16   # image regions  (x stream in AI.forward)
SY = 8    # language tokens (y stream in AI.forward)

_VMEM = pl.BlockSpec(memory_space=pltpu.MemorySpace.VMEM)


def _sigmoid(t):
    # explicit form (exp on EUP + div) -- guaranteed Mosaic lowering
    return 1.0 / (1.0 + jnp.exp(-t))


# ------------------------- fused AI kernel -------------------------
def _ai_kernel(x_ref, y_ref, xm_ref, ym_ref, g_ref, qt_ref,
               w1_ref, b1_ref, bm1_ref,
               wq2_ref, bq2_ref, w2y_ref, b2y_ref, bm2_ref,
               wfc_ref, bfc_ref, wout_ref, bout_ref,
               wSavg_ref, wSqt_ref, bS_ref, wHS_ref, bHS_ref,
               lng_ref, lnb_ref, o_ref):
    Bq, Sx, H = x_ref.shape
    Sy = y_ref.shape[1]
    HM = MULTI_HEAD * H                     # 128 lanes (merge-folded V width)
    f32 = jnp.float32

    x3 = x_ref[...]                         # (B, Sx, H) image stream
    y3 = y_ref[...]                         # (B, Sy, H) language stream
    x2 = x3.reshape(Bq * Sx, H)
    y2 = y3.reshape(Bq * Sy, H)
    lng = lng_ref[...]                      # (3, H) LayerNorm gains
    lnb = lnb_ref[...]                      # (3, H) LayerNorm biases

    def layer_norm(v2d, idx):
        # MCAN LayerNorm: a*(v-mean)/(std+eps)+b, unbiased std (torch default)
        mean = jnp.mean(v2d, axis=-1, keepdims=True)
        d = v2d - mean
        var = jnp.sum(d * d, axis=-1, keepdims=True) / (H - 1)
        inv = pl.reciprocal(jnp.sqrt(var) + 1e-6, approx=True)
        return lng[idx:idx + 1, :] * d * inv + lnb[idx:idx + 1, :]

    def mh_att(q2d, k2d, vm2d, mask2d, bm, Sq, Sk):
        # Multi-head attention; merge projection already folded into vm2d.
        # 1/sqrt(dk) already folded into the Q weights at pack time.
        q3h = q2d.reshape(Bq, Sq, H)
        k3h = k2d.reshape(Bq, Sk, H)
        vm3h = vm2d.reshape(Bq, Sk, HM)
        masked = mask2d[:, None, :] > 0.5                 # (B, 1, Sk)
        merged = jnp.zeros((Bq, Sq, H), f32)
        for h in range(MULTI_HEAD):                       # static unrolled loop
            lo = h * HIDDEN_SIZE_HEAD
            hi = lo + HIDDEN_SIZE_HEAD
            s = jnp.einsum('bqd,bkd->bqk', q3h[:, :, lo:hi], k3h[:, :, lo:hi],
                           preferred_element_type=f32)
            s = jnp.where(masked, f32(-1e9), s)
            s = s - jnp.max(s, axis=-1, keepdims=True)
            p = jnp.exp(s)
            p = p * pl.reciprocal(jnp.sum(p, axis=-1, keepdims=True),
                                  approx=True)
            # vm_h = v_h @ Wm[h-block]  (folded at pack time), 32-lane aligned
            merged = merged + jnp.einsum('bqk,bkd->bqd', p,
                                         vm3h[:, :, h * H:(h + 1) * H],
                                         preferred_element_type=f32)
        return merged.reshape(Bq * Sq, H) + bm

    # ---- mhatt1: self-attention on x ---------------------------------------
    # packed projection lanes: [ VM1 (0:4H) | Q1*scale (4H:5H) | K1 (5H:6H) ]
    proj1 = jnp.dot(x2, w1_ref[...], preferred_element_type=f32) + b1_ref[...]
    att1 = mh_att(proj1[:, 4 * H:5 * H], proj1[:, 5 * H:], proj1[:, :4 * H],
                  xm_ref[...], bm1_ref[...], Sx, Sx)
    xu = layer_norm(x2 + att1, 0)                                  # (B*Sx, H)

    # ---- mhatt2: cross-attention, q from x_update, k/v from y --------------
    # packed y projection lanes: [ VM2 (0:4H) | K2 (4H:5H) ]
    proj2y = jnp.dot(y2, w2y_ref[...], preferred_element_type=f32) + b2y_ref[...]
    q2p = jnp.dot(xu, wq2_ref[...], preferred_element_type=f32) + bq2_ref[...]
    att2 = mh_att(q2p, proj2y[:, 4 * H:], proj2y[:, :4 * H],
                  ym_ref[...], bm2_ref[...], Sx, Sy)
    xu = layer_norm(xu + att2, 1)
    xu3 = xu.reshape(Bq, Sx, H)

    # ---- AAM gating ---------------------------------------------------------
    s_avg = jnp.sum(x3, axis=1) / 14.0                             # (B, H)
    S = _sigmoid(jnp.dot(s_avg, wSavg_ref[...], preferred_element_type=f32)
                 + jnp.dot(qt_ref[...], wSqt_ref[...], preferred_element_type=f32)
                 + bS_ref[...] + g_ref[...])
    Hs = _sigmoid(jnp.dot(S, wHS_ref[...], preferred_element_type=f32)
                  + bHS_ref[...])
    gate = _sigmoid(jnp.sum(xu3, axis=1) / 14.0) * Hs              # (B, H)
    xo3 = gate[:, None, :] * xu3 + x3                              # (B, Sx, H)
    xo2 = xo3.reshape(Bq * Sx, H)

    # ---- FFN + residual + LayerNorm -----------------------------------------
    hmid = jnp.maximum(
        jnp.dot(xo2, wfc_ref[...], preferred_element_type=f32) + bfc_ref[...],
        0.0)
    ffn = jnp.dot(hmid, wout_ref[...], preferred_element_type=f32) + bout_ref[...]
    out = layer_norm(xo2 + ffn, 2)
    o_ref[...] = out.reshape(Bq, Sx, H)


# ------------------------- host-side packing & wrapper -------------------------
def _fold_merge_into_v(wv, bv, wm):
    """Per head:  Wvm_h = Wv[:, h-block] @ Wm[h-block, :]  (and same for bias).
    (p_h @ v_h) @ Wm_h == p_h @ (v_h @ Wm_h), so the merge linear disappears."""
    wblk, bblk = [], []
    for h in range(MULTI_HEAD):
        lo, hi = h * HIDDEN_SIZE_HEAD, (h + 1) * HIDDEN_SIZE_HEAD
        wblk.append(wv[:, lo:hi] @ wm[lo:hi, :])      # (H, H)
        bblk.append(bv[lo:hi] @ wm[lo:hi, :])         # (H,)
    return jnp.concatenate(wblk, axis=1), jnp.concatenate(bblk)   # (H, 4H), (4H,)


def pack_ai_params(p):
    """Fold merge into V, fold 1/sqrt(dk) into Q, concat projections,
    pre-sum AAM biases."""
    scale = 1.0 / math.sqrt(HIDDEN_SIZE_HEAD)
    m1, m2 = p['mhatt1'], p['mhatt2']
    f, a = p['ffn'], p['aam']
    row = lambda b: b.reshape(1, -1)

    wvm1, bvm1 = _fold_merge_into_v(m1['v']['w'], m1['v']['b'], m1['merge']['w'])
    wvm2, bvm2 = _fold_merge_into_v(m2['v']['w'], m2['v']['b'], m2['merge']['w'])

    # self-attention packed projection: [VM1 | Q1*scale | K1]  -> (H, 6H)
    w1 = jnp.concatenate([wvm1, m1['q']['w'] * scale, m1['k']['w']], axis=1)
    b1 = jnp.concatenate([bvm1, m1['q']['b'] * scale, m1['k']['b']])
    # cross-attention y-side packed projection: [VM2 | K2]     -> (H, 5H)
    w2y = jnp.concatenate([wvm2, m2['k']['w']], axis=1)
    b2y = jnp.concatenate([bvm2, m2['k']['b']])

    return (
        w1, row(b1), row(m1['merge']['b']),
        m2['q']['w'] * scale, row(m2['q']['b'] * scale),
        w2y, row(b2y), row(m2['merge']['b']),
        f['fc']['w'], row(f['fc']['b']),
        f['out']['w'], row(f['out']['b']),
        a['S_avg']['w'], a['S_qt']['w'],
        row(a['S_avg']['b'] + a['S_qt']['b']),
        a['H_S']['w'], row(a['H_S']['b']),
        jnp.stack([p['ln1']['g'], p['ln2']['g'], p['ln3']['g']]),
        jnp.stack([p['ln1']['b'], p['ln2']['b'], p['ln3']['b']]),
    )
    # note: AAM.linear_g_H exists in __init__ but is unused in AAM.forward


def ai_forward(packed, x, y, x_mask, y_mask, G, q_type):
    Bq, Sx, H = x.shape
    Sy = y.shape[1]
    args = (x, y,
            x_mask.reshape(Bq, Sx).astype(jnp.float32),
            y_mask.reshape(Bq, Sy).astype(jnp.float32),
            G, q_type) + tuple(packed)
    return pl.pallas_call(
        _ai_kernel,
        out_shape=jax.ShapeDtypeStruct((Bq, Sx, H), jnp.float32),
        in_specs=[_VMEM] * len(args),
        out_specs=_VMEM,
    )(*args)


# ------------------------- deterministic init -------------------------
def init_linear(key, fan_in, fan_out):
    kw, kb = jax.random.split(key)
    bound = 1.0 / math.sqrt(fan_in)
    return {'w': jax.random.uniform(kw, (fan_in, fan_out), jnp.float32, -bound, bound),
            'b': jax.random.uniform(kb, (fan_out,), jnp.float32, -bound, bound)}


def init_ln():
    return {'g': jnp.ones((HIDDEN_SIZE,), jnp.float32),
            'b': jnp.zeros((HIDDEN_SIZE,), jnp.float32)}


def init_mhatt(key):
    k1, k2, k3, k4 = jax.random.split(key, 4)
    H = HIDDEN_SIZE
    return {'v': init_linear(k1, H, H), 'k': init_linear(k2, H, H),
            'q': init_linear(k3, H, H), 'merge': init_linear(k4, H, H)}


def init_ffn(key):
    k1, k2 = jax.random.split(key)
    return {'fc': init_linear(k1, HIDDEN_SIZE, FF_SIZE),
            'out': init_linear(k2, FF_SIZE, HIDDEN_SIZE)}


def init_aam(key):
    k1, k2, k3, k4 = jax.random.split(key, 4)
    H = HIDDEN_SIZE
    return {'S_avg': init_linear(k1, H, H), 'S_qt': init_linear(k2, 4, H),
            'H_S': init_linear(k3, H, H),
            'g_H': init_linear(k4, H, H)}   # present in __init__, unused in forward


def init_ai(key):
    k1, k2, k3, k4 = jax.random.split(key, 4)
    return {'mhatt1': init_mhatt(k1), 'mhatt2': init_mhatt(k2),
            'ffn': init_ffn(k3), 'aam': init_aam(k4),
            'ln1': init_ln(), 'ln2': init_ln(), 'ln3': init_ln()}


# ------------------------- plain-JAX reference (for self-check) -------------------------
def _ref_linear(lp, v):
    return jnp.dot(v, lp['w']) + lp['b']


def _ref_ln(lp, v):
    mean = jnp.mean(v, axis=-1, keepdims=True)
    d = v - mean
    var = jnp.sum(d * d, axis=-1, keepdims=True) / (v.shape[-1] - 1)
    return lp['g'] * d / (jnp.sqrt(var) + 1e-6) + lp['b']


def _ref_mhatt(mp, v_in, k_in, q_in, mask):
    Bq, Sq, H = q_in.shape
    Sk = k_in.shape[1]

    def split(t, lp, S):
        return _ref_linear(lp, t).reshape(Bq, S, MULTI_HEAD,
                                          HIDDEN_SIZE_HEAD).transpose(0, 2, 1, 3)

    v = split(v_in, mp['v'], Sk)
    k = split(k_in, mp['k'], Sk)
    q = split(q_in, mp['q'], Sq)
    s = jnp.einsum('bhqd,bhkd->bhqk', q, k) / math.sqrt(HIDDEN_SIZE_HEAD)
    s = jnp.where(mask > 0.5, -1e9, s)
    p = jax.nn.softmax(s, axis=-1)
    att = jnp.einsum('bhqk,bhkd->bhqd', p, v).transpose(0, 2, 1, 3).reshape(Bq, Sq, H)
    return _ref_linear(mp['merge'], att)


def _ref_ffn(fp, v):
    return _ref_linear(fp['out'], jax.nn.relu(_ref_linear(fp['fc'], v)))


def _ref_aam(ap, x_update, x_original, G, qt):
    S = jax.nn.sigmoid(_ref_linear(ap['S_avg'], jnp.sum(x_original, axis=1) / 14.0)
                       + G + _ref_linear(ap['S_qt'], qt))
    Hh = jax.nn.sigmoid(_ref_linear(ap['H_S'], S))
    return jax.nn.sigmoid(jnp.sum(x_update, axis=1) / 14.0) * Hh


def ai_reference(p, x, y, x_mask, y_mask, G, qt):
    xu = _ref_ln(p['ln1'], x + _ref_mhatt(p['mhatt1'], x, x, x, x_mask))
    xu = _ref_ln(p['ln2'], xu + _ref_mhatt(p['mhatt2'], y, y, xu, y_mask))
    g = _ref_aam(p['aam'], xu, x, G, qt)[:, None, :]
    xo = g * xu + x
    return _ref_ln(p['ln3'], xo + _ref_ffn(p['ffn'], xo))


# ------------------------- main -------------------------
if __name__ == "__main__":
    root = jax.random.PRNGKey(0)
    kp, kx, ky, kg, kq = jax.random.split(root, 5)

    params = init_ai(kp)
    x = jax.random.normal(kx, (B, SX, HIDDEN_SIZE), jnp.float32)    # image features
    y = jax.random.normal(ky, (B, SY, HIDDEN_SIZE), jnp.float32)    # language features
    G = jax.random.normal(kg, (B, HIDDEN_SIZE), jnp.float32)        # global q+img info
    q_type = jax.nn.softmax(jax.random.normal(kq, (B, 4), jnp.float32), axis=-1)
    # masks: 1.0 == masked (torch masked_fill convention); no padding here
    x_mask = jnp.zeros((B, 1, 1, SX), jnp.float32)
    y_mask = jnp.zeros((B, 1, 1, SY), jnp.float32)

    packed = pack_ai_params(params)     # one-time weight packing (outside jit)
    fwd = jax.jit(ai_forward)
    out = fwd(packed, x, y, x_mask, y_mask, G, q_type)
    jax.block_until_ready(out)

    assert out.shape == (B, SX, HIDDEN_SIZE)
    ref = ai_reference(params, x, y, x_mask, y_mask, G, q_type)
    max_err = float(jnp.max(jnp.abs(out - ref)))
    assert max_err < 5e-2, f"kernel/reference mismatch: max abs err {max_err}"
    print("KERNEL_OK")
</pallas_src>

<mosaic_0001>
module attributes {stable_mosaic.version = 11 : i64} {
  func.func @_ai_kernel(%arg0: memref<2x16x32xf32, #tpu.memory_space<vmem>>, %arg1: memref<2x8x32xf32, #tpu.memory_space<vmem>>, %arg2: memref<2x16xf32, #tpu.memory_space<vmem>>, %arg3: memref<2x8xf32, #tpu.memory_space<vmem>>, %arg4: memref<2x32xf32, #tpu.memory_space<vmem>>, %arg5: memref<2x4xf32, #tpu.memory_space<vmem>>, %arg6: memref<32x192xf32, #tpu.memory_space<vmem>>, %arg7: memref<1x192xf32, #tpu.memory_space<vmem>>, %arg8: memref<1x32xf32, #tpu.memory_space<vmem>>, %arg9: memref<32x32xf32, #tpu.memory_space<vmem>>, %arg10: memref<1x32xf32, #tpu.memory_space<vmem>>, %arg11: memref<32x160xf32, #tpu.memory_space<vmem>>, %arg12: memref<1x160xf32, #tpu.memory_space<vmem>>, %arg13: memref<1x32xf32, #tpu.memory_space<vmem>>, %arg14: memref<32x64xf32, #tpu.memory_space<vmem>>, %arg15: memref<1x64xf32, #tpu.memory_space<vmem>>, %arg16: memref<64x32xf32, #tpu.memory_space<vmem>>, %arg17: memref<1x32xf32, #tpu.memory_space<vmem>>, %arg18: memref<32x32xf32, #tpu.memory_space<vmem>>, %arg19: memref<4x32xf32, #tpu.memory_space<vmem>>, %arg20: memref<1x32xf32, #tpu.memory_space<vmem>>, %arg21: memref<32x32xf32, #tpu.memory_space<vmem>>, %arg22: memref<1x32xf32, #tpu.memory_space<vmem>>, %arg23: memref<3x32xf32, #tpu.memory_space<vmem>>, %arg24: memref<3x32xf32, #tpu.memory_space<vmem>>, %arg25: memref<2x16x32xf32, #tpu.memory_space<vmem>>) attributes {dimension_semantics = [], scalar_prefetch = 0 : i64, scratch_operands = 0 : i64, tpu.core_type = #tpu.core_type<tc>} {
    %c0 = arith.constant 0 : index
    %c0_0 = arith.constant 0 : index
    %c0_1 = arith.constant 0 : index
    %0 = vector.load %arg0[%c0, %c0_0, %c0_1] : memref<2x16x32xf32, #tpu.memory_space<vmem>>, vector<2x16x32xf32>
    %c0_2 = arith.constant 0 : index
    %c0_3 = arith.constant 0 : index
    %c0_4 = arith.constant 0 : index
    %1 = vector.load %arg1[%c0_2, %c0_3, %c0_4] : memref<2x8x32xf32, #tpu.memory_space<vmem>>, vector<2x8x32xf32>
    %2 = vector.shape_cast %0 : vector<2x16x32xf32> to vector<32x32xf32>
    %3 = vector.shape_cast %1 : vector<2x8x32xf32> to vector<16x32xf32>
    %c0_5 = arith.constant 0 : index
    %c0_6 = arith.constant 0 : index
    %4 = vector.load %arg23[%c0_5, %c0_6] : memref<3x32xf32, #tpu.memory_space<vmem>>, vector<3x32xf32>
    %c0_7 = arith.constant 0 : index
    %c0_8 = arith.constant 0 : index
    %5 = vector.load %arg24[%c0_7, %c0_8] : memref<3x32xf32, #tpu.memory_space<vmem>>, vector<3x32xf32>
    %c0_9 = arith.constant 0 : index
    %c0_10 = arith.constant 0 : index
    %6 = vector.load %arg6[%c0_9, %c0_10] : memref<32x192xf32, #tpu.memory_space<vmem>>, vector<32x192xf32>
    %cst = arith.constant dense<0.000000e+00> : vector<32x192xf32>
    %7 = tpu.matmul %2, %6, %cst {dimension_numbers = #tpu.dot_dimension_numbers<[1], [0], [0], [1], [0, 0, 1, 1], [], []>} : vector<32x32xf32>, vector<32x192xf32>, vector<32x192xf32> -> vector<32x192xf32>
    %c0_11 = arith.constant 0 : index
    %c0_12 = arith.constant 0 : index
    %8 = vector.load %arg7[%c0_11, %c0_12] : memref<1x192xf32, #tpu.memory_space<vmem>>, vector<1x192xf32>
    %9 = vector.broadcast %8 : vector<1x192xf32> to vector<32x192xf32>
    %10 = arith.addf %7, %9 : vector<32x192xf32>
    %11 = vector.extract_strided_slice %10 {offsets = [0, 128], sizes = [32, 32], strides = [1, 1]} : vector<32x192xf32> to vector<32x32xf32>
    %12 = vector.extract_strided_slice %10 {offsets = [0, 160], sizes = [32, 32], strides = [1, 1]} : vector<32x192xf32> to vector<32x32xf32>
    %13 = vector.extract_strided_slice %10 {offsets = [0, 0], sizes = [32, 128], strides = [1, 1]} : vector<32x192xf32> to vector<32x128xf32>
    %c0_13 = arith.constant 0 : index
    %c0_14 = arith.constant 0 : index
    %14 = vector.load %arg2[%c0_13, %c0_14] : memref<2x16xf32, #tpu.memory_space<vmem>>, vector<2x16xf32>
    %c0_15 = arith.constant 0 : index
    %c0_16 = arith.constant 0 : index
    %15 = vector.load %arg8[%c0_15, %c0_16] : memref<1x32xf32, #tpu.memory_space<vmem>>, vector<1x32xf32>
    %16 = vector.shape_cast %11 : vector<32x32xf32> to vector<2x16x32xf32>
    %17 = vector.shape_cast %12 : vector<32x32xf32> to vector<2x16x32xf32>
    %18 = vector.shape_cast %13 : vector<32x128xf32> to vector<2x16x128xf32>
    %19 = vector.shape_cast %14 : vector<2x16xf32> to vector<2x1x16xf32>
    %cst_17 = arith.constant 5.000000e-01 : f32
    %20 = vector.broadcast %cst_17 : f32 to vector<2x1x16xf32>
    %21 = arith.cmpf ogt, %19, %20 : vector<2x1x16xf32>
    %cst_18 = arith.constant 0.000000e+00 : f32
    %22 = vector.broadcast %cst_18 : f32 to vector<2x16x32xf32>
    %23 = vector.extract_strided_slice %16 {offsets = [0, 0, 0], sizes = [2, 16, 8], strides = [1, 1, 1]} : vector<2x16x32xf32> to vector<2x16x8xf32>
    %24 = vector.extract_strided_slice %17 {offsets = [0, 0, 0], sizes = [2, 16, 8], strides = [1, 1, 1]} : vector<2x16x32xf32> to vector<2x16x8xf32>
    "tpu.trace_start"() <{level = 10 : i32, message = "bqd,bkd->bqk"}> : () -> ()
    %cst_19 = arith.constant dense<0.000000e+00> : vector<2x16x16xf32>
    %25 = tpu.matmul %23, %24, %cst_19 {dimension_numbers = #tpu.dot_dimension_numbers<[2], [2], [1], [1], [0, 0, 0, 1, 1, 1], [0], [0]>} : vector<2x16x8xf32>, vector<2x16x8xf32>, vector<2x16x16xf32> -> vector<2x16x16xf32>
    %cst_20 = arith.constant -1.000000e+09 : f32
    "tpu.trace_stop"() : () -> ()
    %26 = vector.shape_cast %21 : vector<2x1x16xi1> to vector<2x1x16xi1>
    %27 = vector.broadcast %26 : vector<2x1x16xi1> to vector<2x16x16xi1>
    %28 = vector.broadcast %cst_20 : f32 to vector<2x16x16xf32>
    %29 = arith.select %27, %28, %25 : vector<2x16x16xi1>, vector<2x16x16xf32>
    %cst_21 = arith.constant dense<0xFF800000> : vector<2x16xf32>
    %30 = vector.multi_reduction <maximumf>, %29, %cst_21 [2] : vector<2x16x16xf32> to vector<2x16xf32>
    %31 = vector.shape_cast %30 : vector<2x16xf32> to vector<2x16x1xf32>
    %32 = vector.broadcast %31 : vector<2x16x1xf32> to vector<2x16x16xf32>
    %33 = arith.subf %29, %32 : vector<2x16x16xf32>
    %34 = math.exp %33 : vector<2x16x16xf32>
    %cst_22 = arith.constant dense<0.000000e+00> : vector<2x16xf32>
    %35 = vector.multi_reduction <add>, %34, %cst_22 [2] : vector<2x16x16xf32> to vector<2x16xf32>
    %36 = vector.shape_cast %35 : vector<2x16xf32> to vector<2x16x1xf32>
    %37 = tpu.reciprocal %36 {approx = true} : vector<2x16x1xf32> -> vector<2x16x1xf32>
    %38 = vector.broadcast %37 : vector<2x16x1xf32> to vector<2x16x16xf32>
    %39 = arith.mulf %34, %38 : vector<2x16x16xf32>
    %40 = vector.extract_strided_slice %18 {offsets = [0, 0, 0], sizes = [2, 16, 32], strides = [1, 1, 1]} : vector<2x16x128xf32> to vector<2x16x32xf32>
    "tpu.trace_start"() <{level = 10 : i32, message = "bqk,bkd->bqd"}> : () -> ()
    %cst_23 = arith.constant dense<0.000000e+00> : vector<2x16x32xf32>
    %41 = tpu.matmul %39, %40, %cst_23 {dimension_numbers = #tpu.dot_dimension_numbers<[2], [1], [1], [2], [0, 0, 0, 1, 1, 2], [0], [0]>} : vector<2x16x16xf32>, vector<2x16x32xf32>, vector<2x16x32xf32> -> vector<2x16x32xf32>
    "tpu.trace_stop"() : () -> ()
    %42 = arith.addf %22, %41 : vector<2x16x32xf32>
    %43 = vector.extract_strided_slice %16 {offsets = [0, 0, 8], sizes = [2, 16, 8], strides = [1, 1, 1]} : vector<2x16x32xf32> to vector<2x16x8xf32>
    %44 = vector.extract_strided_slice %17 {offsets = [0, 0, 8], sizes = [2, 16, 8], strides = [1, 1, 1]} : vector<2x16x32xf32> to vector<2x16x8xf32>
    "tpu.trace_start"() <{level = 10 : i32, message = "bqd,bkd->bqk"}> : () -> ()
    %cst_24 = arith.constant dense<0.000000e+00> : vector<2x16x16xf32>
    %45 = tpu.matmul %43, %44, %cst_24 {dimension_numbers = #tpu.dot_dimension_numbers<[2], [2], [1], [1], [0, 0, 0, 1, 1, 1], [0], [0]>} : vector<2x16x8xf32>, vector<2x16x8xf32>, vector<2x16x16xf32> -> vector<2x16x16xf32>
    %cst_25 = arith.constant -1.000000e+09 : f32
    "tpu.trace_stop"() : () -> ()
    %46 = vector.shape_cast %21 : vector<2x1x16xi1> to vector<2x1x16xi1>
    %47 = vector.broadcast %46 : vector<2x1x16xi1> to vector<2x16x16xi1>
    %48 = vector.broadcast %cst_25 : f32 to vector<2x16x16xf32>
    %49 = arith.select %47, %48, %45 : vector<2x16x16xi1>, vector<2x16x16xf32>
    %cst_26 = arith.constant dense<0xFF800000> : vector<2x16xf32>
    %50 = vector.multi_reduction <maximumf>, %49, %cst_26 [2] : vector<2x16x16xf32> to vector<2x16xf32>
    %51 = vector.shape_cast %50 : vector<2x16xf32> to vector<2x16x1xf32>
    %52 = vector.broadcast %51 : vector<2x16x1xf32> to vector<2x16x16xf32>
    %53 = arith.subf %49, %52 : vector<2x16x16xf32>
    %54 = math.exp %53 : vector<2x16x16xf32>
    %cst_27 = arith.constant dense<0.000000e+00> : vector<2x16xf32>
    %55 = vector.multi_reduction <add>, %54, %cst_27 [2] : vector<2x16x16xf32> to vector<2x16xf32>
    %56 = vector.shape_cast %55 : vector<2x16xf32> to vector<2x16x1xf32>
    %57 = tpu.reciprocal %56 {approx = true} : vector<2x16x1xf32> -> vector<2x16x1xf32>
    %58 = vector.broadcast %57 : vector<2x16x1xf32> to vector<2x16x16xf32>
    %59 = arith.mulf %54, %58 : vector<2x16x16xf32>
    %60 = vector.extract_strided_slice %18 {offsets = [0, 0, 32], sizes = [2, 16, 32], strides = [1, 1, 1]} : vector<2x16x128xf32> to vector<2x16x32xf32>
    "tpu.trace_start"() <{level = 10 : i32, message = "bqk,bkd->bqd"}> : () -> ()
    %cst_28 = arith.constant dense<0.000000e+00> : vector<2x16x32xf32>
    %61 = tpu.matmul %59, %60, %cst_28 {dimension_numbers = #tpu.dot_dimension_numbers<[2], [1], [1], [2], [0, 0, 0, 1, 1, 2], [0], [0]>} : vector<2x16x16xf32>, vector<2x16x32xf32>, vector<2x16x32xf32> -> vector<2x16x32xf32>
    "tpu.trace_stop"() : () -> ()
    %62 = arith.addf %42, %61 : vector<2x16x32xf32>
    %63 = vector.extract_strided_slice %16 {offsets = [0, 0, 16], sizes = [2, 16, 8], strides = [1, 1, 1]} : vector<2x16x32xf32> to vector<2x16x8xf32>
    %64 = vector.extract_strided_slice %17 {offsets = [0, 0, 16], sizes = [2, 16, 8], strides = [1, 1, 1]} : vector<2x16x32xf32> to vector<2x16x8xf32>
    "tpu.trace_start"() <{level = 10 : i32, message = "bqd,bkd->bqk"}> : () -> ()
    %cst_29 = arith.constant dense<0.000000e+00> : vector<2x16x16xf32>
    %65 = tpu.matmul %63, %64, %cst_29 {dimension_numbers = #tpu.dot_dimension_numbers<[2], [2], [1], [1], [0, 0, 0, 1, 1, 1], [0], [0]>} : vector<2x16x8xf32>, vector<2x16x8xf32>, vector<2x16x16xf32> -> vector<2x16x16xf32>
    %cst_30 = arith.constant -1.000000e+09 : f32
    "tpu.trace_stop"() : () -> ()
    %66 = vector.shape_cast %21 : vector<2x1x16xi1> to vector<2x1x16xi1>
    %67 = vector.broadcast %66 : vector<2x1x16xi1> to vector<2x16x16xi1>
    %68 = vector.broadcast %cst_30 : f32 to vector<2x16x16xf32>
    %69 = arith.select %67, %68, %65 : vector<2x16x16xi1>, vector<2x16x16xf32>
    %cst_31 = arith.constant dense<0xFF800000> : vector<2x16xf32>
    %70 = vector.multi_reduction <maximumf>, %69, %cst_31 [2] : vector<2x16x16xf32> to vector<2x16xf32>
    %71 = vector.shape_cast %70 : vector<2x16xf32> to vector<2x16x1xf32>
    %72 = vector.broadcast %71 : vector<2x16x1xf32> to vector<2x16x16xf32>
    %73 = arith.subf %69, %72 : vector<2x16x16xf32>
    %74 = math.exp %73 : vector<2x16x16xf32>
    %cst_32 = arith.constant dense<0.000000e+00> : vector<2x16xf32>
    %75 = vector.multi_reduction <add>, %74, %cst_32 [2] : vector<2x16x16xf32> to vector<2x16xf32>
    %76 = vector.shape_cast %75 : vector<2x16xf32> to vector<2x16x1xf32>
    %77 = tpu.reciprocal %76 {approx = true} : vector<2x16x1xf32> -> vector<2x16x1xf32>
    %78 = vector.broadcast %77 : vector<2x16x1xf32> to vector<2x16x16xf32>
    %79 = arith.mulf %74, %78 : vector<2x16x16xf32>
    %80 = vector.extract_strided_slice %18 {offsets = [0, 0, 64], sizes = [2, 16, 32], strides = [1, 1, 1]} : vector<2x16x128xf32> to vector<2x16x32xf32>
    "tpu.trace_start"() <{level = 10 : i32, message = "bqk,bkd->bqd"}> : () -> ()
    %cst_33 = arith.constant dense<0.000000e+00> : vector<2x16x32xf32>
    %81 = tpu.matmul %79, %80, %cst_33 {dimension_numbers = #tpu.dot_dimension_numbers<[2], [1], [1], [2], [0, 0, 0, 1, 1, 2], [0], [0]>} : vector<2x16x16xf32>, vector<2x16x32xf32>, vector<2x16x32xf32> -> vector<2x16x32xf32>
    "tpu.trace_stop"() : () -> ()
    %82 = arith.addf %62, %81 : vector<2x16x32xf32>
    %83 = vector.extract_strided_slice %16 {offsets = [0, 0, 24], sizes = [2, 16, 8], strides = [1, 1, 1]} : vector<2x16x32xf32> to vector<2x16x8xf32>
    %84 = vector.extract_strided_slice %17 {offsets = [0, 0, 24], sizes = [2, 16, 8], strides = [1, 1, 1]} : vector<2x16x32xf32> to vector<2x16x8xf32>
    "tpu.trace_start"() <{level = 10 : i32, message = "bqd,bkd->bqk"}> : () -> ()
    %cst_34 = arith.constant dense<0.000000e+00> : vector<2x16x16xf32>
    %85 = tpu.matmul %83, %84, %cst_34 {dimension_numbers = #tpu.dot_dimension_numbers<[2], [2], [1], [1], [0, 0, 0, 1, 1, 1], [0], [0]>} : vector<2x16x8xf32>, vector<2x16x8xf32>, vector<2x16x16xf32> -> vector<2x16x16xf32>
    %cst_35 = arith.constant -1.000000e+09 : f32
    "tpu.trace_stop"() : () -> ()
    %86 = vector.shape_cast %21 : vector<2x1x16xi1> to vector<2x1x16xi1>
    %87 = vector.broadcast %86 : vector<2x1x16xi1> to vector<2x16x16xi1>
    %88 = vector.broadcast %cst_35 : f32 to vector<2x16x16xf32>
    %89 = arith.select %87, %88, %85 : vector<2x16x16xi1>, vector<2x16x16xf32>
    %cst_36 = arith.constant dense<0xFF800000> : vector<2x16xf32>
    %90 = vector.multi_reduction <maximumf>, %89, %cst_36 [2] : vector<2x16x16xf32> to vector<2x16xf32>
    %91 = vector.shape_cast %90 : vector<2x16xf32> to vector<2x16x1xf32>
    %92 = vector.broadcast %91 : vector<2x16x1xf32> to vector<2x16x16xf32>
    %93 = arith.subf %89, %92 : vector<2x16x16xf32>
    %94 = math.exp %93 : vector<2x16x16xf32>
    %cst_37 = arith.constant dense<0.000000e+00> : vector<2x16xf32>
    %95 = vector.multi_reduction <add>, %94, %cst_37 [2] : vector<2x16x16xf32> to vector<2x16xf32>
    %96 = vector.shape_cast %95 : vector<2x16xf32> to vector<2x16x1xf32>
    %97 = tpu.reciprocal %96 {approx = true} : vector<2x16x1xf32> -> vector<2x16x1xf32>
    %98 = vector.broadcast %97 : vector<2x16x1xf32> to vector<2x16x16xf32>
    %99 = arith.mulf %94, %98 : vector<2x16x16xf32>
    %100 = vector.extract_strided_slice %18 {offsets = [0, 0, 96], sizes = [2, 16, 32], strides = [1, 1, 1]} : vector<2x16x128xf32> to vector<2x16x32xf32>
    "tpu.trace_start"() <{level = 10 : i32, message = "bqk,bkd->bqd"}> : () -> ()
    %cst_38 = arith.constant dense<0.000000e+00> : vector<2x16x32xf32>
    %101 = tpu.matmul %99, %100, %cst_38 {dimension_numbers = #tpu.dot_dimension_numbers<[2], [1], [1], [2], [0, 0, 0, 1, 1, 2], [0], [0]>} : vector<2x16x16xf32>, vector<2x16x32xf32>, vector<2x16x32xf32> -> vector<2x16x32xf32>
    "tpu.trace_stop"() : () -> ()
    %102 = arith.addf %82, %101 : vector<2x16x32xf32>
    %103 = vector.shape_cast %102 : vector<2x16x32xf32> to vector<32x32xf32>
    %104 = vector.broadcast %15 : vector<1x32xf32> to vector<32x32xf32>
    %105 = arith.addf %103, %104 : vector<32x32xf32>
    %106 = arith.addf %2, %105 : vector<32x32xf32>
    %cst_39 = arith.constant dense<0.000000e+00> : vector<32xf32>
    %107 = vector.multi_reduction <add>, %106, %cst_39 [1] : vector<32x32xf32> to vector<32xf32>
    %108 = vector.shape_cast %107 : vector<32xf32> to vector<32x1xf32>
    %cst_40 = arith.constant 3.200000e+01 : f32
    %109 = vector.broadcast %cst_40 : f32 to vector<32x1xf32>
    %110 = arith.divf %108, %109 : vector<32x1xf32>
    %111 = vector.broadcast %110 : vector<32x1xf32> to vector<32x32xf32>
    %112 = arith.subf %106, %111 : vector<32x32xf32>
    %113 = arith.mulf %112, %112 : vector<32x32xf32>
    %cst_41 = arith.constant dense<0.000000e+00> : vector<32xf32>
    %114 = vector.multi_reduction <add>, %113, %cst_41 [1] : vector<32x32xf32> to vector<32xf32>
    %115 = vector.shape_cast %114 : vector<32xf32> to vector<32x1xf32>
    %cst_42 = arith.constant 3.100000e+01 : f32
    %116 = vector.broadcast %cst_42 : f32 to vector<32x1xf32>
    %117 = arith.divf %115, %116 : vector<32x1xf32>
    %118 = math.sqrt %117 : vector<32x1xf32>
    %cst_43 = arith.constant 9.99999997E-7 : f32
    %119 = vector.broadcast %cst_43 : f32 to vector<32x1xf32>
    %120 = arith.addf %118, %119 : vector<32x1xf32>
    %121 = tpu.reciprocal %120 {approx = true} : vector<32x1xf32> -> vector<32x1xf32>
    %122 = vector.extract_strided_slice %4 {offsets = [0, 0], sizes = [1, 32], strides = [1, 1]} : vector<3x32xf32> to vector<1x32xf32>
    %123 = vector.broadcast %122 : vector<1x32xf32> to vector<32x32xf32>
    %124 = arith.mulf %123, %112 : vector<32x32xf32>
    %125 = vector.broadcast %121 : vector<32x1xf32> to vector<32x32xf32>
    %126 = arith.mulf %124, %125 : vector<32x32xf32>
    %127 = vector.extract_strided_slice %5 {offsets = [0, 0], sizes = [1, 32], strides = [1, 1]} : vector<3x32xf32> to vector<1x32xf32>
    %128 = vector.broadcast %127 : vector<1x32xf32> to vector<32x32xf32>
    %129 = arith.addf %126, %128 : vector<32x32xf32>
    %c0_44 = arith.constant 0 : index
    %c0_45 = arith.constant 0 : index
    %130 = vector.load %arg11[%c0_44, %c0_45] : memref<32x160xf32, #tpu.memory_space<vmem>>, vector<32x160xf32>
    %cst_46 = arith.constant dense<0.000000e+00> : vector<16x160xf32>
    %131 = tpu.matmul %3, %130, %cst_46 {dimension_numbers = #tpu.dot_dimension_numbers<[1], [0], [0], [1], [0, 0, 1, 1], [], []>} : vector<16x32xf32>, vector<32x160xf32>, vector<16x160xf32> -> vector<16x160xf32>
    %c0_47 = arith.constant 0 : index
    %c0_48 = arith.constant 0 : index
    %132 = vector.load %arg12[%c0_47, %c0_48] : memref<1x160xf32, #tpu.memory_space<vmem>>, vector<1x160xf32>
    %133 = vector.broadcast %132 : vector<1x160xf32> to vector<16x160xf32>
    %134 = arith.addf %131, %133 : vector<16x160xf32>
    %c0_49 = arith.constant 0 : index
    %c0_50 = arith.constant 0 : index
    %135 = vector.load %arg9[%c0_49, %c0_50] : memref<32x32xf32, #tpu.memory_space<vmem>>, vector<32x32xf32>
    %cst_51 = arith.constant dense<0.000000e+00> : vector<32x32xf32>
    %136 = tpu.matmul %129, %135, %cst_51 {dimension_numbers = #tpu.dot_dimension_numbers<[1], [0], [0], [1], [0, 0, 1, 1], [], []>} : vector<32x32xf32>, vector<32x32xf32>, vector<32x32xf32> -> vector<32x32xf32>
    %c0_52 = arith.constant 0 : index
    %c0_53 = arith.constant 0 : index
    %137 = vector.load %arg10[%c0_52, %c0_53] : memref<1x32xf32, #tpu.memory_space<vmem>>, vector<1x32xf32>
    %138 = vector.broadcast %137 : vector<1x32xf32> to vector<32x32xf32>
    %139 = arith.addf %136, %138 : vector<32x32xf32>
    %140 = vector.extract_strided_slice %134 {offsets = [0, 128], sizes = [16, 32], strides = [1, 1]} : vector<16x160xf32> to vector<16x32xf32>
    %141 = vector.extract_strided_slice %134 {offsets = [0, 0], sizes = [16, 128], strides = [1, 1]} : vector<16x160xf32> to vector<16x128xf32>
    %c0_54 = arith.constant 0 : index
    %c0_55 = arith.constant 0 : index
    %142 = vector.load %arg3[%c0_54, %c0_55] : memref<2x8xf32, #tpu.memory_space<vmem>>, vector<2x8xf32>
    %c0_56 = arith.constant 0 : index
    %c0_57 = arith.constant 0 : index
    %143 = vector.load %arg13[%c0_56, %c0_57] : memref<1x32xf32, #tpu.memory_space<vmem>>, vector<1x32xf32>
    %144 = vector.shape_cast %139 : vector<32x32xf32> to vector<2x16x32xf32>
    %145 = vector.shape_cast %140 : vector<16x32xf32> to vector<2x8x32xf32>
    %146 = vector.shape_cast %141 : vector<16x128xf32> to vector<2x8x128xf32>
    %147 = vector.shape_cast %142 : vector<2x8xf32> to vector<2x1x8xf32>
    %cst_58 = arith.constant 5.000000e-01 : f32
    %148 = vector.broadcast %cst_58 : f32 to vector<2x1x8xf32>
    %149 = arith.cmpf ogt, %147, %148 : vector<2x1x8xf32>
    %cst_59 = arith.constant 0.000000e+00 : f32
    %150 = vector.broadcast %cst_59 : f32 to vector<2x16x32xf32>
    %151 = vector.extract_strided_slice %144 {offsets = [0, 0, 0], sizes = [2, 16, 8], strides = [1, 1, 1]} : vector<2x16x32xf32> to vector<2x16x8xf32>
    %152 = vector.extract_strided_slice %145 {offsets = [0, 0, 0], sizes = [2, 8, 8], strides = [1, 1, 1]} : vector<2x8x32xf32> to vector<2x8x8xf32>
    "tpu.trace_start"() <{level = 10 : i32, message = "bqd,bkd->bqk"}> : () -> ()
    %cst_60 = arith.constant dense<0.000000e+00> : vector<2x16x8xf32>
    %153 = tpu.matmul %151, %152, %cst_60 {dimension_numbers = #tpu.dot_dimension_numbers<[2], [2], [1], [1], [0, 0, 0, 1, 1, 1], [0], [0]>} : vector<2x16x8xf32>, vector<2x8x8xf32>, vector<2x16x8xf32> -> vector<2x16x8xf32>
    %cst_61 = arith.constant -1.000000e+09 : f32
    "tpu.trace_stop"() : () -> ()
    %154 = vector.shape_cast %149 : vector<2x1x8xi1> to vector<2x1x8xi1>
    %155 = vector.broadcast %154 : vector<2x1x8xi1> to vector<2x16x8xi1>
    %156 = vector.broadcast %cst_61 : f32 to vector<2x16x8xf32>
    %157 = arith.select %155, %156, %153 : vector<2x16x8xi1>, vector<2x16x8xf32>
    %cst_62 = arith.constant dense<0xFF800000> : vector<2x16xf32>
    %158 = vector.multi_reduction <maximumf>, %157, %cst_62 [2] : vector<2x16x8xf32> to vector<2x16xf32>
    %159 = vector.shape_cast %158 : vector<2x16xf32> to vector<2x16x1xf32>
    %160 = vector.broadcast %159 : vector<2x16x1xf32> to vector<2x16x8xf32>
    %161 = arith.subf %157, %160 : vector<2x16x8xf32>
    %162 = math.exp %161 : vector<2x16x8xf32>
    %cst_63 = arith.constant dense<0.000000e+00> : vector<2x16xf32>
    %163 = vector.multi_reduction <add>, %162, %cst_63 [2] : vector<2x16x8xf32> to vector<2x16xf32>
    %164 = vector.shape_cast %163 : vector<2x16xf32> to vector<2x16x1xf32>
    %165 = tpu.reciprocal %164 {approx = true} : vector<2x16x1xf32> -> vector<2x16x1xf32>
    %166 = vector.broadcast %165 : vector<2x16x1xf32> to vector<2x16x8xf32>
    %167 = arith.mulf %162, %166 : vector<2x16x8xf32>
    %168 = vector.extract_strided_slice %146 {offsets = [0, 0, 0], sizes = [2, 8, 32], strides = [1, 1, 1]} : vector<2x8x128xf32> to vector<2x8x32xf32>
    "tpu.trace_start"() <{level = 10 : i32, message = "bqk,bkd->bqd"}> : () -> ()
    %cst_64 = arith.constant dense<0.000000e+00> : vector<2x16x32xf32>
    %169 = tpu.matmul %167, %168, %cst_64 {dimension_numbers = #tpu.dot_dimension_numbers<[2], [1], [1], [2], [0, 0, 0, 1, 1, 2], [0], [0]>} : vector<2x16x8xf32>, vector<2x8x32xf32>, vector<2x16x32xf32> -> vector<2x16x32xf32>
    "tpu.trace_stop"() : () -> ()
    %170 = arith.addf %150, %169 : vector<2x16x32xf32>
    %171 = vector.extract_strided_slice %144 {offsets = [0, 0, 8], sizes = [2, 16, 8], strides = [1, 1, 1]} : vector<2x16x32xf32> to vector<2x16x8xf32>
    %172 = vector.extract_strided_slice %145 {offsets = [0, 0, 8], sizes = [2, 8, 8], strides = [1, 1, 1]} : vector<2x8x32xf32> to vector<2x8x8xf32>
    "tpu.trace_start"() <{level = 10 : i32, message = "bqd,bkd->bqk"}> : () -> ()
    %cst_65 = arith.constant dense<0.000000e+00> : vector<2x16x8xf32>
    %173 = tpu.matmul %171, %172, %cst_65 {dimension_numbers = #tpu.dot_dimension_numbers<[2], [2], [1], [1], [0, 0, 0, 1, 1, 1], [0], [0]>} : vector<2x16x8xf32>, vector<2x8x8xf32>, vector<2x16x8xf32> -> vector<2x16x8xf32>
    %cst_66 = arith.constant -1.000000e+09 : f32
    "tpu.trace_stop"() : () -> ()
    %174 = vector.shape_cast %149 : vector<2x1x8xi1> to vector<2x1x8xi1>
    %175 = vector.broadcast %174 : vector<2x1x8xi1> to vector<2x16x8xi1>
    %176 = vector.broadcast %cst_66 : f32 to vector<2x16x8xf32>
    %177 = arith.select %175, %176, %173 : vector<2x16x8xi1>, vector<2x16x8xf32>
    %cst_67 = arith.constant dense<0xFF800000> : vector<2x16xf32>
    %178 = vector.multi_reduction <maximumf>, %177, %cst_67 [2] : vector<2x16x8xf32> to vector<2x16xf32>
    %179 = vector.shape_cast %178 : vector<2x16xf32> to vector<2x16x1xf32>
    %180 = vector.broadcast %179 : vector<2x16x1xf32> to vector<2x16x8xf32>
    %181 = arith.subf %177, %180 : vector<2x16x8xf32>
    %182 = math.exp %181 : vector<2x16x8xf32>
    %cst_68 = arith.constant dense<0.000000e+00> : vector<2x16xf32>
    %183 = vector.multi_reduction <add>, %182, %cst_68 [2] : vector<2x16x8xf32> to vector<2x16xf32>
    %184 = vector.shape_cast %183 : vector<2x16xf32> to vector<2x16x1xf32>
    %185 = tpu.reciprocal %184 {approx = true} : vector<2x16x1xf32> -> vector<2x16x1xf32>
    %186 = vector.broadcast %185 : vector<2x16x1xf32> to vector<2x16x8xf32>
    %187 = arith.mulf %182, %186 : vector<2x16x8xf32>
    %188 = vector.extract_strided_slice %146 {offsets = [0, 0, 32], sizes = [2, 8, 32], strides = [1, 1, 1]} : vector<2x8x128xf32> to vector<2x8x32xf32>
    "tpu.trace_start"() <{level = 10 : i32, message = "bqk,bkd->bqd"}> : () -> ()
    %cst_69 = arith.constant dense<0.000000e+00> : vector<2x16x32xf32>
    %189 = tpu.matmul %187, %188, %cst_69 {dimension_numbers = #tpu.dot_dimension_numbers<[2], [1], [1], [2], [0, 0, 0, 1, 1, 2], [0], [0]>} : vector<2x16x8xf32>, vector<2x8x32xf32>, vector<2x16x32xf32> -> vector<2x16x32xf32>
    "tpu.trace_stop"() : () -> ()
    %190 = arith.addf %170, %189 : vector<2x16x32xf32>
    %191 = vector.extract_strided_slice %144 {offsets = [0, 0, 16], sizes = [2, 16, 8], strides = [1, 1, 1]} : vector<2x16x32xf32> to vector<2x16x8xf32>
    %192 = vector.extract_strided_slice %145 {offsets = [0, 0, 16], sizes = [2, 8, 8], strides = [1, 1, 1]} : vector<2x8x32xf32> to vector<2x8x8xf32>
    "tpu.trace_start"() <{level = 10 : i32, message = "bqd,bkd->bqk"}> : () -> ()
    %cst_70 = arith.constant dense<0.000000e+00> : vector<2x16x8xf32>
    %193 = tpu.matmul %191, %192, %cst_70 {dimension_numbers = #tpu.dot_dimension_numbers<[2], [2], [1], [1], [0, 0, 0, 1, 1, 1], [0], [0]>} : vector<2x16x8xf32>, vector<2x8x8xf32>, vector<2x16x8xf32> -> vector<2x16x8xf32>
    %cst_71 = arith.constant -1.000000e+09 : f32
    "tpu.trace_stop"() : () -> ()
    %194 = vector.shape_cast %149 : vector<2x1x8xi1> to vector<2x1x8xi1>
    %195 = vector.broadcast %194 : vector<2x1x8xi1> to vector<2x16x8xi1>
    %196 = vector.broadcast %cst_71 : f32 to vector<2x16x8xf32>
    %197 = arith.select %195, %196, %193 : vector<2x16x8xi1>, vector<2x16x8xf32>
    %cst_72 = arith.constant dense<0xFF800000> : vector<2x16xf32>
    %198 = vector.multi_reduction <maximumf>, %197, %cst_72 [2] : vector<2x16x8xf32> to vector<2x16xf32>
    %199 = vector.shape_cast %198 : vector<2x16xf32> to vector<2x16x1xf32>
    %200 = vector.broadcast %199 : vector<2x16x1xf32> to vector<2x16x8xf32>
    %201 = arith.subf %197, %200 : vector<2x16x8xf32>
    %202 = math.exp %201 : vector<2x16x8xf32>
    %cst_73 = arith.constant dense<0.000000e+00> : vector<2x16xf32>
    %203 = vector.multi_reduction <add>, %202, %cst_73 [2] : vector<2x16x8xf32> to vector<2x16xf32>
    %204 = vector.shape_cast %203 : vector<2x16xf32> to vector<2x16x1xf32>
    %205 = tpu.reciprocal %204 {approx = true} : vector<2x16x1xf32> -> vector<2x16x1xf32>
    %206 = vector.broadcast %205 : vector<2x16x1xf32> to vector<2x16x8xf32>
    %207 = arith.mulf %202, %206 : vector<2x16x8xf32>
    %208 = vector.extract_strided_slice %146 {offsets = [0, 0, 64], sizes = [2, 8, 32], strides = [1, 1, 1]} : vector<2x8x128xf32> to vector<2x8x32xf32>
    "tpu.trace_start"() <{level = 10 : i32, message = "bqk,bkd->bqd"}> : () -> ()
    %cst_74 = arith.constant dense<0.000000e+00> : vector<2x16x32xf32>
    %209 = tpu.matmul %207, %208, %cst_74 {dimension_numbers = #tpu.dot_dimension_numbers<[2], [1], [1], [2], [0, 0, 0, 1, 1, 2], [0], [0]>} : vector<2x16x8xf32>, vector<2x8x32xf32>, vector<2x16x32xf32> -> vector<2x16x32xf32>
    "tpu.trace_stop"() : () -> ()
    %210 = arith.addf %190, %209 : vector<2x16x32xf32>
    %211 = vector.extract_strided_slice %144 {offsets = [0, 0, 24], sizes = [2, 16, 8], strides = [1, 1, 1]} : vector<2x16x32xf32> to vector<2x16x8xf32>
    %212 = vector.extract_strided_slice %145 {offsets = [0, 0, 24], sizes = [2, 8, 8], strides = [1, 1, 1]} : vector<2x8x32xf32> to vector<2x8x8xf32>
    "tpu.trace_start"() <{level = 10 : i32, message = "bqd,bkd->bqk"}> : () -> ()
    %cst_75 = arith.constant dense<0.000000e+00> : vector<2x16x8xf32>
    %213 = tpu.matmul %211, %212, %cst_75 {dimension_numbers = #tpu.dot_dimension_numbers<[2], [2], [1], [1], [0, 0, 0, 1, 1, 1], [0], [0]>} : vector<2x16x8xf32>, vector<2x8x8xf32>, vector<2x16x8xf32> -> vector<2x16x8xf32>
    %cst_76 = arith.constant -1.000000e+09 : f32
    "tpu.trace_stop"() : () -> ()
    %214 = vector.shape_cast %149 : vector<2x1x8xi1> to vector<2x1x8xi1>
    %215 = vector.broadcast %214 : vector<2x1x8xi1> to vector<2x16x8xi1>
    %216 = vector.broadcast %cst_76 : f32 to vector<2x16x8xf32>
    %217 = arith.select %215, %216, %213 : vector<2x16x8xi1>, vector<2x16x8xf32>
    %cst_77 = arith.constant dense<0xFF800000> : vector<2x16xf32>
    %218 = vector.multi_reduction <maximumf>, %217, %cst_77 [2] : vector<2x16x8xf32> to vector<2x16xf32>
    %219 = vector.shape_cast %218 : vector<2x16xf32> to vector<2x16x1xf32>
    %220 = vector.broadcast %219 : vector<2x16x1xf32> to vector<2x16x8xf32>
    %221 = arith.subf %217, %220 : vector<2x16x8xf32>
    %222 = math.exp %221 : vector<2x16x8xf32>
    %cst_78 = arith.constant dense<0.000000e+00> : vector<2x16xf32>
    %223 = vector.multi_reduction <add>, %222, %cst_78 [2] : vector<2x16x8xf32> to vector<2x16xf32>
    %224 = vector.shape_cast %223 : vector<2x16xf32> to vector<2x16x1xf32>
    %225 = tpu.reciprocal %224 {approx = true} : vector<2x16x1xf32> -> vector<2x16x1xf32>
    %226 = vector.broadcast %225 : vector<2x16x1xf32> to vector<2x16x8xf32>
    %227 = arith.mulf %222, %226 : vector<2x16x8xf32>
    %228 = vector.extract_strided_slice %146 {offsets = [0, 0, 96], sizes = [2, 8, 32], strides = [1, 1, 1]} : vector<2x8x128xf32> to vector<2x8x32xf32>
    "tpu.trace_start"() <{level = 10 : i32, message = "bqk,bkd->bqd"}> : () -> ()
    %cst_79 = arith.constant dense<0.000000e+00> : vector<2x16x32xf32>
    %229 = tpu.matmul %227, %228, %cst_79 {dimension_numbers = #tpu.dot_dimension_numbers<[2], [1], [1], [2], [0, 0, 0, 1, 1, 2], [0], [0]>} : vector<2x16x8xf32>, vector<2x8x32xf32>, vector<2x16x32xf32> -> vector<2x16x32xf32>
    "tpu.trace_stop"() : () -> ()
    %230 = arith.addf %210, %229 : vector<2x16x32xf32>
    %231 = vector.shape_cast %230 : vector<2x16x32xf32> to vector<32x32xf32>
    %232 = vector.broadcast %143 : vector<1x32xf32> to vector<32x32xf32>
    %233 = arith.addf %231, %232 : vector<32x32xf32>
    %234 = arith.addf %129, %233 : vector<32x32xf32>
    %cst_80 = arith.constant dense<0.000000e+00> : vector<32xf32>
    %235 = vector.multi_reduction <add>, %234, %cst_80 [1] : vector<32x32xf32> to vector<32xf32>
    %236 = vector.shape_cast %235 : vector<32xf32> to vector<32x1xf32>
    %cst_81 = arith.constant 3.200000e+01 : f32
    %237 = vector.broadcast %cst_81 : f32 to vector<32x1xf32>
    %238 = arith.divf %236, %237 : vector<32x1xf32>
    %239 = vector.broadcast %238 : vector<32x1xf32> to vector<32x32xf32>
    %240 = arith.subf %234, %239 : vector<32x32xf32>
    %241 = arith.mulf %240, %240 : vector<32x32xf32>
    %cst_82 = arith.constant dense<0.000000e+00> : vector<32xf32>
    %242 = vector.multi_reduction <add>, %241, %cst_82 [1] : vector<32x32xf32> to vector<32xf32>
    %243 = vector.shape_cast %242 : vector<32xf32> to vector<32x1xf32>
    %cst_83 = arith.constant 3.100000e+01 : f32
    %244 = vector.broadcast %cst_83 : f32 to vector<32x1xf32>
    %245 = arith.divf %243, %244 : vector<32x1xf32>
    %246 = math.sqrt %245 : vector<32x1xf32>
    %cst_84 = arith.constant 9.99999997E-7 : f32
    %247 = vector.broadcast %cst_84 : f32 to vector<32x1xf32>
    %248 = arith.addf %246, %247 : vector<32x1xf32>
    %249 = tpu.reciprocal %248 {approx = true} : vector<32x1xf32> -> vector<32x1xf32>
    %250 = vector.extract_strided_slice %4 {offsets = [1, 0], sizes = [1, 32], strides = [1, 1]} : vector<3x32xf32> to vector<1x32xf32>
    %251 = vector.broadcast %250 : vector<1x32xf32> to vector<32x32xf32>
    %252 = arith.mulf %251, %240 : vector<32x32xf32>
    %253 = vector.broadcast %249 : vector<32x1xf32> to vector<32x32xf32>
    %254 = arith.mulf %252, %253 : vector<32x32xf32>
    %255 = vector.extract_strided_slice %5 {offsets = [1, 0], sizes = [1, 32], strides = [1, 1]} : vector<3x32xf32> to vector<1x32xf32>
    %256 = vector.broadcast %255 : vector<1x32xf32> to vector<32x32xf32>
    %257 = arith.addf %254, %256 : vector<32x32xf32>
    %258 = vector.shape_cast %257 : vector<32x32xf32> to vector<2x16x32xf32>
    %cst_85 = arith.constant dense<0.000000e+00> : vector<2x32xf32>
    %259 = vector.multi_reduction <add>, %0, %cst_85 [1] : vector<2x16x32xf32> to vector<2x32xf32>
    %cst_86 = arith.constant 1.400000e+01 : f32
    %260 = vector.broadcast %cst_86 : f32 to vector<2x32xf32>
    %261 = arith.divf %259, %260 : vector<2x32xf32>
    %c0_87 = arith.constant 0 : index
    %c0_88 = arith.constant 0 : index
    %262 = vector.load %arg18[%c0_87, %c0_88] : memref<32x32xf32, #tpu.memory_space<vmem>>, vector<32x32xf32>
    %cst_89 = arith.constant dense<0.000000e+00> : vector<2x32xf32>
    %263 = tpu.matmul %261, %262, %cst_89 {dimension_numbers = #tpu.dot_dimension_numbers<[1], [0], [0], [1], [0, 0, 1, 1], [], []>} : vector<2x32xf32>, vector<32x32xf32>, vector<2x32xf32> -> vector<2x32xf32>
    %c0_90 = arith.constant 0 : index
    %c0_91 = arith.constant 0 : index
    %264 = vector.load %arg5[%c0_90, %c0_91] : memref<2x4xf32, #tpu.memory_space<vmem>>, vector<2x4xf32>
    %c0_92 = arith.constant 0 : index
    %c0_93 = arith.constant 0 : index
    %265 = vector.load %arg19[%c0_92, %c0_93] : memref<4x32xf32, #tpu.memory_space<vmem>>, vector<4x32xf32>
    %cst_94 = arith.constant dense<0.000000e+00> : vector<2x32xf32>
    %266 = tpu.matmul %264, %265, %cst_94 {dimension_numbers = #tpu.dot_dimension_numbers<[1], [0], [0], [1], [0, 0, 1, 1], [], []>} : vector<2x4xf32>, vector<4x32xf32>, vector<2x32xf32> -> vector<2x32xf32>
    %267 = arith.addf %263, %266 : vector<2x32xf32>
    %c0_95 = arith.constant 0 : index
    %c0_96 = arith.constant 0 : index
    %268 = vector.load %arg20[%c0_95, %c0_96] : memref<1x32xf32, #tpu.memory_space<vmem>>, vector<1x32xf32>
    %269 = vector.broadcast %268 : vector<1x32xf32> to vector<2x32xf32>
    %270 = arith.addf %267, %269 : vector<2x32xf32>
    %c0_97 = arith.constant 0 : index
    %c0_98 = arith.constant 0 : index
    %271 = vector.load %arg4[%c0_97, %c0_98] : memref<2x32xf32, #tpu.memory_space<vmem>>, vector<2x32xf32>
    %272 = arith.addf %270, %271 : vector<2x32xf32>
    %cst_99 = arith.constant 0.000000e+00 : f32
    %273 = vector.broadcast %cst_99 : f32 to vector<2x32xf32>
    %274 = arith.subf %273, %272 : vector<2x32xf32>
    %275 = math.exp %274 : vector<2x32xf32>
    %cst_100 = arith.constant 1.000000e+00 : f32
    %276 = vector.broadcast %cst_100 : f32 to vector<2x32xf32>
    %277 = arith.addf %276, %275 : vector<2x32xf32>
    %cst_101 = arith.constant 1.000000e+00 : f32
    %278 = vector.broadcast %cst_101 : f32 to vector<2x32xf32>
    %279 = arith.divf %278, %277 : vector<2x32xf32>
    %c0_102 = arith.constant 0 : index
    %c0_103 = arith.constant 0 : index
    %280 = vector.load %arg21[%c0_102, %c0_103] : memref<32x32xf32, #tpu.memory_space<vmem>>, vector<32x32xf32>
    %cst_104 = arith.constant dense<0.000000e+00> : vector<2x32xf32>
    %281 = tpu.matmul %279, %280, %cst_104 {dimension_numbers = #tpu.dot_dimension_numbers<[1], [0], [0], [1], [0, 0, 1, 1], [], []>} : vector<2x32xf32>, vector<32x32xf32>, vector<2x32xf32> -> vector<2x32xf32>
    %c0_105 = arith.constant 0 : index
    %c0_106 = arith.constant 0 : index
    %282 = vector.load %arg22[%c0_105, %c0_106] : memref<1x32xf32, #tpu.memory_space<vmem>>, vector<1x32xf32>
    %283 = vector.broadcast %282 : vector<1x32xf32> to vector<2x32xf32>
    %284 = arith.addf %281, %283 : vector<2x32xf32>
    %cst_107 = arith.constant 0.000000e+00 : f32
    %285 = vector.broadcast %cst_107 : f32 to vector<2x32xf32>
    %286 = arith.subf %285, %284 : vector<2x32xf32>
    %287 = math.exp %286 : vector<2x32xf32>
    %cst_108 = arith.constant 1.000000e+00 : f32
    %288 = vector.broadcast %cst_108 : f32 to vector<2x32xf32>
    %289 = arith.addf %288, %287 : vector<2x32xf32>
    %cst_109 = arith.constant 1.000000e+00 : f32
    %290 = vector.broadcast %cst_109 : f32 to vector<2x32xf32>
    %291 = arith.divf %290, %289 : vector<2x32xf32>
    %cst_110 = arith.constant dense<0.000000e+00> : vector<2x32xf32>
    %292 = vector.multi_reduction <add>, %258, %cst_110 [1] : vector<2x16x32xf32> to vector<2x32xf32>
    %cst_111 = arith.constant 1.400000e+01 : f32
    %293 = vector.broadcast %cst_111 : f32 to vector<2x32xf32>
    %294 = arith.divf %292, %293 : vector<2x32xf32>
    %cst_112 = arith.constant 0.000000e+00 : f32
    %295 = vector.broadcast %cst_112 : f32 to vector<2x32xf32>
    %296 = arith.subf %295, %294 : vector<2x32xf32>
    %297 = math.exp %296 : vector<2x32xf32>
    %cst_113 = arith.constant 1.000000e+00 : f32
    %298 = vector.broadcast %cst_113 : f32 to vector<2x32xf32>
    %299 = arith.addf %298, %297 : vector<2x32xf32>
    %cst_114 = arith.constant 1.000000e+00 : f32
    %300 = vector.broadcast %cst_114 : f32 to vector<2x32xf32>
    %301 = arith.divf %300, %299 : vector<2x32xf32>
    %302 = arith.mulf %301, %291 : vector<2x32xf32>
    %303 = vector.shape_cast %302 : vector<2x32xf32> to vector<2x1x32xf32>
    %304 = vector.broadcast %303 : vector<2x1x32xf32> to vector<2x16x32xf32>
    %305 = arith.mulf %304, %258 : vector<2x16x32xf32>
    %306 = arith.addf %305, %0 : vector<2x16x32xf32>
    %307 = vector.shape_cast %306 : vector<2x16x32xf32> to vector<32x32xf32>
    %c0_115 = arith.constant 0 : index
    %c0_116 = arith.constant 0 : index
    %308 = vector.load %arg14[%c0_115, %c0_116] : memref<32x64xf32, #tpu.memory_space<vmem>>, vector<32x64xf32>
    %cst_117 = arith.constant dense<0.000000e+00> : vector<32x64xf32>
    %309 = tpu.matmul %307, %308, %cst_117 {dimension_numbers = #tpu.dot_dimension_numbers<[1], [0], [0], [1], [0, 0, 1, 1], [], []>} : vector<32x32xf32>, vector<32x64xf32>, vector<32x64xf32> -> vector<32x64xf32>
    %c0_118 = arith.constant 0 : index
    %c0_119 = arith.constant 0 : index
    %310 = vector.load %arg15[%c0_118, %c0_119] : memref<1x64xf32, #tpu.memory_space<vmem>>, vector<1x64xf32>
    %311 = vector.broadcast %310 : vector<1x64xf32> to vector<32x64xf32>
    %312 = arith.addf %309, %311 : vector<32x64xf32>
    %cst_120 = arith.constant 0.000000e+00 : f32
    %313 = vector.broadcast %cst_120 : f32 to vector<32x64xf32>
    %314 = arith.maximumf %312, %313 : vector<32x64xf32>
    %c0_121 = arith.constant 0 : index
    %c0_122 = arith.constant 0 : index
    %315 = vector.load %arg16[%c0_121, %c0_122] : memref<64x32xf32, #tpu.memory_space<vmem>>, vector<64x32xf32>
    %cst_123 = arith.constant dense<0.000000e+00> : vector<32x32xf32>
    %316 = tpu.matmul %314, %315, %cst_123 {dimension_numbers = #tpu.dot_dimension_numbers<[1], [0], [0], [1], [0, 0, 1, 1], [], []>} : vector<32x64xf32>, vector<64x32xf32>, vector<32x32xf32> -> vector<32x32xf32>
    %c0_124 = arith.constant 0 : index
    %c0_125 = arith.constant 0 : index
    %317 = vector.load %arg17[%c0_124, %c0_125] : memref<1x32xf32, #tpu.memory_space<vmem>>, vector<1x32xf32>
    %318 = vector.broadcast %317 : vector<1x32xf32> to vector<32x32xf32>
    %319 = arith.addf %316, %318 : vector<32x32xf32>
    %320 = arith.addf %307, %319 : vector<32x32xf32>
    %cst_126 = arith.constant dense<0.000000e+00> : vector<32xf32>
    %321 = vector.multi_reduction <add>, %320, %cst_126 [1] : vector<32x32xf32> to vector<32xf32>
    %322 = vector.shape_cast %321 : vector<32xf32> to vector<32x1xf32>
    %cst_127 = arith.constant 3.200000e+01 : f32
    %323 = vector.broadcast %cst_127 : f32 to vector<32x1xf32>
    %324 = arith.divf %322, %323 : vector<32x1xf32>
    %325 = vector.broadcast %324 : vector<32x1xf32> to vector<32x32xf32>
    %326 = arith.subf %320, %325 : vector<32x32xf32>
    %327 = arith.mulf %326, %326 : vector<32x32xf32>
    %cst_128 = arith.constant dense<0.000000e+00> : vector<32xf32>
    %328 = vector.multi_reduction <add>, %327, %cst_128 [1] : vector<32x32xf32> to vector<32xf32>
    %329 = vector.shape_cast %328 : vector<32xf32> to vector<32x1xf32>
    %cst_129 = arith.constant 3.100000e+01 : f32
    %330 = vector.broadcast %cst_129 : f32 to vector<32x1xf32>
    %331 = arith.divf %329, %330 : vector<32x1xf32>
    %332 = math.sqrt %331 : vector<32x1xf32>
    %cst_130 = arith.constant 9.99999997E-7 : f32
    %333 = vector.broadcast %cst_130 : f32 to vector<32x1xf32>
    %334 = arith.addf %332, %333 : vector<32x1xf32>
    %335 = tpu.reciprocal %334 {approx = true} : vector<32x1xf32> -> vector<32x1xf32>
    %336 = vector.extract_strided_slice %4 {offsets = [2, 0], sizes = [1, 32], strides = [1, 1]} : vector<3x32xf32> to vector<1x32xf32>
    %337 = vector.broadcast %336 : vector<1x32xf32> to vector<32x32xf32>
    %338 = arith.mulf %337, %326 : vector<32x32xf32>
    %339 = vector.broadcast %335 : vector<32x1xf32> to vector<32x32xf32>
    %340 = arith.mulf %338, %339 : vector<32x32xf32>
    %341 = vector.extract_strided_slice %5 {offsets = [2, 0], sizes = [1, 32], strides = [1, 1]} : vector<3x32xf32> to vector<1x32xf32>
    %342 = vector.broadcast %341 : vector<1x32xf32> to vector<32x32xf32>
    %343 = arith.addf %340, %342 : vector<32x32xf32>
    %344 = vector.shape_cast %343 : vector<32x32xf32> to vector<2x16x32xf32>
    %c0_131 = arith.constant 0 : index
    %c0_132 = arith.constant 0 : index
    %c0_133 = arith.constant 0 : index
    %345 = vector.load %arg25[%c0_131, %c0_132, %c0_133] : memref<2x16x32xf32, #tpu.memory_space<vmem>>, vector<2x16x32xf32>
    tpu.vector_store %arg25[%c0_131, %c0_132, %c0_133], %344 {strides = array<i32>} : memref<2x16x32xf32, #tpu.memory_space<vmem>>, vector<2x16x32xf32>,
    return
  }
}

</mosaic_0001>

<bundles_post_ra>
// kernel: ai_forward.1
= control target key start
LH: loop header
LB: loop body
LE: loop exit
PB: predicated region body
PF: predicated region fallthrough
CT: control target
= control target key end

     0   :  { %s7315_s0 = inlined_call_operand.vmem [shape: f32[2,16,32], index: 0, kind: input, shape index: {}]   ;;  %s7316_s1 = inlined_call_operand.vmem [shape: f32[2,8,32], index: 1, kind: input, shape index: {}]   ;;  %s7317_s2 = inlined_call_operand.vmem [shape: f32[2,16], index: 2, kind: input, shape index: {}]   ;;  %s7318_s3 = inlined_call_operand.vmem [shape: f32[2,8], index: 3, kind: input, shape index: {}]   ;;  %s7319_s4 = inlined_call_operand.vmem [shape: f32[2,32], index: 4, kind: input, shape index: {}]   ;;  %s7320_s5 = inlined_call_operand.vmem [shape: f32[2,4], index: 5, kind: input, shape index: {}]   ;;  %s7321_s6 = inlined_call_operand.vmem [shape: f32[32,192], index: 6, kind: input, shape index: {}]   ;;  %s7322_s7 = inlined_call_operand.hbm [shape: f32[1,192], index: 7, kind: input, shape index: {}]   ;;  %s7323_s8 = inlined_call_operand.hbm [shape: f32[1,32], index: 8, kind: input, shape index: {}]   ;;  %s7324_s9 = inlined_call_operand.hbm [shape: f32[32,32], index: 9, kind: input, shape index: {}]   ;;  %s7325_s10 = inlined_call_operand.hbm [shape: f32[1,32], index: 10, kind: input, shape index: {}]   ;;  %s7326_s11 = inlined_call_operand.hbm [shape: f32[32,160], index: 11, kind: input, shape index: {}]   ;;  %s7327_s12 = inlined_call_operand.hbm [shape: f32[1,160], index: 12, kind: input, shape index: {}]   ;;  %s7328_s13 = inlined_call_operand.hbm [shape: f32[1,32], index: 13, kind: input, shape index: {}]   ;;  %s7329_s14 = inlined_call_operand.hbm [shape: f32[32,64], index: 14, kind: input, shape index: {}]   ;;  %s7330_s15 = inlined_call_operand.hbm [shape: f32[1,64], index: 15, kind: input, shape index: {}]   ;;  %s7331_s16 = inlined_call_operand.vmem [shape: f32[64,32], index: 16, kind: input, shape index: {}]   ;;  %s7332_s17 = inlined_call_operand.hbm [shape: f32[1,32], index: 17, kind: input, shape index: {}]   ;;  %s7333_s18 = inlined_call_operand.hbm [shape: f32[32,32], index: 18, kind: input, shape index: {}]   ;;  %s7334_s19 = inlined_call_operand.hbm [shape: f32[4,32], index: 19, kind: input, shape index: {}]   ;;  %s7335_s20 = inlined_call_operand.hbm [shape: f32[1,32], index: 20, kind: input, shape index: {}]   ;;  %s7336_s21 = inlined_call_operand.vmem [shape: f32[32,32], index: 21, kind: input, shape index: {}]   ;;  %s7337_s22 = inlined_call_operand.vmem [shape: f32[1,32], index: 22, kind: input, shape index: {}]   ;;  %s7338_s23 = inlined_call_operand.hbm [shape: f32[3,32], index: 23, kind: input, shape index: {}]   ;;  %s7339_s24 = inlined_call_operand.hbm [shape: f32[3,32], index: 24, kind: input, shape index: {}]   ;;  %s7340_s25 = inlined_call_operand.hbm [shape: f32[2,16,32], index: 25, kind: output, shape index: {}]  }
   0x1   :  { %7347 = sst [smem:[#allocation36_spill]] %s7315_s0 }
   0x2   :  { %7348 = sst [smem:[#allocation37_spill]] %s7316_s1 }
   0x3   :  { %7349 = sst [smem:[#allocation38_spill]] %s7317_s2 }
   0x4   :  { %7350 = sst [smem:[#allocation39_spill]] %s7318_s3 }
   0x5   :  { %7351 = sst [smem:[#allocation40_spill]] %s7319_s4 }
   0x6   :  { %7352 = sst [smem:[#allocation41_spill]] %s7320_s5 }
   0x7   :  { %7353 = sst [smem:[#allocation42_spill]] %s7321_s6 }
   0x8   :  { %7354 = sst [smem:[#allocation43_spill]] %s7322_s7 }
   0x9   :  { %7355 = sst [smem:[#allocation44_spill]] %s7323_s8 }
   0xa   :  { %7356 = sst [smem:[#allocation45_spill]] %s7324_s9 }
   0xb   :  { %30 = vsyncpa [#allocation3], 0 }
   0xc   :  { %31 = vsyncpa [#allocation6], 0 }
   0xd   :  { %32 = vsyncpa [#allocation9], 0 }
   0xe   :  { %33 = vsyncpa [#allocation12], 0 }
   0xf   :  { %34 = vsyncpa [#allocation15], 0 }
  0x10   :  { %35 = vsyncpa [#allocation18], 0 }
  0x11   :  { %36 = vsyncpa [#allocation21], 0 }
  0x12   :  { %37 = vsyncpa [#allocation24], 0 }
  0x13   :  { %38 = vsyncpa [#allocation4], 0  ;;  %s6153_s29 = smov [#allocation5]   ;;  %s6154_s6 = smov [#allocation8]  }
  0x14   :  { %s69_s2 = sshll.u32 %s6153_s29, 4  ;;  %s91_s30 = sshll.u32 %s6154_s6, 4  ;;  %s70_s2 = int_to_ptr.vmem [resolvable:$true] %s69_s2  ;;  %s92_s30 = int_to_ptr.vmem [resolvable:$true] %s91_s30 }
  0x15   :  { %s7357_s26 = sld [smem:[#allocation44_spill]] }
  0x1b   :  { %s5783_s1 = scalar_lea.hbm %s7357_s26, 16 }
  0x1c   :  { %p5784_p0 = scmp.ne.s32.totalorder %s7357_s26, %s5783_s1  ;;  %p5787_p1 = scmp.lt.u32.totalorder %s5783_s1, %s7357_s26 }
  0x1e   :  { %p5789_p2 = pnand %p5787_p1, %p5784_p0 }
  0x20   :  { %5792 = shalt.err (!%p5789_p2)
}
  0x21   :  { %s5793_s9 = scalar_lea.vmem %s70_s2, 16  ;;  %s5797_s5 = scalar_lea.vmem %s70_s2, 32 }
  0x22   :  { %p5794_p3 = scmp.ne.s32.totalorder %s70_s2, %s5793_s9  ;;  %p5798_p4 = scmp.lt.s32.totalorder %s70_s2, %s70_s2 }
  0x23   :  { %p5799_p5 = scmp.lt.s32.totalorder %s5797_s5, %s5793_s9 }
  0x25   :  { %p5800_p6 = por %p5799_p5, %p5798_p4 }
  0x27   :  { %p5801_p7 = pnand %p5800_p6, %p5794_p3 }
  0x29   :  { %5804 = shalt.err (!%p5801_p7)
}
  0x2a   :  { %72 = dma.hbm_to_vmem [thread:$0]  %s7357_s26, 16, %s70_s2, [#allocation6]  }
  0x2b   :  { %s5805_s3 = scalar_lea.hbm %s7325_s10, 16 }
  0x2c   :  { %p5806_p8 = scmp.ne.s32.totalorder %s7325_s10, %s5805_s3  ;;  %p5809_p9 = scmp.lt.u32.totalorder %s5805_s3, %s7325_s10 }
  0x2e   :  { %p5811_p10 = pnand %p5809_p9, %p5806_p8 }
  0x30   :  { %5814 = shalt.err (!%p5811_p10)
}
  0x31   :  { %s5815_s28 = scalar_lea.vmem %s92_s30, 16  ;;  %s5819_s9 = scalar_lea.vmem %s92_s30, 32 }
  0x32   :  { %p5816_p11 = scmp.ne.s32.totalorder %s92_s30, %s5815_s28  ;;  %p5820_p12 = scmp.lt.s32.totalorder %s92_s30, %s92_s30 }
  0x33   :  { %p5821_p13 = scmp.lt.s32.totalorder %s5819_s9, %s5815_s28 }
  0x35   :  { %p5822_p0 = por %p5821_p13, %p5820_p12 }
  0x37   :  { %p5823_p1 = pnand %p5822_p0, %p5816_p11 }
  0x39   :  { %5826 = shalt.err (!%p5823_p1)
}
  0x3a   :  { %94 = dma.hbm_to_vmem [thread:$0]  %s7325_s10, 16, %s92_s30, [#allocation9]  }
  0x3b   :  { %s6155_s5 = smov [#allocation11]   ;;  %s5827_s7 = scalar_lea.hbm %s7327_s12, 32 }
  0x3c   :  { %s113_s0 = sshll.u32 %s6155_s5, 4  ;;  %p5828_p2 = scmp.ne.s32.totalorder %s7327_s12, %s5827_s7  ;;  %s114_s0 = int_to_ptr.vmem [resolvable:$true] %s113_s0 }
  0x3d   :  { %p5831_p3 = scmp.lt.u32.totalorder %s5827_s7, %s7327_s12 }
  0x3f   :  { %p5833_p4 = pnand %p5831_p3, %p5828_p2 }
  0x41   :  { %5836 = shalt.err (!%p5833_p4)
}
  0x42   :  { %s5837_s4 = scalar_lea.vmem %s114_s0, 32  ;;  %p5842_p6 = scmp.lt.s32.totalorder %s114_s0, %s114_s0 }
  0x43   :  { %p5838_p5 = scmp.ne.s32.totalorder %s114_s0, %s5837_s4  ;;  %p5843_p7 = scmp.lt.s32.totalorder %s5837_s4, %s5837_s4 }
  0x45   :  { %p5844_p8 = por %p5843_p7, %p5842_p6 }
  0x47   :  { %p5845_p9 = pnand %p5844_p8, %p5838_p5 }
  0x49   :  { %5848 = shalt.err (!%p5845_p9)
}
  0x4a   :  { %116 = dma.hbm_to_vmem [thread:$0]  %s7327_s12, 32, %s114_s0, [#allocation12]  }
  0x4b   :  { %s6156_s28 = smov [#allocation14]   ;;  %s6157_s2 = smov [#allocation17]  }
  0x4c   :  { %s132_s9 = sshll.u32 %s6156_s28, 4  ;;  %s157_s26 = sshll.u32 %s6157_s2, 4  ;;  %s133_s9 = int_to_ptr.vmem [resolvable:$true] %s132_s9  ;;  %s158_s26 = int_to_ptr.vmem [resolvable:$true] %s157_s26 }
  0x4d   :  { %s5849_s6 = scalar_lea.hbm %s7329_s14, 512 }
  0x4e   :  { %p5850_p10 = scmp.ne.s32.totalorder %s7329_s14, %s5849_s6  ;;  %p5853_p11 = scmp.lt.u32.totalorder %s5849_s6, %s7329_s14 }
  0x50   :  { %p5855_p12 = pnand %p5853_p11, %p5850_p10 }
  0x52   :  { %5858 = shalt.err (!%p5855_p12)
}
  0x53   :  { %s5859_s12 = scalar_lea.vmem %s133_s9, 512  ;;  %p5864_p0 = scmp.lt.s32.totalorder %s133_s9, %s133_s9 }
  0x54   :  { %p5860_p13 = scmp.ne.s32.totalorder %s133_s9, %s5859_s12  ;;  %p5865_p1 = scmp.lt.s32.totalorder %s5859_s12, %s5859_s12 }
  0x56   :  { %p5866_p2 = por %p5865_p1, %p5864_p0 }
  0x58   :  { %p5867_p3 = pnand %p5866_p2, %p5860_p13 }
  0x5a   :  { %5870 = shalt.err (!%p5867_p3)
}
  0x5b   :  { %s6158_s0 = smov 128   ;;  %s6159_s27 = smov 8  }
  0x5c   :  { %138 = dma.hbm_to_vmem [thread:$0]  %s7329_s14, 512, %s133_s9, [#allocation15], %s6158_s0, %s6158_s0, %s6159_s27  }
  0x5d   :  { %s5871_s2 = scalar_lea.hbm %s7332_s17, 16 }
  0x5e   :  { %p5872_p4 = scmp.ne.s32.totalorder %s7332_s17, %s5871_s2  ;;  %p5875_p5 = scmp.lt.u32.totalorder %s5871_s2, %s7332_s17 }
  0x60   :  { %p5877_p6 = pnand %p5875_p5, %p5872_p4 }
  0x62   :  { %5880 = shalt.err (!%p5877_p6)
}
  0x63   :  { %s5881_s3 = scalar_lea.vmem %s158_s26, 16  ;;  %s5885_s8 = scalar_lea.vmem %s158_s26, 32 }
  0x64   :  { %p5882_p7 = scmp.ne.s32.totalorder %s158_s26, %s5881_s3  ;;  %p5886_p8 = scmp.lt.s32.totalorder %s158_s26, %s158_s26 }
  0x65   :  { %p5887_p9 = scmp.lt.s32.totalorder %s5885_s8, %s5881_s3 }
  0x67   :  { %p5888_p10 = por %p5887_p9, %p5886_p8 }
  0x69   :  { %p5889_p11 = pnand %p5888_p10, %p5882_p7 }
  0x6b   :  { %5892 = shalt.err (!%p5889_p11)
}
  0x6c   :  { %160 = dma.hbm_to_vmem [thread:$0]  %s7332_s17, 16, %s158_s26, [#allocation18]  }
  0x6d   :  { %s6160_s1 = smov [#allocation20]   ;;  %s6161_s4 = smov [#allocation23]  }
  0x6e   :  { %s179_s12 = sshll.u32 %s6160_s1, 4  ;;  %s203_s10 = sshll.u32 %s6161_s4, 4  ;;  %s180_s12 = int_to_ptr.vmem [resolvable:$true] %s179_s12  ;;  %s204_s10 = int_to_ptr.vmem [resolvable:$true] %s203_s10 }
  0x6f   :  { %s5893_s2 = scalar_lea.hbm %s7334_s19, 64 }
  0x70   :  { %p5894_p12 = scmp.ne.s32.totalorder %s7334_s19, %s5893_s2  ;;  %p5897_p13 = scmp.lt.u32.totalorder %s5893_s2, %s7334_s19 }
  0x72   :  { %p5899_p0 = pnand %p5897_p13, %p5894_p12 }
  0x74   :  { %5902 = shalt.err (!%p5899_p0)
}
  0x75   :  { %s5903_s17 = scalar_lea.vmem %s180_s12, 64  ;;  %p5908_p2 = scmp.lt.s32.totalorder %s180_s12, %s180_s12 }
  0x76   :  { %p5904_p1 = scmp.ne.s32.totalorder %s180_s12, %s5903_s17  ;;  %p5909_p3 = scmp.lt.s32.totalorder %s5903_s17, %s5903_s17 }
  0x78   :  { %p5910_p4 = por %p5909_p3, %p5908_p2 }
  0x7a   :  { %p5911_p5 = pnand %p5910_p4, %p5904_p1 }
  0x7c   :  { %5914 = shalt.err (!%p5911_p5)
}
  0x7d   :  { %182 = dma.hbm_to_vmem [thread:$0]  %s7334_s19, 64, %s180_s12, [#allocation21]  }
  0x7e   :  { %s5915_s9 = scalar_lea.hbm %s7338_s23, 64 }
  0x7f   :  { %p5916_p6 = scmp.ne.s32.totalorder %s7338_s23, %s5915_s9  ;;  %p5919_p7 = scmp.lt.u32.totalorder %s5915_s9, %s7338_s23 }
  0x81   :  { %p5921_p8 = pnand %p5919_p7, %p5916_p6 }
  0x83   :  { %5924 = shalt.err (!%p5921_p8)
}
  0x84   :  { %s5925_s2 = scalar_lea.vmem %s204_s10, 64  ;;  %p5930_p10 = scmp.lt.s32.totalorder %s204_s10, %s204_s10 }
  0x85   :  { %p5926_p9 = scmp.ne.s32.totalorder %s204_s10, %s5925_s2  ;;  %p5931_p11 = scmp.lt.s32.totalorder %s5925_s2, %s5925_s2 }
  0x87   :  { %p5932_p12 = por %p5931_p11, %p5930_p10 }
  0x89   :  { %p5933_p13 = pnand %p5932_p12, %p5926_p9 }
  0x8b   :  { %5936 = shalt.err (!%p5933_p13)
}
  0x8c   :  { %206 = dma.hbm_to_vmem [thread:$0]  %s7338_s23, 64, %s204_s10, [#allocation24]  }
  0x8d   :  { %s6162_s5 = smov [#allocation2]   ;;  %s6163_s6 = smov [#allocation7]  }
  0x8e   :  { %s59_s29 = sshll.u32 %s6162_s5, 4  ;;  %s78_s7 = sshll.u32 %s6163_s6, 4  ;;  %s60_s29 = int_to_ptr.vmem [resolvable:$true] %s59_s29  ;;  %s79_s7 = int_to_ptr.vmem [resolvable:$true] %s78_s7 }
  0x8f   :  { %s7358_s3 = sld [smem:[#allocation43_spill]] }
  0x95   :  { %s5937_s8 = scalar_lea.hbm %s7358_s3, 32 }
  0x96   :  { %p5938_p0 = scmp.ne.s32.totalorder %s7358_s3, %s5937_s8  ;;  %p5941_p1 = scmp.lt.u32.totalorder %s5937_s8, %s7358_s3 }
  0x98   :  { %p5943_p2 = pnand %p5941_p1, %p5938_p0 }
  0x9a   :  { %5946 = shalt.err (!%p5943_p2)
}
  0x9b   :  { %s5947_s23 = scalar_lea.vmem %s60_s29, 32  ;;  %p5952_p4 = scmp.lt.s32.totalorder %s60_s29, %s60_s29 }
  0x9c   :  { %p5948_p3 = scmp.ne.s32.totalorder %s60_s29, %s5947_s23  ;;  %p5953_p5 = scmp.lt.s32.totalorder %s5947_s23, %s5947_s23 }
  0x9e   :  { %p5954_p6 = por %p5953_p5, %p5952_p4 }
  0xa0   :  { %p5955_p7 = pnand %p5954_p6, %p5948_p3 }
  0xa2   :  { %5958 = shalt.err (!%p5955_p7)
}
  0xa3   :  { %62 = dma.hbm_to_vmem [thread:$0]  %s7358_s3, 32, %s60_s29, [#allocation3]  }
  0xa4   :  { %s7359_s19 = sld [smem:[#allocation45_spill]] }
  0xaa   :  { %s5959_s12 = scalar_lea.hbm %s7359_s19, 512 }
  0xab   :  { %p5960_p8 = scmp.ne.s32.totalorder %s7359_s19, %s5959_s12  ;;  %p5963_p9 = scmp.lt.u32.totalorder %s5959_s12, %s7359_s19 }
  0xad   :  { %p5965_p10 = pnand %p5963_p9, %p5960_p8 }
  0xaf   :  { %5968 = shalt.err (!%p5965_p10)
}
  0xb0   :  { %s5969_s8 = scalar_lea.vmem %s79_s7, 512  ;;  %p5974_p12 = scmp.lt.s32.totalorder %s79_s7, %s79_s7 }
  0xb1   :  { %p5970_p11 = scmp.ne.s32.totalorder %s79_s7, %s5969_s8  ;;  %p5975_p13 = scmp.lt.s32.totalorder %s5969_s8, %s5969_s8 }
  0xb3   :  { %p5976_p0 = por %p5975_p13, %p5974_p12 }
  0xb5   :  { %p5977_p1 = pnand %p5976_p0, %p5970_p11 }
  0xb7   :  { %5980 = shalt.err (!%p5977_p1)
}
  0xb8   :  { %84 = dma.hbm_to_vmem [thread:$0]  %s7359_s19, 512, %s79_s7, [#allocation6], %s6158_s0, %s6158_s0, %s6159_s27  }
  0xb9   :  { %s6164_s14 = smov [#allocation10]   ;;  %s5981_s23 = scalar_lea.hbm %s7326_s11, 1024 }
  0xba   :  { %s100_s9 = sshll.u32 %s6164_s14, 4  ;;  %p5982_p2 = scmp.ne.s32.totalorder %s7326_s11, %s5981_s23  ;;  %s101_s9 = int_to_ptr.vmem [resolvable:$true] %s100_s9 }
  0xbb   :  { %p5985_p3 = scmp.lt.u32.totalorder %s5981_s23, %s7326_s11 }
  0xbd   :  { %p5987_p4 = pnand %p5985_p3, %p5982_p2 }
  0xbf   :  { %5990 = shalt.err (!%p5987_p4)
}
  0xc0   :  { %s5991_s12 = scalar_lea.vmem %s101_s9, 1024  ;;  %p5996_p6 = scmp.lt.s32.totalorder %s101_s9, %s101_s9 }
  0xc1   :  { %p5992_p5 = scmp.ne.s32.totalorder %s101_s9, %s5991_s12  ;;  %p5997_p7 = scmp.lt.s32.totalorder %s5991_s12, %s5991_s12 }
  0xc3   :  { %p5998_p8 = por %p5997_p7, %p5996_p6 }
  0xc5   :  { %p5999_p9 = pnand %p5998_p8, %p5992_p5 }
  0xc7   :  { %6002 = shalt.err (!%p5999_p9)
}
  0xc8   :  { %s6165_s7 = smov 256   ;;  %s6166_s19 = smov 16  }
  0xc9   :  { %106 = dma.hbm_to_vmem [thread:$0]  %s7326_s11, 1024, %s101_s9, [#allocation9], %s6165_s7, %s6165_s7, %s6166_s19  }
  0xca   :  { %s6167_s17 = smov [#allocation13]   ;;  %s6168_s8 = smov [#allocation16]  }
  0xcb   :  { %s123_s26 = sshll.u32 %s6167_s17, 4  ;;  %s145_s29 = sshll.u32 %s6168_s8, 4  ;;  %s124_s26 = int_to_ptr.vmem [resolvable:$true] %s123_s26  ;;  %s146_s29 = int_to_ptr.vmem [resolvable:$true] %s145_s29 }
  0xcc   :  { %s6003_s1 = scalar_lea.hbm %s7328_s13, 16 }
  0xcd   :  { %p6004_p10 = scmp.ne.s32.totalorder %s7328_s13, %s6003_s1  ;;  %p6007_p11 = scmp.lt.u32.totalorder %s6003_s1, %s7328_s13 }
  0xcf   :  { %p6009_p12 = pnand %p6007_p11, %p6004_p10 }
  0xd1   :  { %6012 = shalt.err (!%p6009_p12)
}
  0xd2   :  { %s6013_s11 = scalar_lea.vmem %s124_s26, 16  ;;  %s6017_s9 = scalar_lea.vmem %s124_s26, 32 }
  0xd3   :  { %p6014_p13 = scmp.ne.s32.totalorder %s124_s26, %s6013_s11  ;;  %p6018_p0 = scmp.lt.s32.totalorder %s124_s26, %s124_s26 }
  0xd4   :  { %p6019_p1 = scmp.lt.s32.totalorder %s6017_s9, %s6013_s11 }
  0xd6   :  { %p6020_p2 = por %p6019_p1, %p6018_p0 }
  0xd8   :  { %p6021_p3 = pnand %p6020_p2, %p6014_p13 }
  0xda   :  { %6024 = shalt.err (!%p6021_p3)
}
  0xdb   :  { %126 = dma.hbm_to_vmem [thread:$0]  %s7328_s13, 16, %s124_s26, [#allocation12]  }
  0xdc   :  { %s6025_s19 = scalar_lea.hbm %s7330_s15, 16 }
  0xdd   :  { %p6026_p4 = scmp.ne.s32.totalorder %s7330_s15, %s6025_s19  ;;  %p6029_p5 = scmp.lt.u32.totalorder %s6025_s19, %s7330_s15 }
  0xdf   :  { %p6031_p6 = pnand %p6029_p5, %p6026_p4 }
  0xe1   :  { %6034 = shalt.err (!%p6031_p6)
}
  0xe2   :  { %s6035_s3 = scalar_lea.vmem %s146_s29, 16  ;;  %s6039_s14 = scalar_lea.vmem %s146_s29, 32 }
  0xe3   :  { %p6036_p7 = scmp.ne.s32.totalorder %s146_s29, %s6035_s3  ;;  %p6040_p8 = scmp.lt.s32.totalorder %s146_s29, %s146_s29 }
  0xe4   :  { %p6041_p9 = scmp.lt.s32.totalorder %s6039_s14, %s6035_s3 }
  0xe6   :  { %p6042_p10 = por %p6041_p9, %p6040_p8 }
  0xe8   :  { %p6043_p11 = pnand %p6042_p10, %p6036_p7 }
  0xea   :  { %6046 = shalt.err (!%p6043_p11)
}
  0xeb   :  { %148 = dma.hbm_to_vmem [thread:$0]  %s7330_s15, 16, %s146_s29, [#allocation15]  }
  0xec   :  { %s6169_s1 = smov [#allocation19]   ;;  %s6170_s23 = smov [#allocation22]  }
  0xed   :  { %s166_s4 = sshll.u32 %s6169_s1, 4  ;;  %s189_s10 = sshll.u32 %s6170_s23, 4  ;;  %s167_s4 = int_to_ptr.vmem [resolvable:$true] %s166_s4  ;;  %s190_s10 = int_to_ptr.vmem [resolvable:$true] %s189_s10 }
  0xee   :  { %s6047_s9 = scalar_lea.hbm %s7333_s18, 512 }
  0xef   :  { %p6048_p12 = scmp.ne.s32.totalorder %s7333_s18, %s6047_s9  ;;  %p6051_p13 = scmp.lt.u32.totalorder %s6047_s9, %s7333_s18 }
  0xf1   :  { %p6053_p0 = pnand %p6051_p13, %p6048_p12 }
  0xf3   :  { %6056 = shalt.err (!%p6053_p0)
}
  0xf4   :  { %s6057_s15 = scalar_lea.vmem %s167_s4, 512  ;;  %p6062_p2 = scmp.lt.s32.totalorder %s167_s4, %s167_s4 }
  0xf5   :  { %p6058_p1 = scmp.ne.s32.totalorder %s167_s4, %s6057_s15  ;;  %p6063_p3 = scmp.lt.s32.totalorder %s6057_s15, %s6057_s15 }
  0xf7   :  { %p6064_p4 = por %p6063_p3, %p6062_p2 }
  0xf9   :  { %p6065_p5 = pnand %p6064_p4, %p6058_p1 }
  0xfb   :  { %6068 = shalt.err (!%p6065_p5)
}
  0xfc   :  { %172 = dma.hbm_to_vmem [thread:$0]  %s7333_s18, 512, %s167_s4, [#allocation18], %s6158_s0, %s6158_s0, %s6159_s27  }
  0xfd   :  { %s6069_s17 = scalar_lea.hbm %s7335_s20, 16 }
  0xfe   :  { %p6070_p6 = scmp.ne.s32.totalorder %s7335_s20, %s6069_s17  ;;  %p6073_p7 = scmp.lt.u32.totalorder %s6069_s17, %s7335_s20 }
 0x100   :  { %p6075_p8 = pnand %p6073_p7, %p6070_p6 }
 0x102   :  { %6078 = shalt.err (!%p6075_p8)
}
 0x103   :  { %s6079_s26 = scalar_lea.vmem %s190_s10, 16  ;;  %s6083_s1 = scalar_lea.vmem %s190_s10, 32 }
 0x104   :  { %p6080_p9 = scmp.ne.s32.totalorder %s190_s10, %s6079_s26  ;;  %p6084_p10 = scmp.lt.s32.totalorder %s190_s10, %s190_s10 }
 0x105   :  { %p6085_p11 = scmp.lt.s32.totalorder %s6083_s1, %s6079_s26 }
 0x107   :  { %p6086_p12 = por %p6085_p11, %p6084_p10 }
 0x109   :  { %p6087_p13 = pnand %p6086_p12, %p6080_p9 }
 0x10b   :  { %6090 = shalt.err (!%p6087_p13)
}
 0x10c   :  { %192 = dma.hbm_to_vmem [thread:$0]  %s7335_s20, 16, %s190_s10, [#allocation21]  }
 0x10d   :  { %s6171_s23 = smov [#allocation25]   ;;  %s6091_s28 = scalar_lea.hbm %s7339_s24, 64 }
 0x10e   :  { %s213_s30 = sshll.u32 %s6171_s23, 4  ;;  %p6092_p0 = scmp.ne.s32.totalorder %s7339_s24, %s6091_s28  ;;  %s214_s30 = int_to_ptr.vmem [resolvable:$true] %s213_s30 }
 0x10f   :  { %p6095_p1 = scmp.lt.u32.totalorder %s6091_s28, %s7339_s24 }
 0x111   :  { %p6097_p2 = pnand %p6095_p1, %p6092_p0 }
 0x113   :  { %6100 = shalt.err (!%p6097_p2)
}
 0x114   :  { %s6101_s29 = scalar_lea.vmem %s214_s30, 64  ;;  %p6106_p4 = scmp.lt.s32.totalorder %s214_s30, %s214_s30 }
 0x115   :  { %p6102_p3 = scmp.ne.s32.totalorder %s214_s30, %s6101_s29  ;;  %p6107_p5 = scmp.lt.s32.totalorder %s6101_s29, %s6101_s29 }
 0x117   :  { %p6108_p6 = por %p6107_p5, %p6106_p4 }
 0x119   :  { %p6109_p7 = pnand %p6108_p6, %p6102_p3 }
 0x11b   :  { %6112 = shalt.err (!%p6109_p7)
}
 0x11c   :  { %216 = dma.hbm_to_vmem [thread:$0]  %s7339_s24, 64, %s214_s30, [#allocation24]  }
 0x11d   :  { %6135 = dma.done.wait [#allocation3], 32  }
 0x11e   :  { %6136 = vsyncadd [#allocation3], 4294967264 }
 0x11f   :  { %6137 = dma.done.wait [#allocation6], 528  }
 0x120   :  { %6138 = vsyncadd [#allocation6], 4294966768 }
 0x121   :  { %6139 = dma.done.wait [#allocation9], 1040  }
 0x122   :  { %6140 = vsyncadd [#allocation9], 4294966256 }
 0x123   :  { %6141 = dma.done.wait [#allocation12], 48  }
 0x124   :  { %6142 = vsyncadd [#allocation12], 4294967248 }
 0x125   :  { %6143 = dma.done.wait [#allocation15], 528  }
 0x126   :  { %6144 = vsyncadd [#allocation15], 4294966768 }
 0x127   :  { %6145 = dma.done.wait [#allocation18], 528  }
 0x128   :  { %6146 = vsyncadd [#allocation18], 4294966768 }
 0x129   :  { %6147 = dma.done.wait [#allocation21], 80  }
 0x12a   :  { %6148 = vsyncadd [#allocation21], 4294967216 }
 0x12b   :  { %6149 = dma.done.wait [#allocation24], 128  }
 0x12c   :  { %6150 = vsyncadd [#allocation24], 4294967168  ;;  %v6172_v0 = vmov 0.0   ;;  %s7360_s5 = sld [smem:[#allocation42_spill]]  ;;  %s7361_s12 = sld [smem:[#allocation36_spill]]  ;;  %vm290_vm0 = vcmask 261120   ;;  %v280_v17 = vlaneseq }
 0x12d   :  { %367 = vmatprep.mubr.f32.mxu0 %v6172_v0  ;;  %379 = vmatprep.mubr.f32.mxu1 %v6172_v0  ;;  %v278_v20 = vld [vmem:[#allocation2] sm:$0x3]  ;;  %vm427_vm1 = vcmask 64512   ;;  %s6173_s19 = smov 88   ;;  %s6175_s6 = smov 120   ;;  %vm616_vm6 = vcmask 130048  }
 0x12e   :  { %v6562_v18 = vshrl.u32 %v280_v17, 7  ;;  %vm6614_vm2 = vmpackc.low %vm427_vm1, %vm427_vm1  ;;  %s7364_s3 = sld [smem:[#allocation38_spill]]  ;;  %s6178_s14 = smov 80  }
 0x12f   :  { %s6179_s13 = smov 112   ;;  %s6180_s26 = smov 64  }
 0x130   :  { %v6565_v19 = vsub.s32 1, %v6562_v18  ;;  %v6568_v21 = vsub.s32 0, %v6562_v18  ;;  %s6181_s1 = smov 72   ;;  %s6182_s18 = smov 104  }
 0x131   :  { %s6183_s4 = smov 32   ;;  %s7369_s11 = sld [smem:[#allocation37_spill]] }
 0x132   :  { %v271_v1 = vld [vmem:[%s7360_s5 + $0x8] sm:$0xff]  ;;  %v273_v2 = vld [vmem:[%s7360_s5 + $0x18] sm:$0xff]  ;;  %v270_v3 = vld [vmem:[%s7360_s5] sm:$0xff]  ;;  %v287_v22 = vrot.slane %v278_v20, %v6565_v19  ;;  %v283_v23 = vrot.slane %v278_v20, %v6568_v21  ;;  %s7370_s15 = sld [smem:[#allocation39_spill]]  ;;  %s7376_s9 = sld [smem:[#allocation40_spill]] }
 0x133   :  { %v5313_v4 = vpack.c.bf16 %v273_v2, %v271_v1  ;;  %v272_v5 = vld [vmem:[%s7360_s5 + $0x10] sm:$0xff]  ;;  %v275_v6 = vld [vmem:[%s7360_s5 + $0x28] sm:$0xff]  ;;  %v277_v7 = vld [vmem:[%s7360_s5 + $0x38] sm:$0xff] }
 0x134   :  { %v5315_v8 = vpack.c.bf16 %v272_v5, %v270_v3  ;;  %v5317_v9 = vpack.c.bf16 %v277_v7, %v275_v6  ;;  %v274_v10 = vld [vmem:[%s7360_s5 + $0x20] sm:$0xff]  ;;  %v276_v11 = vld [vmem:[%s7360_s5 + $0x30] sm:$0xff]  ;;  %v6550_v15 = vld [vmem:[%s7361_s12 + $0x8] sm:$0xff]  ;;  %s6174_s5 = smov 96  }
 0x135   :  { %5314 = vmatprep.subr.bf16.mxu0 %v5313_v4  ;;  %5453 = vmatprep.subr.bf16.mxu1 %v5313_v4  ;;  %v5319_v12 = vpack.c.bf16 %v276_v11, %v274_v10  ;;  %v6535_v13 = vld [vmem:[%s7361_s12] sm:$0xff]  ;;  %v6540_v14 = vld [vmem:[%s7361_s12 + $0x10] sm:$0xff]  ;;  %v6556_v16 = vld [vmem:[%s7361_s12 + $0x18] sm:$0xff]  ;;  %v6176_v4 = vmov 1966171168   ;;  %v6177_v11 = vmov 0  }
 0x136   :  { %5316 = vmatpush1.bf16.msra.mxu0 %v5315_v8  ;;  %5455 = vmatpush1.bf16.msra.mxu1 %v5315_v8  ;;  %v404_v5 = vunpack.c.l.s4 %v6176_v4  ;;  %v4777_v8 = vld.sshfl [vmem:[%s7364_s3] sm:$0x11 pattern:$0x75316420]  ;;  %s7375_s3 = sld [smem:[#allocation41_spill]] }
 0x137   :  { %5318 = vmatprep.subr.bf16.mxu0 %v5317_v9  ;;  %5454 = vmatprep.subr.bf16.mxu1 %v5317_v9  ;;  %v402_v10 = vcombine.high %v4777_v8, %v4777_v8 }
 0x138   :  { %v405_v6 = vunpack.c.0.s8 %v404_v5 }
 0x13a   :  { %5320 = vmatpush1.bf16.msra.mxu0 %v5319_v12  ;;  %5456 = vmatpush1.bf16.msra.mxu1 %v5319_v12  ;;  %v6645_v7 = vsub.s32 %v405_v6, %v6562_v18 }
 0x13c   :  { %v409_v9 = vrot.slane %v4777_v8, %v6645_v7  ;;  %v416_v17 = vrot.slane %v402_v10, %v6645_v7 }
 0x13d   :  { %4773 = vmatmul.mubr.msk.f32.vlgmr.msra.gmra.mrb[0].mxu0 %vm290_vm0, %v6535_v13  ;;  %4775 = vmatmul.mubr.msk.f32.vlgmr.msra.gmra.mrb[0].mxu1 %vm290_vm0, %v6540_v14 }
 0x13e   :  { %373 = vmatprep.mubr.f32.mxu0 %v6172_v0  ;;  %385 = vmatprep.mubr.f32.mxu1 %v6172_v0  ;;  %vm419_vm3 = vcmp.gt.f32.partialorder %v409_v9, 0.5  ;;  %vm420_vm4 = vcmp.gt.f32.partialorder %v416_v17, 0.5 }
 0x13f   :  { %v600_v12 = vsel %vm419_vm3, 1, %v6177_v11 }
 0x140   :  { %v605_v20 = vrot.slane %v600_v12, %v6568_v21 }
 0x141   :  { %4774 = vmatmul.mubr.msk.f32.gmra.mrb[2].mxu0 %vm290_vm0, %v6550_v15  ;;  %4776 = vmatmul.mubr.msk.f32.gmra.mrb[2].mxu1 %vm290_vm0, %v6556_v16 }
 0x142   :  { %vm6654_vm5 = vcmp.eq.s32.totalorder %v605_v20, 1 }
 0x210   :  { %v369_v24 = vpop.f32.mrb[0].mxu0  ;;  %v381_v25 = vpop.f32.mrb[0].mxu1 }
 0x211   :  { %v371_v26 = vpop.f32.mrb[1].mxu0  ;;  %v382_v27 = vadd.f32 %v381_v25, %v283_v23  ;;  %v383_v28 = vpop.f32.mrb[1].mxu1  ;;  %v370_v32 = vadd.f32 %v369_v24, %v283_v23  ;;  %v601_v25 = vsel %vm420_vm4, 1, %v6177_v11 }
 0x212   :  { %v6572_v29 = vadd.f32 %v371_v26, %v287_v22  ;;  %v6586_v42 = vadd.f32 %v383_v28, %v287_v22 }
 0x214   :  { %v375_v30 = vpop.f32.mrb[2].mxu0  ;;  %5048 = vmatprep.mubr.msk.f32.mxu1 %vm427_vm1, %v6572_v29  ;;  %v387_v31 = vpop.f32.mrb[2].mxu1 }
 0x215   :  { %v376_v33 = vadd.f32 %v375_v30, %v283_v23  ;;  %v377_v34 = vpop.f32.mrb[3].mxu0  ;;  %v388_v35 = vadd.f32 %v387_v31, %v283_v23  ;;  %v389_v36 = vpop.f32.mrb[3].mxu1 }
 0x216   :  { %v6576_v37 = vadd.f32 %v377_v34, %v287_v22  ;;  %v6588_v43 = vadd.f32 %v389_v36, %v287_v22  ;;  %v609_v34 = vrot.slane %v601_v25, %v6568_v21 }
 0x217   :  { %v6578_v38 = vpack.i.bf16 %v376_v33, %v370_v32  ;;  %v6580_v39 = vpack.c.bf16 %v376_v33, %v370_v32  ;;  %v6582_v40 = vpack.i.bf16 %v388_v35, %v382_v27  ;;  %v6584_v41 = vpack.c.bf16 %v388_v35, %v382_v27 }
 0x218   :  { %v6592_v44 = vpack.i.bf16 %v6576_v37, %v6572_v29  ;;  %v6599_v45 = vpack.i.bf16 %v6588_v43, %v6586_v42  ;;  %vm6669_vm7 = vcmp.eq.s32.totalorder %v609_v34, 1 }
 0x21a   :  { %5526 = vrot.lane.b32.xlu1 %v6592_v44, %s6173_s19  ;;  %5516 = vrot.lane.b32.xlu0 %v6592_v44, %s6174_s5 }
 0x21e   :  { %5531 = vrot.lane.b32.xlu1 %v6599_v45, %s6173_s19  ;;  %5521 = vrot.lane.b32.xlu0 %v6599_v45, %s6174_s5 }
 0x222   :  { %663 = vrot.lane.b32.xlu1 %v6576_v37, %s6175_s6  ;;  %661 = vrot.lane.b32.xlu0 %v6572_v29, %s6175_s6 }
 0x226   :  { %754 = vrot.lane.b32.xlu1 %v6588_v43, %s6175_s6  ;;  %752 = vrot.lane.b32.xlu0 %v6586_v42, %s6175_s6 }
 0x28c   :  { %v5527_v46 = vpop.permute.xlu1 %5526  ;;  %v5517_v47 = vpop.permute.xlu0 %5516 }
 0x28d   :  { %v5529_v48 = vunpack.i.h.bf16 %v5527_v46  ;;  %v5528_v49 = vunpack.i.l.bf16 %v5527_v46  ;;  %v5519_v50 = vunpack.i.h.bf16 %v5517_v47  ;;  %v5518_v51 = vunpack.i.l.bf16 %v5517_v47 }
 0x28f   :  { %v5333_v53 = vpack.c.bf16 %v5529_v48, %v5528_v49  ;;  %v5321_v54 = vpack.c.bf16 %v5519_v50, %v5518_v51 }
 0x290   :  { %v5522_v55 = vpop.permute.xlu0 %5521  ;;  %v5532_v58 = vpop.permute.xlu1 %5531 }
 0x291   :  { %v5524_v56 = vunpack.i.h.bf16 %v5522_v55  ;;  %v5523_v57 = vunpack.i.l.bf16 %v5522_v55  ;;  %5323 = vmatprep.subr.msk.bf16.mxu1 %vm6614_vm2, %v5321_v54  ;;  %5335 = vmatprep.subr.msk.bf16.mxu0 %vm6614_vm2, %v5333_v53  ;;  %v5534_v61 = vunpack.i.h.bf16 %v5532_v58  ;;  %v5533_v62 = vunpack.i.l.bf16 %v5532_v58 }
 0x292   :  { %5326 = vmatpush3.bf16.xpose.msk.msra.mxu1 %vm6614_vm2, %v5321_v54  ;;  %5338 = vmatpush3.bf16.xpose.msk.msra.mxu0 %vm6614_vm2, %v5333_v53 }
 0x293   :  { %v5327_v59 = vpack.c.bf16 %v5524_v56, %v5523_v57  ;;  %v5339_v1 = vpack.c.bf16 %v5534_v61, %v5533_v62 }
 0x294   :  { %v662_v60 = vpop.permute.xlu0 %661  ;;  %v664_v63 = vpop.permute.xlu1 %663 }
 0x295   :  { %5329 = vmatprep.subr.msk.bf16.mxu1 %vm6614_vm2, %v5327_v59  ;;  %5062 = vmatprep.mubr.msk.f32.mxu0 %vm427_vm1, %v662_v60 }
 0x298   :  { %v753_v2 = vpop.permute.xlu0 %752  ;;  %v755_v3 = vpop.permute.xlu1 %754 }
 0x299   :  { %5049 = vmatmul.mubr.msk.f32.vlgmr.msra.gmra.mrb[4].mxu1 %vm427_vm1, %v6576_v37  ;;  %5063 = vmatmul.mubr.msk.f32.vlgmr.msra.gmra.mrb[4].mxu0 %vm427_vm1, %v664_v63 }
 0x29a   :  { %5332 = vmatpush3.bf16.xpose.msk.msra.mxu1 %vm6614_vm2, %v5327_v59  ;;  %5055 = vmatprep.mubr.msk.f32.mxu1 %vm427_vm1, %v6586_v42 }
 0x29b   :  { %5341 = vmatprep.subr.msk.bf16.mxu1 %vm6614_vm2, %v5339_v1 }
 0x2a1   :  { %5056 = vmatmul.mubr.msk.f32.vlgmr.msra.gmra.mrb[6].mxu1 %vm427_vm1, %v6588_v43 }
 0x2a2   :  { %5344 = vmatpush3.bf16.xpose.msk.msra.mxu1 %vm6614_vm2, %v5339_v1  ;;  %5069 = vmatprep.mubr.msk.f32.mxu1 %vm427_vm1, %v753_v2 }
 0x2a9   :  { %5070 = vmatmul.mubr.msk.f32.vlgmr.msra.gmra.mrb[8].mxu1 %vm427_vm1, %v755_v3 }
 0x36c   :  { %v5050_v23 = vpop.f32.mrb[4].mxu1  ;;  %v5064_v24 = vpop.f32.mrb[4].mxu0 }
 0x36d   :  { %v844_v26 = vsel %vm6654_vm5, -1e+09, %v5064_v24  ;;  %v502_v27 = vpop.f32.mrb[5].mxu1  ;;  %v743_v28 = vpop.f32.mrb[5].mxu0  ;;  %v613_v57 = vsel %vm6654_vm5, -1e+09, %v5050_v23 }
 0x36e   :  { %v843_v30 = vsel %vm6654_vm5, -1e+09, %v743_v28  ;;  %v850_v31 = vsel %vm616_vm6, %v844_v26, -inf  ;;  %v612_v32 = vsel %vm6654_vm5, -1e+09, %v502_v27  ;;  %v620_v58 = vsel %vm616_vm6, %v613_v57, -inf }
 0x36f   :  { %851 = vmax.xlane.f32.xlu1 %v850_v31  ;;  %v847_v33 = vsel %vm616_vm6, %v843_v30, -inf  ;;  %v617_v35 = vsel %vm616_vm6, %v612_v32, -inf }
 0x370   :  { %848 = vmax.xlane.f32.xlu0 %v847_v33 }
 0x373   :  { %618 = vmax.xlane.f32.xlu1 %v617_v35 }
 0x374   :  { %v5057_v46 = vpop.f32.mrb[6].mxu1 }
 0x375   :  { %v591_v47 = vpop.f32.mrb[7].mxu1  ;;  %v615_v59 = vsel %vm6669_vm7, -1e+09, %v5057_v46 }
 0x376   :  { %v614_v48 = vsel %vm6669_vm7, -1e+09, %v591_v47  ;;  %v626_v60 = vsel %vm616_vm6, %v615_v59, -inf }
 0x377   :  { %v623_v49 = vsel %vm616_vm6, %v614_v48, -inf }
 0x378   :  { %624 = vmax.xlane.f32.xlu1 %v623_v49 }
 0x37c   :  { %v5071_v50 = vpop.f32.mrb[8].mxu1 }
 0x37d   :  { %v834_v51 = vpop.f32.mrb[9].mxu1  ;;  %v846_v55 = vsel %vm6669_vm7, -1e+09, %v5071_v50 }
 0x37e   :  { %v6678_v53 = vsel %vm6669_vm7, -1e+09, %v834_v51  ;;  %v856_v56 = vsel %vm616_vm6, %v846_v55, -inf }
 0x37f   :  { %v853_v54 = vsel %vm616_vm6, %v6678_v53, -inf }
 0x380   :  { %854 = vmax.xlane.f32.xlu0 %v853_v54 }
 0x384   :  { %857 = vmax.xlane.f32.xlu0 %v856_v56 }
 0x388   :  { %621 = vmax.xlane.f32.xlu0 %v620_v58 }
 0x389   :  { %5536 = vrot.lane.b32.xlu1 %v6578_v38, %s6174_s5 }
 0x38c   :  { %627 = vmax.xlane.f32.xlu0 %v626_v60 }
 0x3fc   :  { %v852_v61 = vpop.xlane.xlu1 %851 }
 0x3fd   :  { %v860_v62 = vsub.f32 %v844_v26, %v852_v61  ;;  %v849_v63 = vpop.xlane.xlu0 %848 }
 0x3fe   :  { %v859_v1 = vsub.f32 %v843_v30, %v849_v63 }
 0x3ff   :  { %v865_v2 = vmul.f32 1.442695, %v860_v62 }
 0x400   :  { %v863_v3 = vmul.f32 1.442695, %v859_v1  ;;  %v619_v4 = vpop.xlane.xlu1 %618 }
 0x401   :  { %5585 = vpow2.f32 %v865_v2  ;;  %v629_v5 = vsub.f32 %v612_v32, %v619_v4 }
 0x402   :  { %5587 = vpow2.f32 %v863_v3 }
 0x403   :  { %v633_v6 = vmul.f32 1.442695, %v629_v5 }
 0x405   :  { %5589 = vpow2.f32 %v633_v6  ;;  %v625_v8 = vpop.xlane.xlu1 %624 }
 0x406   :  { %v631_v9 = vsub.f32 %v614_v48, %v625_v8 }
 0x408   :  { %v637_v10 = vmul.f32 1.442695, %v631_v9 }
 0x409   :  { %v5537_v12 = vpop.permute.xlu1 %5536 }
 0x40a   :  { %5591 = vpow2.f32 %v637_v10  ;;  %v5539_v17 = vunpack.i.h.bf16 %v5537_v12  ;;  %v5538_v20 = vunpack.i.l.bf16 %v5537_v12 }
 0x40b   :  { %v6693_v23 = vpop.eup %5585 }
 0x40c   :  { %v5588_v24 = vpop.eup %5587  ;;  %v874_v25 = vsel %vm616_vm6, %v6693_v23, 0.0  ;;  %v5345_v26 = vpack.c.bf16 %v5539_v17, %v5538_v20 }
 0x40d   :  { %875 = vadd.xlane.f32.xlu0 %v874_v25  ;;  %v855_v27 = vpop.xlane.xlu0 %854  ;;  %v871_v28 = vsel %vm616_vm6, %v5588_v24, 0.0 }
 0x40e   :  { %872 = vadd.xlane.f32.xlu1 %v871_v28  ;;  %5346 = vmatprep.subr.bf16.mxu0 %v5345_v26  ;;  %v861_v61 = vsub.f32 %v6678_v53, %v855_v27 }
 0x40f   :  { %v6698_v30 = vpop.eup %5589  ;;  %5348 = vmatpush3.bf16.msra.mxu0 %v5345_v26 }
 0x410   :  { %5354 = vmatprep.subr.bf16.mxu0 %v6580_v39  ;;  %v641_v31 = vsel %vm616_vm6, %v6698_v30, 0.0  ;;  %v867_v62 = vmul.f32 1.442695, %v861_v61 }
 0x411   :  { %v858_v32 = vpop.xlane.xlu0 %857 }
 0x412   :  { %642 = vadd.xlane.f32.xlu1 %v641_v31  ;;  %v862_v47 = vsub.f32 %v846_v55, %v858_v32 }
 0x414   :  { %v6703_v33 = vpop.eup %5591  ;;  %v869_v51 = vmul.f32 1.442695, %v862_v47 }
 0x415   :  { %v622_v34 = vpop.xlane.xlu0 %621  ;;  %v647_v35 = vsel %vm616_vm6, %v6703_v33, 0.0 }
 0x416   :  { %v630_v46 = vsub.f32 %v613_v57, %v622_v34  ;;  %648 = vadd.xlane.f32.xlu1 %v647_v35 }
 0x418   :  { %v635_v48 = vmul.f32 1.442695, %v630_v46 }
 0x419   :  { %v628_v49 = vpop.xlane.xlu0 %627 }
 0x41a   :  { %5593 = vpow2.f32 %v635_v48  ;;  %v632_v50 = vsub.f32 %v615_v59, %v628_v49 }
 0x41c   :  { %v639_v54 = vmul.f32 1.442695, %v632_v50 }
 0x41e   :  { %5595 = vpow2.f32 %v639_v54 }
 0x41f   :  { %5597 = vpow2.f32 %v869_v51 }
 0x420   :  { %5599 = vpow2.f32 %v867_v62 }
 0x424   :  { %v5594_v56 = vpop.eup %5593 }
 0x425   :  { %v644_v58 = vsel %vm616_vm6, %v5594_v56, 0.0 }
 0x426   :  { %645 = vadd.xlane.f32.xlu0 %v644_v58 }
 0x427   :  { %5546 = vrot.lane.b32.xlu1 %v6592_v44, %s6178_s14 }
 0x428   :  { %v6709_v60 = vpop.eup %5595 }
 0x429   :  { %v650_v55 = vsel %vm616_vm6, %v6709_v60, 0.0  ;;  %v6713_v57 = vpop.eup %5597 }
 0x42a   :  { %651 = vadd.xlane.f32.xlu0 %v650_v55  ;;  %v880_v59 = vsel %vm616_vm6, %v6713_v57, 0.0  ;;  %v5600_v63 = vpop.eup %5599 }
 0x42b   :  { %v877_v1 = vsel %vm616_vm6, %v5600_v63, 0.0 }
 0x42e   :  { %881 = vadd.xlane.f32.xlu0 %v880_v59 }
 0x444   :  { %5541 = vrot.lane.b32.xlu0 %v6582_v40, %s6174_s5 }
 0x448   :  { %1231 = vrot.lane.b32.xlu0 %v6572_v29, %s6179_s13 }
 0x44b   :  { %878 = vadd.xlane.f32.xlu1 %v877_v1 }
 0x44c   :  { %1322 = vrot.lane.b32.xlu0 %v6586_v42, %s6179_s13 }
 0x45c   :  { %5551 = vrot.lane.b32.xlu1 %v6599_v45, %s6178_s14 }
 0x460   :  { %1233 = vrot.lane.b32.xlu1 %v6576_v37, %s6179_s13 }
 0x464   :  { %1324 = vrot.lane.b32.xlu1 %v6588_v43, %s6179_s13 }
 0x49a   :  { %v876_v53 = vpop.xlane.xlu0 %875 }
 0x49b   :  { %5601 = vrcp.f32 %v876_v53  ;;  %v873_v2 = vpop.xlane.xlu1 %872 }
 0x49c   :  { %5603 = vrcp.f32 %v873_v2 }
 0x49f   :  { %v643_v3 = vpop.xlane.xlu1 %642 }
 0x4a0   :  { %5605 = vrcp.f32 %v643_v3 }
 0x4a3   :  { %v649_v4 = vpop.xlane.xlu1 %648 }
 0x4a5   :  { %v5602_v5 = vpop.eup %5601 }
 0x4a6   :  { %v5604_v6 = vpop.eup %5603  ;;  %v888_v17 = vmul.f32 %v5602_v5, %v6693_v23 }
 0x4a7   :  { %v5547_v8 = vpop.permute.xlu1 %5546  ;;  %v887_v9 = vmul.f32 %v5604_v6, %v5588_v24 }
 0x4a8   :  { %v5549_v10 = vunpack.i.h.bf16 %v5547_v8  ;;  %v5548_v12 = vunpack.i.l.bf16 %v5547_v8 }
 0x4a9   :  { %5076 = vmatprep.mubr.msk.f32.mxu0 %vm616_vm6, %v887_v9 }
 0x4aa   :  { %v5606_v20 = vpop.eup %5605  ;;  %v5361_v25 = vpack.c.bf16 %v5549_v10, %v5548_v12  ;;  %5077 = vmatmul.mubr.msk.f32.vlgmr.msra.gmra.mrb[6].mxu0 %vm616_vm6, %v888_v17 }
 0x4ab   :  { %5356 = vmatpush3.bf16.msra.mxu0 %v6580_v39  ;;  %v657_v26 = vmul.f32 %v5606_v20, %v6698_v30 }
 0x4ac   :  { %5363 = vmatprep.subr.msk.bf16.mxu0 %vm6614_vm2, %v5361_v25 }
 0x4ad   :  { %5090 = vmatprep.mubr.msk.f32.mxu0 %vm616_vm6, %v657_v26 }
 0x4b3   :  { %v646_v24 = vpop.xlane.xlu0 %645 }
 0x4b4   :  { %5607 = vrcp.f32 %v646_v24 }
 0x4b5   :  { %5609 = vrcp.f32 %v649_v4 }
 0x4b7   :  { %v652_v27 = vpop.xlane.xlu0 %651 }
 0x4bb   :  { %v882_v28 = vpop.xlane.xlu0 %881 }
 0x4bc   :  { %5611 = vrcp.f32 %v882_v28 }
 0x4be   :  { %v5608_v23 = vpop.eup %5607 }
 0x4bf   :  { %v5542_v31 = vpop.permute.xlu0 %5541  ;;  %v658_v32 = vmul.f32 %v5608_v23, %v5594_v56  ;;  %v5610_v49 = vpop.eup %5609 }
 0x4c0   :  { %v5544_v34 = vunpack.i.h.bf16 %v5542_v31  ;;  %v5543_v35 = vunpack.i.l.bf16 %v5542_v31  ;;  %v659_v59 = vmul.f32 %v5610_v49, %v6703_v33 }
 0x4c1   :  { %5091 = vmatmul.mubr.msk.f32.vlgmr.msra.gmra.mrb[6].mxu0 %vm616_vm6, %v658_v32 }
 0x4c2   :  { %5366 = vmatpush3.bf16.xpose.msk.msra.mxu0 %vm6614_vm2, %v5361_v25  ;;  %v5349_v39 = vpack.c.bf16 %v5544_v34, %v5543_v35 }
 0x4c3   :  { %v1232_v30 = vpop.permute.xlu0 %1231 }
 0x4c4   :  { %5350 = vmatprep.subr.bf16.mxu1 %v5349_v39  ;;  %5104 = vmatprep.mubr.msk.f32.mxu0 %vm427_vm1, %v1232_v30 }
 0x4c5   :  { %5352 = vmatpush3.bf16.msra.mxu1 %v5349_v39 }
 0x4c6   :  { %5358 = vmatprep.subr.bf16.mxu1 %v6584_v41  ;;  %v5612_v50 = vpop.eup %5611 }
 0x4c7   :  { %v890_v55 = vmul.f32 %v5612_v50, %v6713_v57 }
 0x4d8   :  { %v879_v46 = vpop.xlane.xlu1 %878 }
 0x4d9   :  { %5613 = vrcp.f32 %v879_v46 }
 0x4da   :  { %5615 = vrcp.f32 %v652_v27 }
 0x4dc   :  { %v5552_v47 = vpop.permute.xlu1 %5551 }
 0x4dd   :  { %v5554_v54 = vunpack.i.h.bf16 %v5552_v47  ;;  %v5553_v56 = vunpack.i.l.bf16 %v5552_v47 }
 0x4df   :  { %v5367_v61 = vpack.c.bf16 %v5554_v54, %v5553_v56 }
 0x4e0   :  { %v1234_v48 = vpop.permute.xlu1 %1233 }
 0x4e1   :  { %5105 = vmatmul.mubr.msk.f32.vlgmr.msra.gmra.mrb[8].mxu0 %vm427_vm1, %v1234_v48 }
 0x4e3   :  { %v5614_v51 = vpop.eup %5613 }
 0x4e4   :  { %v889_v58 = vmul.f32 %v5614_v51, %v5600_v63  ;;  %v5616_v62 = vpop.eup %5615  ;;  %v1323_v63 = vpop.permute.xlu0 %1322 }
 0x4e5   :  { %v660_v1 = vmul.f32 %v5616_v62, %v6709_v60  ;;  %v1325_v33 = vpop.permute.xlu1 %1324 }
 0x4e6   :  { %5083 = vmatprep.mubr.msk.f32.mxu1 %vm616_vm6, %v889_v58 }
 0x4e7   :  { %5084 = vmatmul.mubr.msk.f32.vlgmr.msra.gmra.mrb[10].mxu1 %vm616_vm6, %v890_v55 }
 0x4e8   :  { %5360 = vmatpush3.bf16.msra.mxu1 %v6584_v41  ;;  %5097 = vmatprep.mubr.msk.f32.mxu1 %vm616_vm6, %v659_v59 }
 0x4e9   :  { %5369 = vmatprep.subr.msk.bf16.mxu1 %vm6614_vm2, %v5367_v61 }
 0x4ef   :  { %5098 = vmatmul.mubr.msk.f32.vlgmr.msra.gmra.mrb[10].mxu1 %vm616_vm6, %v660_v1 }
 0x4f0   :  { %5111 = vmatprep.mubr.msk.f32.mxu1 %vm427_vm1, %v1323_v63 }
 0x4f1   :  { %5372 = vmatpush3.bf16.xpose.msk.msra.mxu1 %vm6614_vm2, %v5367_v61 }
 0x4f8   :  { %5112 = vmatmul.mubr.msk.f32.vlgmr.msra.gmra.mrb[12].mxu1 %vm427_vm1, %v1325_v33 }
 0x5b4   :  { %v5106_v41 = vpop.f32.mrb[8].mxu0 }
 0x5b5   :  { %v1414_v57 = vsel %vm6654_vm5, -1e+09, %v5106_v41  ;;  %v1313_v53 = vpop.f32.mrb[9].mxu0 }
 0x5b6   :  { %v1413_v2 = vsel %vm6654_vm5, -1e+09, %v1313_v53  ;;  %v1420_v60 = vsel %vm616_vm6, %v1414_v57, -inf }
 0x5b7   :  { %1421 = vmax.xlane.f32.xlu1 %v1420_v60  ;;  %v1417_v3 = vsel %vm616_vm6, %v1413_v2, -inf }
 0x5b8   :  { %1418 = vmax.xlane.f32.xlu0 %v1417_v3 }
 0x5c8   :  { %5556 = vrot.lane.b32.xlu1 %v6578_v38, %s6180_s26 }
 0x5cb   :  { %v5113_v4 = vpop.f32.mrb[12].mxu1 }
 0x5cc   :  { %v1404_v5 = vpop.f32.mrb[13].mxu1  ;;  %5566 = vrot.lane.b32.xlu1 %v6592_v44, %s6181_s1  ;;  %v1416_v9 = vsel %vm6669_vm7, -1e+09, %v5113_v4 }
 0x5cd   :  { %v1415_v6 = vsel %vm6669_vm7, -1e+09, %v1404_v5  ;;  %v1426_v10 = vsel %vm616_vm6, %v1416_v9, -inf }
 0x5ce   :  { %v1423_v8 = vsel %vm616_vm6, %v1415_v6, -inf }
 0x5cf   :  { %1424 = vmax.xlane.f32.xlu0 %v1423_v8 }
 0x5d0   :  { %5571 = vrot.lane.b32.xlu1 %v6599_v45, %s6181_s1 }
 0x5d3   :  { %1427 = vmax.xlane.f32.xlu0 %v1426_v10 }
 0x5e9   :  { %5561 = vrot.lane.b32.xlu0 %v6582_v40, %s6180_s26 }
 0x644   :  { %v1422_v12 = vpop.xlane.xlu1 %1421 }
 0x645   :  { %v1430_v17 = vsub.f32 %v1414_v57, %v1422_v12  ;;  %v1419_v44 = vpop.xlane.xlu0 %1418 }
 0x646   :  { %v1429_v20 = vsub.f32 %v1413_v2, %v1419_v44 }
 0x647   :  { %v1435_v25 = vmul.f32 1.442695, %v1430_v17 }
 0x648   :  { %v1433_v26 = vmul.f32 1.442695, %v1429_v20  ;;  %v5557_v24 = vpop.permute.xlu1 %5556 }
 0x649   :  { %5617 = vpow2.f32 %v1435_v25  ;;  %v5559_v27 = vunpack.i.h.bf16 %v5557_v24  ;;  %v5558_v28 = vunpack.i.l.bf16 %v5557_v24 }
 0x64a   :  { %5619 = vpow2.f32 %v1433_v26 }
 0x64b   :  { %v5373_v23 = vpack.c.bf16 %v5559_v27, %v5558_v28 }
 0x64c   :  { %v5567_v31 = vpop.permute.xlu1 %5566 }
 0x64d   :  { %v5569_v45 = vunpack.i.h.bf16 %v5567_v31  ;;  %v5568_v32 = vunpack.i.l.bf16 %v5567_v31  ;;  %5374 = vmatprep.subr.bf16.mxu0 %v5373_v23 }
 0x64e   :  { %5376 = vmatpush3.bf16.msra.mxu0 %v5373_v23 }
 0x64f   :  { %v5381_v34 = vpack.c.bf16 %v5569_v45, %v5568_v32 }
 0x650   :  { %v5572_v49 = vpop.permute.xlu1 %5571 }
 0x651   :  { %5383 = vmatprep.subr.msk.bf16.mxu0 %vm6614_vm2, %v5381_v34  ;;  %v5574_v54 = vunpack.i.h.bf16 %v5572_v49  ;;  %v5573_v58 = vunpack.i.l.bf16 %v5572_v49 }
 0x653   :  { %v5618_v35 = vpop.eup %5617  ;;  %v5387_v62 = vpack.c.bf16 %v5574_v54, %v5573_v58 }
 0x654   :  { %v5620_v39 = vpop.eup %5619  ;;  %v1444_v30 = vsel %vm616_vm6, %v5618_v35, 0.0 }
 0x655   :  { %1445 = vadd.xlane.f32.xlu0 %v1444_v30  ;;  %v1441_v46 = vsel %vm616_vm6, %v5620_v39, 0.0 }
 0x656   :  { %1442 = vadd.xlane.f32.xlu1 %v1441_v46 }
 0x65c   :  { %v1425_v47 = vpop.xlane.xlu0 %1424 }
 0x65d   :  { %v1431_v33 = vsub.f32 %v1415_v6, %v1425_v47 }
 0x65f   :  { %v1437_v41 = vmul.f32 1.442695, %v1431_v33 }
 0x660   :  { %v1428_v48 = vpop.xlane.xlu0 %1427 }
 0x661   :  { %v1432_v50 = vsub.f32 %v1416_v9, %v1428_v48 }
 0x663   :  { %v1439_v51 = vmul.f32 1.442695, %v1432_v50 }
 0x664   :  { %v5562_v56 = vpop.permute.xlu0 %5561 }
 0x665   :  { %5621 = vpow2.f32 %v1439_v51  ;;  %v5564_v55 = vunpack.i.h.bf16 %v5562_v56  ;;  %v5563_v59 = vunpack.i.l.bf16 %v5562_v56 }
 0x666   :  { %5623 = vpow2.f32 %v1437_v41 }
 0x667   :  { %1641 = vrot.lane.b32.xlu1 %v6576_v37, %s6182_s18  ;;  %v5377_v61 = vpack.c.bf16 %v5564_v55, %v5563_v59 }
 0x669   :  { %5378 = vmatprep.subr.bf16.mxu1 %v5377_v61 }
 0x66a   :  { %5380 = vmatpush3.bf16.msra.mxu1 %v5377_v61 }
 0x66b   :  { %5389 = vmatprep.subr.msk.bf16.mxu1 %vm6614_vm2, %v5387_v62 }
 0x66f   :  { %v5622_v1 = vpop.eup %5621 }
 0x670   :  { %v1450_v63 = vsel %vm616_vm6, %v5622_v1, 0.0  ;;  %v5624_v57 = vpop.eup %5623 }
 0x671   :  { %1451 = vadd.xlane.f32.xlu0 %v1450_v63  ;;  %v1447_v37 = vsel %vm616_vm6, %v5624_v57, 0.0 }
 0x687   :  { %1639 = vrot.lane.b32.xlu0 %v6572_v29, %s6182_s18 }
 0x68b   :  { %1730 = vrot.lane.b32.xlu0 %v6586_v42, %s6182_s18  ;;  %1448 = vadd.xlane.f32.xlu1 %v1447_v37 }
 0x69c   :  { %1732 = vrot.lane.b32.xlu1 %v6588_v43, %s6182_s18 }
 0x6e2   :  { %v1446_v53 = vpop.xlane.xlu0 %1445 }
 0x6e3   :  { %5625 = vrcp.f32 %v1446_v53  ;;  %v1443_v2 = vpop.xlane.xlu1 %1442 }
 0x6e4   :  { %5627 = vrcp.f32 %v1443_v2 }
 0x6e7   :  { %v1642_v6 = vpop.permute.xlu1 %1641 }
 0x6ed   :  { %v5626_v60 = vpop.eup %5625 }
 0x6ee   :  { %v5628_v3 = vpop.eup %5627  ;;  %v1458_v5 = vmul.f32 %v5626_v60, %v5618_v35 }
 0x6ef   :  { %v1457_v4 = vmul.f32 %v5628_v3, %v5620_v39 }
 0x6f1   :  { %5118 = vmatprep.mubr.msk.f32.mxu0 %vm616_vm6, %v1457_v4 }
 0x6f2   :  { %5119 = vmatmul.mubr.msk.f32.vlgmr.msra.gmra.mrb[6].mxu0 %vm616_vm6, %v1458_v5 }
 0x6f3   :  { %5386 = vmatpush3.bf16.xpose.msk.msra.mxu0 %vm6614_vm2, %v5381_v34 }
 0x6fe   :  { %v1452_v29 = vpop.xlane.xlu0 %1451 }
 0x6ff   :  { %5629 = vrcp.f32 %v1452_v29 }
 0x702   :  { %v1640_v42 = vpop.permute.xlu0 %1639 }
 0x703   :  { %5132 = vmatprep.mubr.msk.f32.mxu0 %vm427_vm1, %v1640_v42 }
 0x704   :  { %5133 = vmatmul.mubr.msk.f32.vlgmr.msra.gmra.mrb[10].mxu0 %vm427_vm1, %v1642_v6 }
 0x706   :  { %v1731_v17 = vpop.permute.xlu0 %1730 }
 0x709   :  { %v5630_v8 = vpop.eup %5629 }
 0x70a   :  { %v1460_v12 = vmul.f32 %v5630_v8, %v5622_v1 }
 0x718   :  { %v1449_v43 = vpop.xlane.xlu1 %1448 }
 0x719   :  { %5631 = vrcp.f32 %v1449_v43 }
 0x71c   :  { %v1733_v44 = vpop.permute.xlu1 %1732 }
 0x723   :  { %v5632_v9 = vpop.eup %5631 }
 0x724   :  { %v1459_v10 = vmul.f32 %v5632_v9, %v5624_v57 }
 0x726   :  { %5125 = vmatprep.mubr.msk.f32.mxu1 %vm616_vm6, %v1459_v10 }
 0x727   :  { %5126 = vmatmul.mubr.msk.f32.vlgmr.msra.gmra.mrb[10].mxu1 %vm616_vm6, %v1460_v12 }
 0x728   :  { %5392 = vmatpush3.bf16.xpose.msk.msra.mxu1 %vm6614_vm2, %v5387_v62  ;;  %5139 = vmatprep.mubr.msk.f32.mxu1 %vm427_vm1, %v1731_v17  ;;  %v4826_v17 = vld [vmem:[#allocation5] ss:$0 sm:$0xff] }
 0x72f   :  { %5140 = vmatmul.mubr.msk.f32.vlgmr.msra.gmra.mrb[14].mxu1 %vm427_vm1, %v1733_v44 }
 0x7d7   :  { %v5134_v20 = vpop.f32.mrb[10].mxu0 }
 0x7d8   :  { %v1822_v25 = vsel %vm6654_vm5, -1e+09, %v5134_v20  ;;  %v1721_v26 = vpop.f32.mrb[11].mxu0 }
 0x7d9   :  { %v1821_v24 = vsel %vm6654_vm5, -1e+09, %v1721_v26  ;;  %v1828_v27 = vsel %vm616_vm6, %v1822_v25, -inf }
 0x7da   :  { %1829 = vmax.xlane.f32.xlu1 %v1828_v27  ;;  %v1825_v28 = vsel %vm616_vm6, %v1821_v24, -inf }
 0x7db   :  { %1826 = vmax.xlane.f32.xlu0 %v1825_v28 }
 0x802   :  { %v5141_v52 = vpop.f32.mrb[14].mxu1 }
 0x803   :  { %v1812_v23 = vpop.f32.mrb[15].mxu1  ;;  %v1824_v32 = vsel %vm6669_vm7, -1e+09, %v5141_v52 }
 0x804   :  { %v1823_v31 = vsel %vm6669_vm7, -1e+09, %v1812_v23  ;;  %v1834_v22 = vsel %vm616_vm6, %v1824_v32, -inf  ;;  %vm6185_vm7 = vmmov 0  }
 0x805   :  { %v1831_v45 = vsel %vm616_vm6, %v1823_v31, -inf }
 0x806   :  { %1832 = vmax.xlane.f32.xlu0 %v1831_v45 }
 0x80a   :  { %1835 = vmax.xlane.f32.xlu0 %v1834_v22 }
 0x867   :  { %v1830_v34 = vpop.xlane.xlu1 %1829 }
 0x868   :  { %v1838_v35 = vsub.f32 %v1822_v25, %v1830_v34  ;;  %v1827_v39 = vpop.xlane.xlu0 %1826 }
 0x869   :  { %v1837_v30 = vsub.f32 %v1821_v24, %v1827_v39 }
 0x86a   :  { %v1843_v46 = vmul.f32 1.442695, %v1838_v35 }
 0x86b   :  { %v1841_v47 = vmul.f32 1.442695, %v1837_v30 }
 0x86c   :  { %5633 = vpow2.f32 %v1843_v46 }
 0x86d   :  { %5635 = vpow2.f32 %v1841_v47 }
 0x876   :  { %v5634_v48 = vpop.eup %5633 }
 0x877   :  { %v5636_v49 = vpop.eup %5635  ;;  %v1852_v50 = vsel %vm616_vm6, %v5634_v48, 0.0 }
 0x878   :  { %1853 = vadd.xlane.f32.xlu0 %v1852_v50  ;;  %v1849_v36 = vsel %vm616_vm6, %v5636_v49, 0.0 }
 0x879   :  { %1850 = vadd.xlane.f32.xlu1 %v1849_v36 }
 0x893   :  { %v1833_v51 = vpop.xlane.xlu0 %1832 }
 0x894   :  { %v1839_v54 = vsub.f32 %v1823_v31, %v1833_v51 }
 0x896   :  { %v1845_v56 = vmul.f32 1.442695, %v1839_v54 }
 0x897   :  { %v1836_v58 = vpop.xlane.xlu0 %1835 }
 0x898   :  { %5637 = vpow2.f32 %v1845_v56  ;;  %v1840_v55 = vsub.f32 %v1824_v32, %v1836_v58 }
 0x89a   :  { %v1847_v59 = vmul.f32 1.442695, %v1840_v55 }
 0x89c   :  { %5639 = vpow2.f32 %v1847_v59 }
 0x8a2   :  { %v5638_v61 = vpop.eup %5637 }
 0x8a3   :  { %v1855_v62 = vsel %vm616_vm6, %v5638_v61, 0.0 }
 0x8a4   :  { %1856 = vadd.xlane.f32.xlu1 %v1855_v62 }
 0x8a6   :  { %v5640_v1 = vpop.eup %5639 }
 0x8a7   :  { %v1858_v63 = vsel %vm616_vm6, %v5640_v1, 0.0 }
 0x8a8   :  { %1859 = vadd.xlane.f32.xlu0 %v1858_v63  ;;  %v2160_v63 = vld [vmem:[#allocation10 + $0x8] sm:$0xff] }
 0x8b5   :  { %5576 = vrot.lane.b32.xlu1 %v6578_v38, %s6183_s4 }
 0x8be   :  { %5581 = vrot.lane.b32.xlu0 %v6582_v40, %s6183_s4 }
 0x905   :  { %v1854_v37 = vpop.xlane.xlu0 %1853 }
 0x906   :  { %v1851_v33 = vpop.xlane.xlu1 %1850 }
 0x907   :  { %5641 = vrcp.f32 %v1851_v33  ;;  %v2162_v33 = vld [vmem:[#allocation10 + $0x18] sm:$0xff] }
 0x908   :  { %5643 = vrcp.f32 %v1854_v37  ;;  %v2161_v37 = vld [vmem:[#allocation10 + $0x10] sm:$0xff] }
 0x911   :  { %v5642_v41 = vpop.eup %5641 }
 0x912   :  { %v1865_v57 = vmul.f32 %v5642_v41, %v5636_v49  ;;  %v5644_v38 = vpop.eup %5643  ;;  %v5401_v41 = vpack.c.bf16 %v2162_v33, %v2160_v63  ;;  %v269_v63 = vld [vmem:[#allocation25] sm:$0x7] }
 0x913   :  { %v1866_v43 = vmul.f32 %v5644_v38, %v5634_v48  ;;  %v2262_v38 = vld [vmem:[#allocation7] sm:$0xff] }
 0x914   :  { %5146 = vmatprep.mubr.msk.f32.mxu0 %vm616_vm6, %v1865_v57  ;;  %v2159_v57 = vld [vmem:[#allocation10] sm:$0xff] }
 0x931   :  { %v1857_v53 = vpop.xlane.xlu1 %1856 }
 0x932   :  { %5645 = vrcp.f32 %v1857_v53  ;;  %v2164_v53 = vld [vmem:[#allocation10 + $0x28] sm:$0xff] }
 0x935   :  { %v5577_v2 = vpop.permute.xlu1 %5576  ;;  %v1860_v60 = vpop.xlane.xlu0 %1859 }
 0x936   :  { %v5579_v3 = vunpack.i.h.bf16 %v5577_v2  ;;  %v5578_v4 = vunpack.i.l.bf16 %v5577_v2  ;;  %5647 = vrcp.f32 %v1860_v60  ;;  %v5403_v2 = vpack.c.bf16 %v2161_v37, %v2159_v57  ;;  %v2166_v60 = vld [vmem:[#allocation10 + $0x38] sm:$0xff] }
 0x937   :  { %v2154_v37 = vrot.slane %v269_v63, %v6568_v21 }
 0x938   :  { %v5393_v5 = vpack.c.bf16 %v5579_v3, %v5578_v4  ;;  %v2163_v3 = vld [vmem:[#allocation10 + $0x20] sm:$0xff]  ;;  %v2165_v4 = vld [vmem:[#allocation10 + $0x30] sm:$0xff] }
 0x939   :  { %v5582_v29 = vpop.permute.xlu0 %5581 }
 0x93a   :  { %v5584_v42 = vunpack.i.h.bf16 %v5582_v29  ;;  %v5583_v40 = vunpack.i.l.bf16 %v5582_v29  ;;  %5394 = vmatprep.subr.bf16.mxu0 %v5393_v5  ;;  %v2263_v29 = vld [vmem:[#allocation7 + $0x8] sm:$0xff] }
 0x93b   :  { %5396 = vmatpush3.bf16.msra.mxu0 %v5393_v5  ;;  %v5405_v5 = vpack.c.bf16 %v2166_v60, %v2164_v53 }
 0x93c   :  { %v5646_v6 = vpop.eup %5645  ;;  %v5397_v8 = vpack.c.bf16 %v5584_v42, %v5583_v40  ;;  %5402 = vmatprep.subr.bf16.mxu0 %v5401_v41  ;;  %v5407_v42 = vpack.c.bf16 %v2165_v4, %v2163_v3  ;;  %v5409_v40 = vpack.c.bf16 %v2263_v29, %v2262_v38 }
 0x93d   :  { %v1867_v9 = vmul.f32 %v5646_v6, %v5638_v61  ;;  %v2264_v6 = vld [vmem:[#allocation7 + $0x10] sm:$0xff] }
 0x93e   :  { %5147 = vmatmul.mubr.msk.f32.vlgmr.msra.gmra.mrb[6].mxu0 %vm616_vm6, %v1866_v43  ;;  %5398 = vmatprep.subr.bf16.mxu1 %v5397_v8  ;;  %v2265_v43 = vld [vmem:[#allocation7 + $0x18] sm:$0xff] }
 0x93f   :  { %5400 = vmatpush3.bf16.msra.mxu1 %v5397_v8  ;;  %5153 = vmatprep.mubr.msk.f32.mxu1 %vm616_vm6, %v1867_v9  ;;  %v5413_v8 = vpack.c.bf16 %v2265_v43, %v2264_v6  ;;  %v266_v9 = vld [vmem:[%s7369_s11] sm:$0xff] }
 0x940   :  { %v5648_v10 = vpop.eup %5647  ;;  %2249 = vmatprep.mubr.f32.mxu0 %v6172_v0  ;;  %5404 = vmatpush1.bf16.msra.mxu0 %v5403_v2 }
 0x941   :  { %v1868_v12 = vmul.f32 %v5648_v10, %v5640_v1  ;;  %5406 = vmatprep.subr.bf16.mxu0 %v5405_v5  ;;  %5410 = vmatprep.subr.bf16.mxu1 %v5409_v40  ;;  %v267_v10 = vld [vmem:[%s7369_s11 + $0x8] sm:$0xff] }
 0x943   :  { %5154 = vmatmul.mubr.msk.f32.vlgmr.msra.gmra.mrb[10].mxu1 %vm616_vm6, %v1868_v12  ;;  %vm4110_vm6 = vcmask 1043456  }
 0x944   :  { %5412 = vmatpush3.bf16.msra.mxu1 %v5409_v40  ;;  %5408 = vmatpush1.bf16.msra.mxu0 %v5407_v42 }
 0x945   :  { %5414 = vmatprep.subr.bf16.mxu1 %v5413_v8 }
 0x947   :  { %4827 = vmatmul.mubr.msk.f32.vlgmr.msra.gmra.mrb[12].mxu0 %vm290_vm0, %v266_v9 }
 0x948   :  { %5416 = vmatpush3.bf16.msra.mxu1 %v5413_v8  ;;  %2255 = vmatprep.mubr.f32.mxu0 %v6172_v0 }
 0x94b   :  { %4828 = vmatmul.mubr.msk.f32.gmra.mrb[14].mxu0 %vm290_vm0, %v267_v10 }
 0xa11   :  { %v5148_v44 = vpop.f32.mrb[6].mxu0 }
 0xa12   :  { %v2054_v20 = vadd.f32 %v5148_v44, %v4826_v17  ;;  %v1947_v25 = vpop.f32.mrb[7].mxu0 }
 0xa13   :  { %v2053_v26 = vadd.f32 %v4826_v17, %v1947_v25 }
 0xa14   :  { %v2058_v24 = vadd.f32 %v2054_v20, %v6550_v15 }
 0xa15   :  { %v2057_v27 = vadd.f32 %v2053_v26, %v6535_v13 }
 0xa16   :  { %v5155_v28 = vpop.f32.mrb[10].mxu1  ;;  %v2064_v52 = vsel %vm290_vm0, %v2058_v24, 0.0 }
 0xa17   :  { %v2056_v23 = vadd.f32 %v5155_v28, %v4826_v17  ;;  %2065 = vadd.xlane.f32.xlu0 %v2064_v52  ;;  %v2034_v31 = vpop.f32.mrb[11].mxu1  ;;  %v2061_v45 = vsel %vm290_vm0, %v2057_v27, 0.0 }
 0xa18   :  { %v2055_v32 = vadd.f32 %v4826_v17, %v2034_v31  ;;  %2062 = vadd.xlane.f32.xlu1 %v2061_v45 }
 0xa19   :  { %v2060_v22 = vadd.f32 %v2056_v23, %v6556_v16 }
 0xa1a   :  { %v2059_v34 = vadd.f32 %v2055_v32, %v6540_v14  ;;  %v2251_v8 = vpop.f32.mrb[12].mxu0 }
 0xa1b   :  { %v2070_v35 = vsel %vm290_vm0, %v2060_v22, 0.0  ;;  %v2253_v10 = vpop.f32.mrb[13].mxu0 }
 0xa1c   :  { %2071 = vadd.xlane.f32.xlu0 %v2070_v35  ;;  %v2067_v15 = vsel %vm290_vm0, %v2059_v34, 0.0 }
 0xa1d   :  { %2068 = vadd.xlane.f32.xlu1 %v2067_v15 }
 0xaa4   :  { %v2066_v13 = vpop.xlane.xlu0 %2065 }
 0xaa5   :  { %v2075_v39 = vmul.f32 0.03125, %v2066_v13  ;;  %v2063_v30 = vpop.xlane.xlu1 %2062 }
 0xaa6   :  { %v2074_v46 = vmul.f32 0.03125, %v2063_v30 }
 0xaa7   :  { %v6837_v47 = vsub.f32 %v2058_v24, %v2075_v39 }
 0xaa8   :  { %v6839_v48 = vsub.f32 %v2057_v27, %v2074_v46 }
 0xaa9   :  { %v2072_v49 = vpop.xlane.xlu0 %2071  ;;  %v2083_v16 = vmul.f32 %v6837_v47, %v6837_v47 }
 0xaaa   :  { %v2077_v50 = vmul.f32 0.03125, %v2072_v49  ;;  %v2069_v14 = vpop.xlane.xlu1 %2068  ;;  %v2082_v36 = vmul.f32 %v6839_v48, %v6839_v48 }
 0xaab   :  { %v2076_v51 = vmul.f32 0.03125, %v2069_v14  ;;  %v2089_v54 = vsel %vm290_vm0, %v2083_v16, 0.0 }
 0xaac   :  { %v6846_v56 = vsub.f32 %v2060_v22, %v2077_v50  ;;  %2090 = vadd.xlane.f32.xlu0 %v2089_v54  ;;  %v2086_v58 = vsel %vm290_vm0, %v2082_v36, 0.0 }
 0xaad   :  { %v6849_v55 = vsub.f32 %v2059_v34, %v2076_v51  ;;  %2087 = vadd.xlane.f32.xlu1 %v2086_v58  ;;  %v268_v51 = vld [vmem:[#allocation23] sm:$0x7] }
 0xaae   :  { %v2085_v59 = vmul.f32 %v6846_v56, %v6846_v56 }
 0xaaf   :  { %v2084_v61 = vmul.f32 %v6849_v55, %v6849_v55 }
 0xab0   :  { %v2095_v62 = vsel %vm290_vm0, %v2085_v59, 0.0 }
 0xab1   :  { %2096 = vadd.xlane.f32.xlu0 %v2095_v62  ;;  %v2092_v1 = vsel %vm290_vm0, %v2084_v61, 0.0 }
 0xab2   :  { %2093 = vadd.xlane.f32.xlu1 %v2092_v1  ;;  %v2142_v1 = vrot.slane %v268_v51, %v6568_v21 }
 0xab4   :  { %v2144_v33 = vmul.f32 %v2142_v1, %v6837_v47  ;;  %v2143_v57 = vmul.f32 %v2142_v1, %v6839_v48  ;;  %v2146_v3 = vmul.f32 %v2142_v1, %v6846_v56  ;;  %v2145_v38 = vmul.f32 %v2142_v1, %v6849_v55  ;;  %v2167_v56 = vld [vmem:[#allocation11] sm:$0x3] }
 0xab5   :  { %v6889_v55 = vrot.slane %v2167_v56, %v6568_v21  ;;  %v2176_v43 = vrot.slane %v2167_v56, %v6565_v19 }
 0xab7   :  { %v6893_v9 = vadd.f32 %v2251_v8, %v6889_v55 }
 0xb39   :  { %v2091_v12 = vpop.xlane.xlu0 %2090 }
 0xb3a   :  { %v2100_v17 = vmul.f32 0.032258064, %v2091_v12  ;;  %v2088_v44 = vpop.xlane.xlu1 %2087  ;;  %v6895_v12 = vadd.f32 %v2253_v10, %v2176_v43 }
 0xb3b   :  { %v2099_v20 = vmul.f32 0.032258064, %v2088_v44 }
 0xb3c   :  { %5649 = vrsqrt.f32 %v2100_v17  ;;  %vm2112_vm8 = vcmp.eq.f32.partialorder %v2100_v17, inf  ;;  %v2115_v31 = vand.u32 2147483648, %v2100_v17  ;;  %vm2114_vm9 = vcmp.eq.f32.partialorder %v2100_v17, 0.0  ;;  %5170 = vmatprep.subr.msk.mxu0 %vm427_vm1, %v6895_v12  ;;  %2631 = vrot.lane.b32.xlu0 %v6895_v12, %s6175_s6 }
 0xb3d   :  { %5651 = vrsqrt.f32 %v2099_v20  ;;  %vm2105_vm10 = vcmp.eq.f32.partialorder %v2099_v20, inf  ;;  %v2108_v22 = vand.u32 2147483648, %v2099_v20  ;;  %vm2107_vm11 = vcmp.eq.f32.partialorder %v2099_v20, 0.0  ;;  %5171 = vmatpush3.xpose.msk.msra.mxu0 %vm427_vm1, %v6895_v12 }
 0xb3e   :  { %v2097_v25 = vpop.xlane.xlu0 %2096 }
 0xb3f   :  { %v2102_v26 = vmul.f32 0.032258064, %v2097_v25  ;;  %v2094_v24 = vpop.xlane.xlu1 %2093 }
 0xb40   :  { %v2101_v27 = vmul.f32 0.032258064, %v2094_v24  ;;  %v4829_v24 = vld [vmem:[#allocation8] ss:$0 sm:$0xff] }
 0xb41   :  { %5653 = vrsqrt.f32 %v2102_v26  ;;  %vm2126_vm12 = vcmp.eq.f32.partialorder %v2102_v26, inf  ;;  %vm2128_vm13 = vcmp.eq.f32.partialorder %v2102_v26, 0.0  ;;  %v2129_v16 = vand.u32 2147483648, %v2102_v26 }
 0xb42   :  { %5655 = vrsqrt.f32 %v2101_v27  ;;  %vm2119_vm14 = vcmp.eq.f32.partialorder %v2101_v27, inf  ;;  %v2122_v36 = vand.u32 2147483648, %v2101_v27  ;;  %vm2121_vm15 = vcmp.eq.f32.partialorder %v2101_v27, 0.0 }
 0xb46   :  { %v5650_v28 = vpop.eup %5649 }
 0xb47   :  { %v5652_v52 = vpop.eup %5651  ;;  %v2111_v23 = vmul.f32 %v5650_v28, %v2100_v17 }
 0xb48   :  { %v2104_v45 = vmul.f32 %v5652_v52, %v2099_v20 }
 0xb49   :  { %v2113_v32 = vsel %vm2112_vm8, %v2100_v17, %v2111_v23  ;;  %v6897_v17 = vpop.f32.mrb[14].mxu0  ;;  %vm4106_vm8 = vcmask 31744  }
 0xb4a   :  { %v2116_v34 = vsel %vm2114_vm9, %v2115_v31, %v2113_v32  ;;  %v2106_v35 = vsel %vm2105_vm10, %v2099_v20, %v2104_v45  ;;  %v2259_v44 = vpop.f32.mrb[15].mxu0  ;;  %v6994_v10 = vadd.f32 %v6897_v17, %v6889_v55  ;;  %vm4186_vm9 = vcmask 1041409  }
 0xb4b   :  { %v5654_v15 = vpop.eup %5653  ;;  %v2132_v13 = vadd.f32 1e-06, %v2116_v34  ;;  %v2109_v39 = vsel %vm2107_vm11, %v2108_v22, %v2106_v35  ;;  %v6905_v20 = vadd.f32 %v2259_v44, %v2176_v43 }
 0xb4c   :  { %v5656_v30 = vpop.eup %5655  ;;  %v2125_v46 = vmul.f32 %v5654_v15, %v2102_v26  ;;  %v2131_v49 = vadd.f32 1e-06, %v2109_v39 }
 0xb4d   :  { %5657 = vrcp.f32 %v2132_v13  ;;  %v2118_v50 = vmul.f32 %v5656_v30, %v2101_v27  ;;  %5175 = vmatprep.subr.msk.mxu1 %vm427_vm1, %v6905_v20  ;;  %2718 = vrot.lane.b32.xlu1 %v6905_v20, %s6175_s6 }
 0xb4e   :  { %v2127_v14 = vsel %vm2126_vm12, %v2102_v26, %v2125_v46  ;;  %5659 = vrcp.f32 %v2131_v49 }
 0xb4f   :  { %v2130_v54 = vsel %vm2128_vm13, %v2129_v16, %v2127_v14  ;;  %v2120_v58 = vsel %vm2119_vm14, %v2101_v27, %v2118_v50  ;;  %v4834_v16 = vld.sshfl [vmem:[%s7370_s15] sm:$0x11 pattern:$0x75316420] }
 0xb50   :  { %v2123_v59 = vsel %vm2121_vm15, %v2122_v36, %v2120_v58  ;;  %v2134_v61 = vadd.f32 1e-06, %v2130_v54  ;;  %v2380_v50 = vcombine.high %v4834_v16, %v4834_v16  ;;  %v2387_v36 = vrot.slane %v4834_v16, %v6645_v7 }
 0xb51   :  { %v2133_v62 = vadd.f32 1e-06, %v2123_v59 }
 0xb52   :  { %5661 = vrcp.f32 %v2134_v61  ;;  %v2394_v14 = vrot.slane %v2380_v50, %v6645_v7  ;;  %vm2397_vm3 = vcmp.gt.f32.partialorder %v2387_v36, 0.5 }
 0xb53   :  { %5663 = vrcp.f32 %v2133_v62  ;;  %v2567_v58 = vsel %vm2397_vm3, 1, %v6177_v11  ;;  %vm4547_vm3 = vcmask 523264  }
 0xb54   :  { %vm2398_vm2 = vcmp.gt.f32.partialorder %v2394_v14, 0.5  ;;  %v2572_v59 = vrot.slane %v2567_v58, %v6568_v21 }
 0xb55   :  { %v2568_v51 = vsel %vm2398_vm2, 1, %v6177_v11 }
 0xb56   :  { %v2576_v54 = vrot.slane %v2568_v51, %v6568_v21  ;;  %vm6966_vm5 = vcmp.eq.s32.totalorder %v2572_v59, 1 }
 0xb57   :  { %v5658_v41 = vpop.eup %5657 }
 0xb58   :  { %v5660_v53 = vpop.eup %5659  ;;  %v2148_v2 = vmul.f32 %v5658_v41, %v2144_v33  ;;  %vm6954_vm4 = vcmp.eq.s32.totalorder %v2576_v54, 1 }
 0xb59   :  { %v2147_v60 = vmul.f32 %v5660_v53, %v2143_v57 }
 0xb5a   :  { %v6874_v29 = vadd.f32 %v2154_v37, %v2148_v2 }
 0xb5b   :  { %v6871_v4 = vadd.f32 %v2154_v37, %v2147_v60 }
 0xb5c   :  { %v5662_v5 = vpop.eup %5661 }
 0xb5d   :  { %v5664_v42 = vpop.eup %5663  ;;  %5164 = vmatprep.mubr.msk.f32.mxu1 %vm290_vm0, %v6871_v4  ;;  %v2150_v47 = vmul.f32 %v5662_v5, %v2146_v3 }
 0xb5e   :  { %5165 = vmatmul.mubr.msk.f32.vlgmr.msra.gmra.mrb[16].mxu1 %vm290_vm0, %v6874_v29  ;;  %v2149_v48 = vmul.f32 %v5664_v42, %v2145_v38 }
 0xb5f   :  { %v6882_v6 = vadd.f32 %v2154_v37, %v2150_v47  ;;  %5176 = vmatpush3.xpose.msk.msra.mxu1 %vm427_vm1, %v6905_v20 }
 0xb60   :  { %v6880_v40 = vadd.f32 %v2154_v37, %v2149_v48 }
 0xb62   :  { %5167 = vmatprep.mubr.msk.f32.mxu1 %vm290_vm0, %v6880_v40 }
 0xb63   :  { %5168 = vmatmul.mubr.msk.f32.gmra.mrb[18].mxu1 %vm290_vm0, %v6882_v6 }
 0xbae   :  { %v2632_v25 = vpop.permute.xlu0 %2631 }
 0xbaf   :  { %5180 = vmatprep.subr.msk.mxu0 %vm427_vm1, %v2632_v25 }
 0xbbf   :  { %v2719_v26 = vpop.permute.xlu1 %2718 }
 0xbc0   :  { %5185 = vmatprep.subr.msk.mxu1 %vm427_vm1, %v2719_v26 }
 0xc31   :  { %v5166_v27 = vpop.f32.mrb[16].mxu1 }
 0xc32   :  { %v2351_v28 = vpop.f32.mrb[17].mxu1  ;;  %v6917_v23 = vadd.f32 %v5166_v27, %v4829_v24 }
 0xc33   :  { %v6915_v52 = vadd.f32 %v4829_v24, %v2351_v28 }
 0xc35   :  { %2627 = vrot.lane.b32.xlu0 %v6915_v52, %s6175_s6  ;;  %5172 = vmatprep.mubr.msk.f32.mxu0 %vm427_vm1, %v6915_v52 }
 0xc36   :  { %v5169_v31 = vpop.f32.mrb[18].mxu1  ;;  %5173 = vmatmul.mubr.msk.f32.vlgmr.msra.gmra.mrb[16].mxu0 %vm427_vm1, %v6917_v23 }
 0xc37   :  { %v6925_v45 = vadd.f32 %v5169_v31, %v4829_v24  ;;  %v2361_v32 = vpop.f32.mrb[19].mxu1  ;;  %5181 = vmatpush3.xpose.msk.msra.mxu0 %vm427_vm1, %v2632_v25 }
 0xc38   :  { %v6928_v22 = vadd.f32 %v4829_v24, %v2361_v32 }
 0xc39   :  { %2716 = vrot.lane.b32.xlu1 %v6925_v45, %s6175_s6 }
 0xc3a   :  { %5177 = vmatprep.mubr.msk.f32.mxu1 %vm427_vm1, %v6928_v22 }
 0xc3b   :  { %5178 = vmatmul.mubr.msk.f32.vlgmr.msra.gmra.mrb[20].mxu1 %vm427_vm1, %v6925_v45 }
 0xc3c   :  { %5186 = vmatpush3.xpose.msk.msra.mxu1 %vm427_vm1, %v2719_v26 }
 0xc3d   :  { %2714 = vrot.lane.b32.xlu1 %v6928_v22, %s6175_s6 }
 0xc41   :  { %2629 = vrot.lane.b32.xlu1 %v6917_v23, %s6175_s6 }
 0xca7   :  { %v2628_v34 = vpop.permute.xlu0 %2627 }
 0xca8   :  { %5182 = vmatprep.mubr.msk.f32.mxu0 %vm427_vm1, %v2628_v34 }
 0xcab   :  { %v2717_v35 = vpop.permute.xlu1 %2716 }
 0xcaf   :  { %v2715_v15 = vpop.permute.xlu1 %2714 }
 0xcb0   :  { %5187 = vmatprep.mubr.msk.f32.mxu1 %vm427_vm1, %v2715_v15 }
 0xcb1   :  { %5188 = vmatmul.mubr.msk.f32.vlgmr.msra.gmra.mrb[22].mxu1 %vm427_vm1, %v2717_v35 }
 0xcb3   :  { %v2630_v13 = vpop.permute.xlu1 %2629 }
 0xcb4   :  { %5183 = vmatmul.mubr.msk.f32.vlgmr.msra.gmra.mrb[18].mxu0 %vm427_vm1, %v2630_v13 }
 0xd09   :  { %v5174_v39 = vpop.f32.mrb[16].mxu0 }
 0xd0a   :  { %v2474_v30 = vpop.f32.mrb[17].mxu0  ;;  %v2580_v43 = vsel %vm6966_vm5, -1e+09, %v5174_v39 }
 0xd0b   :  { %v2579_v60 = vsel %vm6966_vm5, -1e+09, %v2474_v30  ;;  %v2586_v8 = vsel %vm427_vm1, %v2580_v43, -inf }
 0xd0c   :  { %v2583_v5 = vsel %vm427_vm1, %v2579_v60, -inf }
 0xd0e   :  { %v5179_v46 = vpop.f32.mrb[20].mxu1 }
 0xd0f   :  { %v2558_v49 = vpop.f32.mrb[21].mxu1  ;;  %v2582_v48 = vsel %vm6954_vm4, -1e+09, %v5179_v46 }
 0xd10   :  { %v2581_v33 = vsel %vm6954_vm4, -1e+09, %v2558_v49  ;;  %v2592_v56 = vsel %vm427_vm1, %v2582_v48, -inf }
 0xd11   :  { %v2589_v53 = vsel %vm427_vm1, %v2581_v33, -inf }
 0xd84   :  { %v5189_v62 = vpop.f32.mrb[22].mxu1 }
 0xd85   :  { %v6960_v1 = vsel %vm6954_vm4, -1e+09, %v5189_v62  ;;  %v2792_v7 = vpop.f32.mrb[23].mxu1 }
 0xd86   :  { %v2814_v63 = vsel %vm427_vm1, %v6960_v1, -inf  ;;  %v6978_v3 = vsel %vm6954_vm4, -1e+09, %v2792_v7 }
 0xd87   :  { %2815 = vmax.xlane.f32.xlu1 %v2814_v63  ;;  %v5184_v11 = vpop.f32.mrb[18].mxu0  ;;  %v2811_v38 = vsel %vm427_vm1, %v6978_v3, -inf }
 0xd88   :  { %v2705_v57 = vpop.f32.mrb[19].mxu0  ;;  %v2802_v42 = vsel %vm6966_vm5, -1e+09, %v5184_v11 }
 0xd89   :  { %v2801_v37 = vsel %vm6966_vm5, -1e+09, %v2705_v57  ;;  %v2808_v47 = vsel %vm427_vm1, %v2802_v42, -inf }
 0xd8a   :  { %v2805_v2 = vsel %vm427_vm1, %v2801_v37, -inf }
 0xd8b   :  { %2590 = vmax.xlane.f32.xlu1 %v2589_v53  ;;  %2806 = vmax.xlane.f32.xlu0 %v2805_v2 }
 0xd8f   :  { %2584 = vmax.xlane.f32.xlu1 %v2583_v5  ;;  %2812 = vmax.xlane.f32.xlu0 %v2811_v38 }
 0xd93   :  { %2809 = vmax.xlane.f32.xlu0 %v2808_v47 }
 0xd97   :  { %2593 = vmax.xlane.f32.xlu0 %v2592_v56 }
 0xd9b   :  { %2587 = vmax.xlane.f32.xlu0 %v2586_v8 }
 0xda0   :  { %2935 = vrot.lane.b32.xlu1 %v6994_v10, %s6174_s5 }
 0xe14   :  { %v2816_v44 = vpop.xlane.xlu1 %2815 }
 0xe15   :  { %v2820_v54 = vsub.f32 %v6960_v1, %v2816_v44 }
 0xe17   :  { %v2827_v7 = vmul.f32 1.442695, %v2820_v54 }
 0xe18   :  { %v2807_v25 = vpop.xlane.xlu0 %2806  ;;  %v2591_v26 = vpop.xlane.xlu1 %2590 }
 0xe19   :  { %v2597_v24 = vsub.f32 %v2581_v33, %v2591_v26  ;;  %v2817_v34 = vsub.f32 %v2801_v37, %v2807_v25 }
 0xe1b   :  { %v2603_v35 = vmul.f32 1.442695, %v2597_v24  ;;  %v2821_v55 = vmul.f32 1.442695, %v2817_v34 }
 0xe1c   :  { %v2813_v27 = vpop.xlane.xlu0 %2812  ;;  %v2585_v28 = vpop.xlane.xlu1 %2584 }
 0xe1d   :  { %v2595_v31 = vsub.f32 %v2579_v60, %v2585_v28  ;;  %v2819_v5 = vsub.f32 %v6978_v3, %v2813_v27 }
 0xe1f   :  { %v2599_v32 = vmul.f32 1.442695, %v2595_v31  ;;  %v2825_v38 = vmul.f32 1.442695, %v2819_v5 }
 0xe20   :  { %v2810_v15 = vpop.xlane.xlu0 %2809  ;;  %v2936_v13 = vpop.permute.xlu1 %2935 }
 0xe21   :  { %5195 = vmatprep.subr.mxu1 %v2936_v13  ;;  %5665 = vpow2.f32 %v2599_v32  ;;  %v2818_v49 = vsub.f32 %v2802_v42, %v2810_v15 }
 0xe22   :  { %5196 = vmatpush3.msra.mxu1 %v2936_v13  ;;  %5667 = vpow2.f32 %v2603_v35 }
 0xe23   :  { %5205 = vmatprep.subr.mxu1 %v6994_v10  ;;  %5669 = vpow2.f32 %v2821_v55  ;;  %v2823_v58 = vmul.f32 1.442695, %v2818_v49 }
 0xe24   :  { %v2594_v17 = vpop.xlane.xlu0 %2593 }
 0xe25   :  { %v2598_v39 = vsub.f32 %v2582_v48, %v2594_v17 }
 0xe27   :  { %v2605_v16 = vmul.f32 1.442695, %v2598_v39 }
 0xe28   :  { %v2588_v30 = vpop.xlane.xlu0 %2587 }
 0xe29   :  { %v2596_v46 = vsub.f32 %v2580_v43, %v2588_v30 }
 0xe2b   :  { %v2601_v50 = vmul.f32 1.442695, %v2596_v46  ;;  %v5666_v14 = vpop.eup %5665 }
 0xe2c   :  { %v2607_v36 = vsel %vm427_vm1, %v5666_v14, 0.0  ;;  %v7000_v51 = vpop.eup %5667 }
 0xe2d   :  { %5671 = vpow2.f32 %v2601_v50  ;;  %2608 = vadd.xlane.f32.xlu1 %v2607_v36  ;;  %v2613_v59 = vsel %vm427_vm1, %v7000_v51, 0.0  ;;  %v5670_v62 = vpop.eup %5669 }
 0xe2e   :  { %5673 = vpow2.f32 %v2605_v16  ;;  %v2829_v63 = vsel %vm427_vm1, %v5670_v62, 0.0 }
 0xe2f   :  { %5675 = vpow2.f32 %v2823_v58 }
 0xe30   :  { %5677 = vpow2.f32 %v2827_v7 }
 0xe31   :  { %2614 = vadd.xlane.f32.xlu1 %v2613_v59  ;;  %5679 = vpow2.f32 %v2825_v38 }
 0xe35   :  { %2830 = vadd.xlane.f32.xlu1 %v2829_v63 }
 0xe37   :  { %v5672_v33 = vpop.eup %5671 }
 0xe38   :  { %v2610_v11 = vsel %vm427_vm1, %v5672_v33, 0.0  ;;  %v7007_v57 = vpop.eup %5673 }
 0xe39   :  { %2611 = vadd.xlane.f32.xlu0 %v2610_v11  ;;  %v2616_v1 = vsel %vm427_vm1, %v7007_v57, 0.0  ;;  %v5676_v37 = vpop.eup %5675 }
 0xe3a   :  { %v2832_v53 = vsel %vm427_vm1, %v5676_v37, 0.0  ;;  %v7012_v2 = vpop.eup %5677 }
 0xe3b   :  { %v2838_v60 = vsel %vm427_vm1, %v7012_v2, 0.0  ;;  %v5680_v42 = vpop.eup %5679 }
 0xe3c   :  { %v2835_v47 = vsel %vm427_vm1, %v5680_v42, 0.0 }
 0xe3d   :  { %2617 = vadd.xlane.f32.xlu0 %v2616_v1 }
 0xe41   :  { %2833 = vadd.xlane.f32.xlu0 %v2832_v53 }
 0xe45   :  { %2839 = vadd.xlane.f32.xlu0 %v2838_v60 }
 0xe46   :  { %3272 = vrot.lane.b32.xlu1 %v6905_v20, %s6179_s13 }
 0xe5b   :  { %2850 = vrot.lane.b32.xlu0 %v6893_v9, %s6174_s5 }
 0xe5f   :  { %3268 = vrot.lane.b32.xlu0 %v6928_v22, %s6179_s13 }
 0xe63   :  { %3181 = vrot.lane.b32.xlu0 %v6915_v52, %s6179_s13 }
 0xe6a   :  { %2836 = vadd.xlane.f32.xlu1 %v2835_v47 }
 0xe7b   :  { %3185 = vrot.lane.b32.xlu1 %v6895_v12, %s6179_s13 }
 0xe7f   :  { %3270 = vrot.lane.b32.xlu1 %v6925_v45, %s6179_s13 }
 0xe83   :  { %3183 = vrot.lane.b32.xlu1 %v6917_v23, %s6179_s13 }
 0xeba   :  { %v2609_v3 = vpop.xlane.xlu1 %2608 }
 0xebe   :  { %v2615_v48 = vpop.xlane.xlu1 %2614 }
 0xec2   :  { %v2831_v56 = vpop.xlane.xlu1 %2830 }
 0xec3   :  { %5681 = vrcp.f32 %v2831_v56 }
 0xec4   :  { %5683 = vrcp.f32 %v2609_v3 }
 0xec6   :  { %v2612_v43 = vpop.xlane.xlu0 %2611  ;;  %v3273_v17 = vpop.permute.xlu1 %3272 }
 0xeca   :  { %v2618_v8 = vpop.xlane.xlu0 %2617 }
 0xecd   :  { %v5682_v44 = vpop.eup %5681 }
 0xece   :  { %v2834_v25 = vpop.xlane.xlu0 %2833  ;;  %v2845_v26 = vmul.f32 %v5682_v44, %v5670_v62  ;;  %v5684_v28 = vpop.eup %5683 }
 0xecf   :  { %5685 = vrcp.f32 %v2834_v25  ;;  %v2623_v34 = vmul.f32 %v5684_v28, %v5666_v14 }
 0xed0   :  { %5192 = vmatprep.mubr.msk.f32.mxu0 %vm427_vm1, %v2845_v26  ;;  %5687 = vrcp.f32 %v2612_v43 }
 0xed1   :  { %5689 = vrcp.f32 %v2615_v48 }
 0xed2   :  { %v2840_v24 = vpop.xlane.xlu0 %2839 }
 0xed3   :  { %5691 = vrcp.f32 %v2840_v24 }
 0xed6   :  { %v2851_v27 = vpop.permute.xlu0 %2850 }
 0xed7   :  { %5190 = vmatprep.subr.mxu0 %v2851_v27 }
 0xed8   :  { %5191 = vmatpush3.msra.mxu0 %v2851_v27 }
 0xed9   :  { %v5686_v31 = vpop.eup %5685  ;;  %5200 = vmatprep.subr.mxu0 %v6893_v9 }
 0xeda   :  { %v2846_v32 = vmul.f32 %v5686_v31, %v5676_v37  ;;  %v3269_v35 = vpop.permute.xlu0 %3268  ;;  %v5688_v15 = vpop.eup %5687 }
 0xedb   :  { %v2624_v13 = vmul.f32 %v5688_v15, %v5672_v33  ;;  %v5690_v49 = vpop.eup %5689 }
 0xedc   :  { %5193 = vmatmul.mubr.msk.f32.vlgmr.msra.gmra.mrb[20].mxu0 %vm427_vm1, %v2846_v32  ;;  %v2625_v58 = vmul.f32 %v5690_v49, %v7000_v51 }
 0xedd   :  { %5201 = vmatpush3.msra.mxu0 %v6893_v9  ;;  %5202 = vmatprep.mubr.msk.f32.mxu0 %vm427_vm1, %v2623_v34  ;;  %v5692_v16 = vpop.eup %5691 }
 0xede   :  { %v3182_v55 = vpop.permute.xlu0 %3181  ;;  %v2848_v54 = vmul.f32 %v5692_v16, %v7012_v2 }
 0xee4   :  { %5203 = vmatmul.mubr.msk.f32.vlgmr.msra.gmra.mrb[20].mxu0 %vm427_vm1, %v2624_v13 }
 0xee5   :  { %5212 = vmatprep.mubr.msk.f32.mxu0 %vm427_vm1, %v3182_v55 }
 0xef7   :  { %v2837_v39 = vpop.xlane.xlu1 %2836 }
 0xef8   :  { %5693 = vrcp.f32 %v2837_v39 }
 0xef9   :  { %5695 = vrcp.f32 %v2618_v8 }
 0xefb   :  { %v3186_v30 = vpop.permute.xlu1 %3185 }
 0xefc   :  { %5210 = vmatprep.subr.msk.mxu0 %vm427_vm1, %v3186_v30 }
 0xefd   :  { %5211 = vmatpush3.xpose.msk.msra.mxu0 %vm427_vm1, %v3186_v30 }
 0xeff   :  { %v3271_v46 = vpop.permute.xlu1 %3270 }
 0xf02   :  { %v5694_v50 = vpop.eup %5693 }
 0xf03   :  { %v3184_v14 = vpop.permute.xlu1 %3183  ;;  %v2847_v36 = vmul.f32 %v5694_v50, %v5680_v42  ;;  %v5696_v59 = vpop.eup %5695 }
 0xf04   :  { %5213 = vmatmul.mubr.msk.f32.vlgmr.msra.gmra.mrb[22].mxu0 %vm427_vm1, %v3184_v14  ;;  %v2626_v62 = vmul.f32 %v5696_v59, %v7007_v57 }
 0xf05   :  { %5197 = vmatprep.mubr.msk.f32.mxu1 %vm427_vm1, %v2847_v36 }
 0xf06   :  { %5198 = vmatmul.mubr.msk.f32.vlgmr.msra.gmra.mrb[24].mxu1 %vm427_vm1, %v2848_v54 }
 0xf07   :  { %5206 = vmatpush3.msra.mxu1 %v6994_v10  ;;  %5207 = vmatprep.mubr.msk.f32.mxu1 %vm427_vm1, %v2625_v58 }
 0xf08   :  { %5215 = vmatprep.subr.msk.mxu1 %vm427_vm1, %v3273_v17 }
 0xf0e   :  { %5208 = vmatmul.mubr.msk.f32.vlgmr.msra.gmra.mrb[24].mxu1 %vm427_vm1, %v2626_v62 }
 0xf0f   :  { %5216 = vmatpush3.xpose.msk.msra.mxu1 %vm427_vm1, %v3273_v17  ;;  %5217 = vmatprep.mubr.msk.f32.mxu1 %vm427_vm1, %v3269_v35 }
 0xf12   :  { %5218 = vmatmul.mubr.msk.f32.vlgmr.msra.gmra.mrb[26].mxu1 %vm427_vm1, %v3271_v46 }
 0xfd7   :  { %v5214_v51 = vpop.f32.mrb[22].mxu0 }
 0xfd8   :  { %v3259_v7 = vpop.f32.mrb[23].mxu0  ;;  %v3356_v60 = vsel %vm6966_vm5, -1e+09, %v5214_v51 }
 0xfd9   :  { %v3355_v63 = vsel %vm6966_vm5, -1e+09, %v3259_v7  ;;  %v3362_v5 = vsel %vm427_vm1, %v3356_v60, -inf }
 0xfda   :  { %v3359_v33 = vsel %vm427_vm1, %v3355_v63, -inf }
 0xfdb   :  { %3360 = vmax.xlane.f32.xlu0 %v3359_v33 }
 0xfe5   :  { %v5219_v11 = vpop.f32.mrb[26].mxu1 }
 0xfe6   :  { %v3358_v57 = vsel %vm6954_vm4, -1e+09, %v5219_v11  ;;  %v3346_v1 = vpop.f32.mrb[27].mxu1 }
 0xfe7   :  { %v3357_v37 = vsel %vm6954_vm4, -1e+09, %v3346_v1  ;;  %v3368_v53 = vsel %vm427_vm1, %v3358_v57, -inf }
 0xfe8   :  { %v3365_v2 = vsel %vm427_vm1, %v3357_v37, -inf  ;;  %3369 = vmax.xlane.f32.xlu1 %v3368_v53 }
 0xfe9   :  { %3366 = vmax.xlane.f32.xlu0 %v3365_v2 }
 0xfed   :  { %3363 = vmax.xlane.f32.xlu0 %v3362_v5 }
 0xff9   :  { %3487 = vrot.lane.b32.xlu1 %v6994_v10, %s6180_s26 }
 0xffd   :  { %3666 = vrot.lane.b32.xlu1 %v6905_v20, %s6182_s18 }
0x1001   :  { %3579 = vrot.lane.b32.xlu1 %v6895_v12, %s6182_s18 }
0x1003   :  { %3403 = vrot.lane.b32.xlu0 %v6893_v9, %s6180_s26 }
0x1068   :  { %v3361_v38 = vpop.xlane.xlu0 %3360 }
0x1069   :  { %v3371_v42 = vsub.f32 %v3355_v63, %v3361_v38 }
0x106b   :  { %v3375_v47 = vmul.f32 1.442695, %v3371_v42 }
0x106d   :  { %5697 = vpow2.f32 %v3375_v47 }
0x1075   :  { %v3370_v3 = vpop.xlane.xlu1 %3369 }
0x1076   :  { %v3367_v48 = vpop.xlane.xlu0 %3366  ;;  %v3374_v8 = vsub.f32 %v3358_v57, %v3370_v3 }
0x1077   :  { %v5698_v56 = vpop.eup %5697  ;;  %v3373_v15 = vsub.f32 %v3357_v37, %v3367_v48 }
0x1078   :  { %v3383_v43 = vsel %vm427_vm1, %v5698_v56, 0.0  ;;  %v3381_v12 = vmul.f32 1.442695, %v3374_v8 }
0x1079   :  { %3384 = vadd.xlane.f32.xlu1 %v3383_v43  ;;  %v3488_v44 = vpop.permute.xlu1 %3487  ;;  %v3379_v13 = vmul.f32 1.442695, %v3373_v15 }
0x107a   :  { %v3364_v25 = vpop.xlane.xlu0 %3363  ;;  %5225 = vmatprep.subr.mxu1 %v3488_v44 }
0x107b   :  { %v3372_v20 = vsub.f32 %v3356_v60, %v3364_v25  ;;  %5226 = vmatpush3.msra.mxu1 %v3488_v44 }
0x107d   :  { %v3377_v26 = vmul.f32 1.442695, %v3372_v20  ;;  %v3667_v24 = vpop.permute.xlu1 %3666 }
0x107e   :  { %v3404_v27 = vpop.permute.xlu0 %3403  ;;  %5235 = vmatprep.subr.msk.mxu1 %vm427_vm1, %v3667_v24 }
0x107f   :  { %5699 = vpow2.f32 %v3377_v26  ;;  %5220 = vmatprep.subr.mxu0 %v3404_v27 }
0x1080   :  { %5221 = vmatpush3.msra.mxu0 %v3404_v27  ;;  %5701 = vpow2.f32 %v3381_v12 }
0x1081   :  { %v3580_v28 = vpop.permute.xlu1 %3579  ;;  %5703 = vpow2.f32 %v3379_v13  ;;  %v7131_v13 = vld [vmem:[%s7361_s12 + $0x10] sm:$0xff] }
0x1082   :  { %5230 = vmatprep.subr.msk.mxu0 %vm427_vm1, %v3580_v28 }
0x1089   :  { %v5700_v31 = vpop.eup %5699 }
0x108a   :  { %3664 = vrot.lane.b32.xlu1 %v6925_v45, %s6182_s18  ;;  %v3386_v32 = vsel %vm427_vm1, %v5700_v31, 0.0  ;;  %v5702_v34 = vpop.eup %5701 }
0x108b   :  { %3387 = vadd.xlane.f32.xlu0 %v3386_v32  ;;  %v3392_v35 = vsel %vm427_vm1, %v5702_v34, 0.0  ;;  %v5704_v55 = vpop.eup %5703 }
0x108c   :  { %v3389_v17 = vsel %vm427_vm1, %v5704_v55, 0.0 }
0x108f   :  { %3393 = vadd.xlane.f32.xlu0 %v3392_v35  ;;  %v7124_v35 = vld [vmem:[%s7361_s12] sm:$0xff] }
0x1090   :  { %v4079_v15 = vsel %vm290_vm0, %v7124_v35, 0.0 }
0x10a5   :  { %3662 = vrot.lane.b32.xlu0 %v6928_v22, %s6182_s18 }
0x10a9   :  { %3575 = vrot.lane.b32.xlu0 %v6915_v52, %s6182_s18 }
0x10ae   :  { %3390 = vadd.xlane.f32.xlu1 %v3389_v17  ;;  %v7145_v17 = vld [vmem:[%s7361_s12 + $0x18] sm:$0xff] }
0x10bf   :  { %3577 = vrot.lane.b32.xlu1 %v6917_v23, %s6182_s18 }
0x1106   :  { %v3385_v45 = vpop.xlane.xlu1 %3384 }
0x1107   :  { %5705 = vrcp.f32 %v3385_v45  ;;  %v4089_v45 = vsel %vm290_vm0, %v7145_v17, 0.0 }
0x110a   :  { %v3665_v23 = vpop.permute.xlu1 %3664 }
0x1111   :  { %v5706_v39 = vpop.eup %5705 }
0x1112   :  { %v3399_v30 = vmul.f32 %v5706_v39, %v5698_v56 }
0x1114   :  { %5222 = vmatprep.mubr.msk.f32.mxu0 %vm427_vm1, %v3399_v30 }
0x1118   :  { %v3388_v46 = vpop.xlane.xlu0 %3387 }
0x1119   :  { %5707 = vrcp.f32 %v3388_v46 }
0x111c   :  { %v3394_v49 = vpop.xlane.xlu0 %3393 }
0x111d   :  { %5709 = vrcp.f32 %v3394_v49 }
0x1120   :  { %v3663_v22 = vpop.permute.xlu0 %3662 }
0x1123   :  { %v5708_v16 = vpop.eup %5707 }
0x1124   :  { %v3400_v50 = vmul.f32 %v5708_v16, %v5700_v31  ;;  %v3576_v52 = vpop.permute.xlu0 %3575 }
0x1126   :  { %5223 = vmatmul.mubr.msk.f32.vlgmr.msra.gmra.mrb[20].mxu0 %vm427_vm1, %v3400_v50 }
0x1127   :  { %5231 = vmatpush3.xpose.msk.msra.mxu0 %vm427_vm1, %v3580_v28  ;;  %5232 = vmatprep.mubr.msk.f32.mxu0 %vm427_vm1, %v3576_v52  ;;  %v5710_v54 = vpop.eup %5709 }
0x1128   :  { %v3402_v62 = vmul.f32 %v5710_v54, %v5702_v34 }
0x113b   :  { %v3391_v14 = vpop.xlane.xlu1 %3390 }
0x113c   :  { %5711 = vrcp.f32 %v3391_v14 }
0x113f   :  { %v3578_v36 = vpop.permute.xlu1 %3577 }
0x1140   :  { %5233 = vmatmul.mubr.msk.f32.vlgmr.msra.gmra.mrb[24].mxu0 %vm427_vm1, %v3578_v36 }
0x1146   :  { %v5712_v58 = vpop.eup %5711 }
0x1147   :  { %v3401_v59 = vmul.f32 %v5712_v58, %v5704_v55 }
0x1149   :  { %5227 = vmatprep.mubr.msk.f32.mxu1 %vm427_vm1, %v3401_v59  ;;  %v6184_v59 = vmov 0.0|0.0  }
0x114a   :  { %5228 = vmatmul.mubr.msk.f32.vlgmr.msra.gmra.mrb[24].mxu1 %vm427_vm1, %v3402_v62 }
0x114b   :  { %5236 = vmatpush3.xpose.msk.msra.mxu1 %vm427_vm1, %v3667_v24  ;;  %5237 = vmatprep.mubr.msk.f32.mxu1 %vm427_vm1, %v3663_v22 }
0x114e   :  { %5238 = vmatmul.mubr.msk.f32.vlgmr.msra.gmra.mrb[28].mxu1 %vm427_vm1, %v3665_v23 }
0x1213   :  { %v5234_v51 = vpop.f32.mrb[24].mxu0 }
0x1214   :  { %v3653_v7 = vpop.f32.mrb[25].mxu0  ;;  %v3750_v60 = vsel %vm6966_vm5, -1e+09, %v5234_v51 }
0x1215   :  { %v3749_v63 = vsel %vm6966_vm5, -1e+09, %v3653_v7  ;;  %v3756_v5 = vsel %vm427_vm1, %v3750_v60, -inf }
0x1216   :  { %v3753_v33 = vsel %vm427_vm1, %v3749_v63, -inf }
0x1217   :  { %3754 = vmax.xlane.f32.xlu0 %v3753_v33 }
0x1221   :  { %v5239_v11 = vpop.f32.mrb[28].mxu1 }
0x1222   :  { %v3752_v57 = vsel %vm6954_vm4, -1e+09, %v5239_v11  ;;  %v3740_v1 = vpop.f32.mrb[29].mxu1 }
0x1223   :  { %v3762_v37 = vsel %vm427_vm1, %v3752_v57, -inf  ;;  %v3751_v53 = vsel %vm6954_vm4, -1e+09, %v3740_v1 }
0x1224   :  { %v3759_v2 = vsel %vm427_vm1, %v3751_v53, -inf  ;;  %3763 = vmax.xlane.f32.xlu1 %v3762_v37 }
0x1225   :  { %3760 = vmax.xlane.f32.xlu0 %v3759_v2  ;;  %v4100_v2 = vld [vmem:[#allocation19] sm:$0xff] }
0x1229   :  { %3757 = vmax.xlane.f32.xlu0 %v3756_v5  ;;  %v4105_v5 = vld [vmem:[#allocation20] sm:$0xf] }
0x12a4   :  { %v3755_v38 = vpop.xlane.xlu0 %3754 }
0x12a5   :  { %v3765_v42 = vsub.f32 %v3749_v63, %v3755_v38 }
0x12a7   :  { %v3769_v47 = vmul.f32 1.442695, %v3765_v42 }
0x12a9   :  { %5713 = vpow2.f32 %v3769_v47  ;;  %v4104_v47 = vld [vmem:[%s7375_s3] sm:$0x3] }
0x12b1   :  { %v3764_v3 = vpop.xlane.xlu1 %3763 }
0x12b2   :  { %v3761_v48 = vpop.xlane.xlu0 %3760  ;;  %v3768_v8 = vsub.f32 %v3752_v57, %v3764_v3 }
0x12b3   :  { %v5714_v56 = vpop.eup %5713  ;;  %v3767_v43 = vsub.f32 %v3751_v53, %v3761_v48 }
0x12b4   :  { %v3777_v61 = vsel %vm427_vm1, %v5714_v56, 0.0  ;;  %v3775_v20 = vmul.f32 1.442695, %v3768_v8 }
0x12b5   :  { %v3773_v44 = vmul.f32 1.442695, %v3767_v43  ;;  %3778 = vadd.xlane.f32.xlu1 %v3777_v61  ;;  %v4102_v43 = vld [vmem:[#allocation19 + $0x10] sm:$0xff]  ;;  %v4103_v61 = vld [vmem:[#allocation19 + $0x18] sm:$0xff] }
0x12b6   :  { %v3758_v25 = vpop.xlane.xlu0 %3757  ;;  %v5421_v8 = vpack.c.bf16 %v4103_v61, %v4102_v43 }
0x12b7   :  { %5715 = vpow2.f32 %v3773_v44  ;;  %v3766_v41 = vsub.f32 %v3750_v60, %v3758_v25  ;;  %v4101_v60 = vld [vmem:[#allocation19 + $0x8] sm:$0xff] }
0x12b8   :  { %v5418_v42 = vpack.c.bf16 %v4101_v60, %v4100_v2 }
0x12b9   :  { %v3771_v12 = vmul.f32 1.442695, %v3766_v41 }
0x12bb   :  { %5717 = vpow2.f32 %v3771_v12  ;;  %v4277_v12 = vld [vmem:[%s7336_s21 + $0x8] sm:$0xff] }
0x12bc   :  { %5719 = vpow2.f32 %v3775_v20  ;;  %v4276_v20 = vld [vmem:[%s7336_s21] sm:$0xff] }
0x12c1   :  { %v5716_v26 = vpop.eup %5715 }
0x12c2   :  { %v3783_v24 = vsel %vm427_vm1, %v5716_v26, 0.0 }
0x12c3   :  { %3784 = vadd.xlane.f32.xlu1 %v3783_v24  ;;  %v5424_v24 = vpack.c.bf16 %v4277_v12, %v4276_v20  ;;  %v4420_v20 = vld [vmem:[#allocation14] sm:$0xff]  ;;  %v4421_v12 = vld [vmem:[#allocation14 + $0x8] sm:$0xff] }
0x12c5   :  { %v5718_v27 = vpop.eup %5717 }
0x12c6   :  { %v3780_v28 = vsel %vm427_vm1, %v5718_v27, 0.0  ;;  %v7113_v31 = vpop.eup %5719 }
0x12c7   :  { %3781 = vadd.xlane.f32.xlu0 %v3780_v28  ;;  %v3786_v32 = vsel %vm427_vm1, %v7113_v31, 0.0  ;;  %v4875_v28 = vld [vmem:[#allocation13] ss:$0 sm:$0xff] }
0x12cb   :  { %3787 = vadd.xlane.f32.xlu0 %v3786_v32 }
0x12d4   :  { %3881 = vrot.lane.b32.xlu1 %v6994_v10, %s6183_s4  ;;  %v4088_v10 = vsel %vm290_vm0, %v7131_v13, 0.0 }
0x12d5   :  { %v4090_v30 = vadd.f32 %v4089_v45, %v4088_v10 }
0x12d7   :  { %v4091_v16 = vrot.slane %v4090_v30, 4 }
0x12d9   :  { %v4092_v23 = vadd.f32 %v4091_v16, %v4090_v30 }
0x12db   :  { %v4093_v58 = vrot.slane %v4092_v23, 2 }
0x12dd   :  { %v4094_v63 = vadd.f32 %v4093_v58, %v4092_v23 }
0x12df   :  { %v4095_v37 = vrot.slane %v4094_v63, 1 }
0x12e1   :  { %3797 = vrot.lane.b32.xlu0 %v6893_v9, %s6183_s4  ;;  %v7138_v9 = vld [vmem:[%s7361_s12 + $0x8] sm:$0xff]  ;;  %v4096_v48 = vadd.f32 %v4095_v37, %v4094_v63 }
0x12e2   :  { %v4080_v55 = vsel %vm290_vm0, %v7138_v9, 0.0 }
0x12e3   :  { %v4081_v39 = vadd.f32 %v4080_v55, %v4079_v15  ;;  %v4099_v25 = vmul.f32 0.071428575, %v4096_v48 }
0x12e5   :  { %v4082_v22 = vrot.slane %v4081_v39, 4 }
0x12e7   :  { %v4083_v52 = vadd.f32 %v4082_v22, %v4081_v39 }
0x12e9   :  { %v4084_v54 = vrot.slane %v4083_v52, 2 }
0x12eb   :  { %v4085_v7 = vadd.f32 %v4084_v54, %v4083_v52 }
0x12ed   :  { %v4086_v1 = vrot.slane %v4085_v7, 1 }
0x12ef   :  { %v4087_v3 = vadd.f32 %v4086_v1, %v4085_v7 }
0x12f1   :  { %v4098_v44 = vmul.f32 0.071428575, %v4087_v3 }
0x12f3   :  { %v4187_v41 = vsel %vm4186_vm9, %v4099_v25, %v4098_v44 }
0x1342   :  { %v3779_v34 = vpop.xlane.xlu1 %3778 }
0x1343   :  { %5721 = vrcp.f32 %v3779_v34 }
0x134d   :  { %v5722_v46 = vpop.eup %5721 }
0x134e   :  { %v3793_v49 = vmul.f32 %v5722_v46, %v5714_v56 }
0x1350   :  { %5242 = vmatprep.mubr.msk.f32.mxu0 %vm427_vm1, %v3793_v49  ;;  %v3785_v50 = vpop.xlane.xlu1 %3784 }
0x1351   :  { %5723 = vrcp.f32 %v3785_v50 }
0x1354   :  { %v3782_v14 = vpop.xlane.xlu0 %3781  ;;  %v3882_v36 = vpop.permute.xlu1 %3881 }
0x1355   :  { %5725 = vrcp.f32 %v3782_v14  ;;  %5245 = vmatprep.subr.mxu1 %v3882_v36 }
0x1356   :  { %5246 = vmatpush3.msra.mxu1 %v3882_v36  ;;  %v4879_v36 = vld [vmem:[#allocation22] ss:$0 sm:$0xff] }
0x1357   :  { %5417 = vmatprep.subr.bf16.mxu1 %v6184_v59 }
0x1358   :  { %v3788_v62 = vpop.xlane.xlu0 %3787 }
0x1359   :  { %5727 = vrcp.f32 %v3788_v62 }
0x135b   :  { %v5724_v51 = vpop.eup %5723 }
0x135c   :  { %v3798_v33 = vpop.permute.xlu0 %3797  ;;  %v3795_v11 = vmul.f32 %v5724_v51, %v5716_v26  ;;  %v4278_v26 = vld [vmem:[%s7336_s21 + $0x10] sm:$0xff] }
0x135d   :  { %5240 = vmatprep.subr.mxu0 %v3798_v33 }
0x135e   :  { %5241 = vmatpush3.msra.mxu0 %v3798_v33  ;;  %5247 = vmatprep.mubr.msk.f32.mxu1 %vm427_vm1, %v3795_v11 }
0x135f   :  { %v5726_v57 = vpop.eup %5725  ;;  %5250 = vmatprep.subr.mxu0 %v6172_v0 }
0x1360   :  { %v3794_v53 = vmul.f32 %v5726_v57, %v5718_v27 }
0x1362   :  { %5243 = vmatmul.mubr.msk.f32.vlgmr.msra.gmra.mrb[20].mxu0 %vm427_vm1, %v3794_v53 }
0x1363   :  { %v5728_v38 = vpop.eup %5727  ;;  %5251 = vmatpush3.msk.msra.mxu0 %vm4110_vm6, %v4105_v5  ;;  %5252 = vmatprep.mubr.msk.f32.mxu0 %vm6185_vm7, %v6172_v0 }
0x1364   :  { %v3796_v56 = vmul.f32 %v5728_v38, %v7113_v31  ;;  %5423 = vmatprep.subr.bf16.mxu0 %v6184_v59 }
0x1366   :  { %5248 = vmatmul.mubr.msk.f32.vlgmr.msra.gmra.mrb[24].mxu1 %vm427_vm1, %v3796_v56  ;;  %5253 = vmatmul.mubr.msk.f32.vlgmr.msra.gmra.mrb[26].mxu0 %vm4106_vm8, %v4104_v47 }
0x1367   :  { %5419 = vmatpush3.bf16.msra.mxu1 %v5418_v42  ;;  %5263 = vmatprep.mubr.msk.f32.mxu1 %vm6185_vm7, %v6172_v0 }
0x1368   :  { %5420 = vmatprep.subr.bf16.mxu1 %v6184_v59  ;;  %5274 = vmatprep.mubr.msk.f32.mxu0 %vm6185_vm7, %v6172_v0  ;;  %v4279_v0 = vld [vmem:[%s7336_s21 + $0x18] sm:$0xff] }
0x1369   :  { %5425 = vmatpush3.bf16.msra.mxu0 %v5424_v24  ;;  %v5427_v27 = vpack.c.bf16 %v4279_v0, %v4278_v26  ;;  %v5429_v26 = vpack.c.bf16 %v4421_v12, %v4420_v20  ;;  %v4422_v24 = vld [vmem:[#allocation14 + $0x10] sm:$0xff]  ;;  %v4423_v0 = vld [vmem:[#allocation14 + $0x18] sm:$0xff] }
0x136a   :  { %5426 = vmatprep.subr.bf16.mxu0 %v6184_v59  ;;  %v4268_v59 = vld [vmem:[%s7376_s9] sm:$0x3] }
0x136b   :  { %5422 = vmatpush3.bf16.msra.mxu1 %v5421_v8 }
0x136c   :  { %5430 = vmatprep.subr.bf16.mxu1 %v5429_v26 }
0x136d   :  { %5428 = vmatpush3.bf16.msra.mxu0 %v5427_v27  ;;  %v5433_v27 = vpack.c.bf16 %v4423_v0, %v4422_v24 }
0x136e   :  { %5264 = vmatmul.mubr.msk.f32.vlgmr.msra.gmra.mrb[30].mxu1 %vm290_vm0, %v4187_v41 }
0x136f   :  { %5432 = vmatpush3.bf16.msra.mxu1 %v5429_v26 }
0x1370   :  { %5434 = vmatprep.subr.bf16.mxu1 %v5433_v27 }
0x1373   :  { %5436 = vmatpush3.bf16.msra.mxu1 %v5433_v27 }
0x1435   :  { %v5244_v31 = vpop.f32.mrb[20].mxu0 }
0x1436   :  { %v3976_v32 = vadd.f32 %v5244_v31, %v4875_v28  ;;  %v3872_v34 = vpop.f32.mrb[21].mxu0 }
0x1437   :  { %v3975_v15 = vadd.f32 %v4875_v28, %v3872_v34  ;;  %v4533_v34 = vld [vmem:[%s7331_s16 + $0x8] sm:$0xff] }
0x1438   :  { %v3980_v10 = vadd.f32 %v3976_v32, %v6874_v29  ;;  %v4532_v32 = vld [vmem:[%s7331_s16] sm:$0xff] }
0x1439   :  { %v3979_v55 = vadd.f32 %v3975_v15, %v6871_v4  ;;  %v5249_v45 = vpop.f32.mrb[24].mxu1  ;;  %v4180_v39 = vpop.f32.mrb[26].mxu0  ;;  %v4534_v15 = vld [vmem:[%s7331_s16 + $0x10] sm:$0xff] }
0x143a   :  { %v3978_v30 = vadd.f32 %v5249_v45, %v4875_v28  ;;  %v3956_v46 = vpop.f32.mrb[25].mxu1  ;;  %v3986_v49 = vsel %vm290_vm0, %v3980_v10, 0.0  ;;  %v5254_v22 = vpop.f32.mrb[27].mxu0 }
0x143b   :  { %v3977_v16 = vadd.f32 %v4875_v28, %v3956_v46  ;;  %3987 = vadd.xlane.f32.xlu0 %v3986_v49  ;;  %v3983_v50 = vsel %vm290_vm0, %v3979_v55, 0.0 }
0x143c   :  { %v3982_v52 = vadd.f32 %v3978_v30, %v6882_v6  ;;  %3984 = vadd.xlane.f32.xlu1 %v3983_v50  ;;  %v4537_v30 = vld [vmem:[%s7331_s16 + $0x28] sm:$0xff] }
0x143d   :  { %v3981_v23 = vadd.f32 %v3977_v16, %v6880_v40 }
0x143e   :  { %v3992_v29 = vsel %vm290_vm0, %v3982_v52, 0.0 }
0x143f   :  { %3993 = vadd.xlane.f32.xlu0 %v3992_v29  ;;  %v3989_v4 = vsel %vm290_vm0, %v3981_v23, 0.0 }
0x1440   :  { %3990 = vadd.xlane.f32.xlu1 %v3989_v4 }
0x1441   :  { %v4256_v14 = vpop.f32.mrb[30].mxu1 }
0x1442   :  { %v4257_v54 = vadd.f32 %v4256_v14, %v4180_v39  ;;  %v5265_v58 = vpop.f32.mrb[31].mxu1  ;;  %v4536_v39 = vld [vmem:[%s7331_s16 + $0x20] sm:$0xff] }
0x1443   :  { %v5445_v46 = vpack.c.bf16 %v4537_v30, %v4536_v39 }
0x1444   :  { %v4267_v62 = vadd.f32 %v4879_v36, %v4257_v54 }
0x1446   :  { %v4269_v51 = vadd.f32 %v4268_v59, %v4267_v62 }
0x1448   :  { %v4270_v6 = vsub.f32 0.0, %v4269_v51 }
0x144a   :  { %v4271_v7 = vmul.f32 1.442695, %v4270_v6 }
0x144c   :  { %5729 = vpow2.f32 %v4271_v7 }
0x1456   :  { %v5730_v40 = vpop.eup %5729 }
0x1457   :  { %v4273_v63 = vadd.f32 1.0, %v5730_v40 }
0x1459   :  { %5731 = vrcp.f32 %v4273_v63 }
0x1463   :  { %v5732_v33 = vpop.eup %5731 }
0x1464   :  { %5275 = vmatmul.mubr.msk.f32.vlgmr.msra.gmra.mrb[28].mxu0 %vm290_vm0, %v5732_v33 }
0x14c8   :  { %v3988_v11 = vpop.xlane.xlu0 %3987 }
0x14c9   :  { %v3996_v57 = vmul.f32 0.03125, %v3988_v11  ;;  %v3985_v1 = vpop.xlane.xlu1 %3984 }
0x14ca   :  { %v3995_v37 = vmul.f32 0.03125, %v3985_v1 }
0x14cb   :  { %v7189_v53 = vsub.f32 %v3980_v10, %v3996_v57  ;;  %v5437_v10 = vpack.c.bf16 %v4533_v34, %v4532_v32 }
0x14cc   :  { %v7191_v2 = vsub.f32 %v3979_v55, %v3995_v37  ;;  %v3994_v60 = vpop.xlane.xlu0 %3993  ;;  %v4535_v55 = vld [vmem:[%s7331_s16 + $0x18] sm:$0xff] }
0x14cd   :  { %v3998_v5 = vmul.f32 0.03125, %v3994_v60  ;;  %v3991_v38 = vpop.xlane.xlu1 %3990  ;;  %v4004_v42 = vmul.f32 %v7189_v53, %v7189_v53  ;;  %v5441_v45 = vpack.c.bf16 %v4535_v55, %v4534_v15  ;;  %5438 = vmatprep.subr.bf16.mxu0 %v5437_v10 }
0x14ce   :  { %v3997_v47 = vmul.f32 0.03125, %v3991_v38  ;;  %v4003_v3 = vmul.f32 %v7191_v2, %v7191_v2  ;;  %5440 = vmatpush3.bf16.msra.mxu0 %v5437_v10 }
0x14cf   :  { %v7197_v48 = vsub.f32 %v3982_v52, %v3998_v5  ;;  %v4010_v56 = vsel %vm290_vm0, %v4004_v42, 0.0  ;;  %5442 = vmatprep.subr.bf16.mxu0 %v5441_v45 }
0x14d0   :  { %v7200_v43 = vsub.f32 %v3981_v23, %v3997_v47  ;;  %4011 = vadd.xlane.f32.xlu0 %v4010_v56  ;;  %v4007_v61 = vsel %vm290_vm0, %v4003_v3, 0.0 }
0x14d1   :  { %4008 = vadd.xlane.f32.xlu1 %v4007_v61  ;;  %v4006_v8 = vmul.f32 %v7197_v48, %v7197_v48 }
0x14d2   :  { %v4005_v44 = vmul.f32 %v7200_v43, %v7200_v43  ;;  %5444 = vmatpush3.bf16.msra.mxu0 %v5441_v45 }
0x14d3   :  { %v4016_v25 = vsel %vm290_vm0, %v4006_v8, 0.0  ;;  %5446 = vmatprep.subr.bf16.mxu0 %v5445_v46  ;;  %v7229_v8 = vld [vmem:[#allocation23] sm:$0x7] }
0x14d4   :  { %4017 = vadd.xlane.f32.xlu0 %v4016_v25  ;;  %v4013_v41 = vsel %vm290_vm0, %v4005_v44, 0.0  ;;  %v4062_v44 = vrot.slane %v7229_v8, %v6565_v19 }
0x14d5   :  { %4014 = vadd.xlane.f32.xlu1 %v4013_v41  ;;  %v7234_v41 = vld [vmem:[#allocation25] sm:$0x7] }
0x14d6   :  { %5448 = vmatpush3.bf16.msra.mxu0 %v5445_v46  ;;  %v4064_v25 = vmul.f32 %v4062_v44, %v7189_v53  ;;  %v4074_v20 = vrot.slane %v7234_v41, %v6565_v19  ;;  %v4063_v26 = vmul.f32 %v4062_v44, %v7191_v2  ;;  %v4065_v15 = vmul.f32 %v4062_v44, %v7200_v43  ;;  %v4880_v19 = vld [vmem:[%s7337_s22] ss:$0 sm:$0xff] }
0x1537   :  { %v7209_v28 = vpop.f32.mrb[28].mxu0 }
0x1538   :  { %v5276_v31 = vpop.f32.mrb[29].mxu0 }
0x1539   :  { %v4066_v31 = vmul.f32 %v4062_v44, %v7197_v48  ;;  %v4357_v48 = vadd.f32 %v4880_v19, %v7209_v28 }
0x155d   :  { %v4012_v49 = vpop.xlane.xlu0 %4011 }
0x155e   :  { %v4020_v22 = vmul.f32 0.032258064, %v4012_v49  ;;  %v4009_v16 = vpop.xlane.xlu1 %4008 }
0x155f   :  { %v4019_v50 = vmul.f32 0.032258064, %v4009_v16 }
0x1560   :  { %5733 = vrsqrt.f32 %v4020_v22  ;;  %vm4032_vm1 = vcmp.eq.f32.partialorder %v4020_v22, inf  ;;  %v4035_v58 = vand.u32 2147483648, %v4020_v22  ;;  %vm4034_vm10 = vcmp.eq.f32.partialorder %v4020_v22, 0.0 }
0x1561   :  { %5735 = vrsqrt.f32 %v4019_v50  ;;  %v4018_v52 = vpop.xlane.xlu0 %4017  ;;  %vm4025_vm11 = vcmp.eq.f32.partialorder %v4019_v50, inf  ;;  %v4028_v51 = vand.u32 2147483648, %v4019_v50  ;;  %vm4027_vm12 = vcmp.eq.f32.partialorder %v4019_v50, 0.0 }
0x1562   :  { %v4022_v23 = vmul.f32 0.032258064, %v4018_v52  ;;  %v4015_v29 = vpop.xlane.xlu1 %4014 }
0x1563   :  { %v4021_v4 = vmul.f32 0.032258064, %v4015_v29 }
0x1564   :  { %5737 = vrsqrt.f32 %v4022_v23  ;;  %vm4046_vm13 = vcmp.eq.f32.partialorder %v4022_v23, inf  ;;  %vm4048_vm14 = vcmp.eq.f32.partialorder %v4022_v23, 0.0  ;;  %v4049_v37 = vand.u32 2147483648, %v4022_v23 }
0x1565   :  { %5739 = vrsqrt.f32 %v4021_v4  ;;  %vm4039_vm15 = vcmp.eq.f32.partialorder %v4021_v4, inf  ;;  %v4042_v38 = vand.u32 2147483648, %v4021_v4  ;;  %vm4041_vm2 = vcmp.eq.f32.partialorder %v4021_v4, 0.0 }
0x156a   :  { %v5734_v14 = vpop.eup %5733 }
0x156b   :  { %v5736_v36 = vpop.eup %5735  ;;  %v4031_v54 = vmul.f32 %v5734_v14, %v4020_v22 }
0x156c   :  { %v4024_v59 = vmul.f32 %v5736_v36, %v4019_v50 }
0x156d   :  { %v4033_v62 = vsel %vm4032_vm1, %v4020_v22, %v4031_v54 }
0x156e   :  { %v5738_v6 = vpop.eup %5737  ;;  %v4036_v7 = vsel %vm4034_vm10, %v4035_v58, %v4033_v62  ;;  %v4026_v40 = vsel %vm4025_vm11, %v4019_v50, %v4024_v59 }
0x156f   :  { %v5740_v63 = vpop.eup %5739  ;;  %v4052_v33 = vadd.f32 1e-06, %v4036_v7  ;;  %v4029_v11 = vsel %vm4027_vm12, %v4028_v51, %v4026_v40  ;;  %v4045_v57 = vmul.f32 %v5738_v6, %v4022_v23 }
0x1570   :  { %v4051_v1 = vadd.f32 1e-06, %v4029_v11  ;;  %v4038_v60 = vmul.f32 %v5740_v63, %v4021_v4 }
0x1571   :  { %5741 = vrcp.f32 %v4052_v33  ;;  %v4047_v5 = vsel %vm4046_vm13, %v4022_v23, %v4045_v57  ;;  %v4360_v23 = vsub.f32 0.0, %v4357_v48 }
0x1572   :  { %5743 = vrcp.f32 %v4051_v1  ;;  %v4050_v42 = vsel %vm4048_vm14, %v4049_v37, %v4047_v5  ;;  %v4040_v47 = vsel %vm4039_vm15, %v4021_v4, %v4038_v60 }
0x1573   :  { %v4054_v3 = vadd.f32 1e-06, %v4050_v42  ;;  %v4043_v56 = vsel %vm4041_vm2, %v4042_v38, %v4040_v47  ;;  %v4361_v54 = vmul.f32 1.442695, %v4360_v23 }
0x1574   :  { %v4053_v61 = vadd.f32 1e-06, %v4043_v56 }
0x1575   :  { %5745 = vrcp.f32 %v4054_v3 }
0x1576   :  { %5747 = vrcp.f32 %v4053_v61 }
0x1577   :  { %5749 = vpow2.f32 %v4361_v54 }
0x157b   :  { %v5742_v12 = vpop.eup %5741 }
0x157c   :  { %v5744_v24 = vpop.eup %5743  ;;  %v4068_v0 = vmul.f32 %v5742_v12, %v4064_v25 }
0x157d   :  { %v4067_v27 = vmul.f32 %v5744_v24, %v4063_v26 }
0x157e   :  { %v4076_v32 = vadd.f32 %v4074_v20, %v4068_v0 }
0x157f   :  { %v5746_v34 = vpop.eup %5745  ;;  %v4075_v10 = vadd.f32 %v4074_v20, %v4067_v27 }
0x1580   :  { %v5748_v55 = vpop.eup %5747  ;;  %v4367_v53 = vsel %vm290_vm0, %v4076_v32, 0.0  ;;  %v4070_v45 = vmul.f32 %v5746_v34, %v4066_v31 }
0x1581   :  { %v4366_v2 = vsel %vm290_vm0, %v4075_v10, 0.0  ;;  %v4069_v39 = vmul.f32 %v5748_v55, %v4065_v15  ;;  %v5750_v1 = vpop.eup %5749 }
0x1582   :  { %v4368_v30 = vadd.f32 %v4367_v53, %v4366_v2  ;;  %v4078_v46 = vadd.f32 %v4074_v20, %v4070_v45  ;;  %v4363_v37 = vadd.f32 1.0, %v5750_v1 }
0x1583   :  { %v4077_v49 = vadd.f32 %v4074_v20, %v4069_v39 }
0x1584   :  { %v4369_v22 = vrot.slane %v4368_v30, 4  ;;  %v4376_v43 = vsel %vm290_vm0, %v4078_v46, 0.0 }
0x1585   :  { %v4375_v16 = vsel %vm290_vm0, %v4077_v49, 0.0 }
0x1586   :  { %v4370_v50 = vadd.f32 %v4369_v22, %v4368_v30  ;;  %v4377_v52 = vadd.f32 %v4376_v43, %v4375_v16  ;;  %v4887_v22 = vld [vmem:[#allocation17] ss:$0 sm:$0xff] }
0x1588   :  { %v4371_v29 = vrot.slane %v4370_v50, 2  ;;  %v4378_v4 = vrot.slane %v4377_v52, 4 }
0x158a   :  { %v4372_v14 = vadd.f32 %v4371_v29, %v4370_v50  ;;  %v4379_v36 = vadd.f32 %v4378_v4, %v4377_v52 }
0x158c   :  { %v4373_v58 = vrot.slane %v4372_v14, 1  ;;  %v4380_v59 = vrot.slane %v4379_v36, 2 }
0x158e   :  { %v4374_v62 = vadd.f32 %v4373_v58, %v4372_v14  ;;  %v4381_v51 = vadd.f32 %v4380_v59, %v4379_v36 }
0x1590   :  { %v4384_v6 = vmul.f32 0.071428575, %v4374_v62  ;;  %v4382_v28 = vrot.slane %v4381_v51, 1 }
0x1592   :  { %v4386_v7 = vsub.f32 0.0, %v4384_v6  ;;  %v4383_v40 = vadd.f32 %v4382_v28, %v4381_v51 }
0x1594   :  { %v4388_v63 = vmul.f32 1.442695, %v4386_v7  ;;  %v4385_v33 = vmul.f32 0.071428575, %v4383_v40 }
0x1596   :  { %5751 = vpow2.f32 %v4388_v63  ;;  %v4387_v11 = vsub.f32 0.0, %v4385_v33 }
0x1598   :  { %v4390_v57 = vmul.f32 1.442695, %v4387_v11 }
0x159a   :  { %5753 = vpow2.f32 %v4390_v57 }
0x159b   :  { %5755 = vrcp.f32 %v4363_v37 }
0x15a0   :  { %v5752_v60 = vpop.eup %5751 }
0x15a1   :  { %v4392_v5 = vadd.f32 1.0, %v5752_v60 }
0x15a3   :  { %5757 = vrcp.f32 %v4392_v5 }
0x15a4   :  { %v5754_v38 = vpop.eup %5753 }
0x15a5   :  { %v4393_v42 = vadd.f32 1.0, %v5754_v38  ;;  %v5756_v47 = vpop.eup %5755 }
0x15a6   :  { %v4399_v44 = vrot.slane %v5756_v47, 1 }
0x15a7   :  { %5759 = vrcp.f32 %v4393_v42 }
0x15ad   :  { %v5758_v3 = vpop.eup %5757 }
0x15ae   :  { %v4402_v56 = vmul.f32 %v5758_v3, %v5756_v47 }
0x15b0   :  { %v4407_v61 = vrot.slane %v4402_v56, %v6568_v21 }
0x15b1   :  { %v5760_v25 = vpop.eup %5759 }
0x15b2   :  { %v4412_v20 = vmul.f32 %v4407_v61, %v4075_v10  ;;  %v4413_v12 = vmul.f32 %v4407_v61, %v4076_v32  ;;  %v4403_v26 = vmul.f32 %v5760_v25, %v4399_v44  ;;  %v4882_v32 = vld [vmem:[#allocation16] ss:$0 sm:$0xff] }
0x15b4   :  { %v4416_v24 = vadd.f32 %v7124_v35, %v4412_v20  ;;  %v4417_v0 = vadd.f32 %v7138_v9, %v4413_v12  ;;  %v4411_v27 = vrot.slane %v4403_v26, %v6568_v21  ;;  %v4538_v35 = vld [vmem:[%s7331_s16 + $0x30] sm:$0xff]  ;;  %v4539_v21 = vld [vmem:[%s7331_s16 + $0x38] sm:$0xff]  ;;  %s6186_s16 = smov [#allocation26]  }
0x15b5   :  { %v5449_v9 = vpack.c.bf16 %v4539_v21, %v4538_v35  ;;  %s4754_s26 = sshll.u32 %s6186_s16, 4  ;;  %s4755_s26 = int_to_ptr.vmem [resolvable:$true] %s4754_s26 }
0x15b6   :  { %5285 = vmatprep.mubr.msk.f32.mxu1 %vm290_vm0, %v4416_v24  ;;  %v4414_v31 = vmul.f32 %v4411_v27, %v4077_v49  ;;  %v4415_v34 = vmul.f32 %v4411_v27, %v4078_v46  ;;  %s6113_s1 = scalar_lea.vmem %s4755_s26, 512  ;;  %p6118_p9 = scmp.lt.s32.totalorder %s4755_s26, %s4755_s26 }
0x15b7   :  { %5286 = vmatmul.mubr.msk.f32.vlgmr.msra.gmra.mrb[32].mxu1 %vm290_vm0, %v4417_v0  ;;  %5450 = vmatprep.subr.bf16.mxu0 %v5449_v9  ;;  %p6114_p8 = scmp.ne.s32.totalorder %s4755_s26, %s6113_s1  ;;  %p6119_p10 = scmp.lt.s32.totalorder %s6113_s1, %s6113_s1 }
0x15b8   :  { %v4418_v15 = vadd.f32 %v7131_v13, %v4414_v31  ;;  %v4419_v55 = vadd.f32 %v7145_v17, %v4415_v34  ;;  %5452 = vmatpush3.bf16.msra.mxu0 %v5449_v9 }
0x15b9   :  { %p6120_p11 = por %p6119_p10, %p6118_p9 }
0x15ba   :  { %5288 = vmatprep.mubr.msk.f32.mxu1 %vm290_vm0, %v4418_v15 }
0x15bb   :  { %5289 = vmatmul.mubr.msk.f32.gmra.mrb[34].mxu1 %vm290_vm0, %v4419_v55  ;;  %p6121_p12 = pnand %p6120_p11, %p6114_p8 }
0x168a   :  { %v5287_v10 = vpop.f32.mrb[32].mxu1 }
0x168b   :  { %v4515_v13 = vadd.f32 %v5287_v10, %v4882_v32  ;;  %v4509_v53 = vpop.f32.mrb[33].mxu1 }
0x168c   :  { %v4510_v17 = vadd.f32 %v4882_v32, %v4509_v53 }
0x168d   :  { %v4529_v2 = vmax.f32 %v4515_v13, 0.0 }
0x168e   :  { %v4528_v45 = vmax.f32 %v4510_v17, 0.0  ;;  %v5290_v19 = vpop.f32.mrb[34].mxu1 }
0x168f   :  { %v4525_v39 = vadd.f32 %v5290_v19, %v4882_v32  ;;  %v4519_v30 = vpop.f32.mrb[35].mxu1 }
0x1690   :  { %v4520_v46 = vadd.f32 %v4882_v32, %v4519_v30  ;;  %5307 = vmatprep.mubr.msk.f32.mxu0 %vm4547_vm3, %v4528_v45  ;;  %v4727_v45 = vsub.s32 2, %v6562_v18 }
0x1691   :  { %5308 = vmatmul.mubr.msk.f32.vlgmr.msra.gmra.mrb[30].mxu0 %vm4547_vm3, %v4529_v2  ;;  %v4531_v48 = vmax.f32 %v4525_v39, 0.0 }
0x1692   :  { %v4530_v49 = vmax.f32 %v4520_v46, 0.0 }
0x1694   :  { %5310 = vmatprep.mubr.msk.f32.mxu0 %vm4547_vm3, %v4530_v49 }
0x1695   :  { %5311 = vmatmul.mubr.msk.f32.gmra.mrb[32].mxu0 %vm4547_vm3, %v4531_v48 }
0x1764   :  { %v5309_v43 = vpop.f32.mrb[30].mxu0 }
0x1765   :  { %v4632_v16 = vadd.f32 %v5309_v43, %v4887_v22  ;;  %v4626_v50 = vpop.f32.mrb[31].mxu0 }
0x1766   :  { %v4627_v52 = vadd.f32 %v4887_v22, %v4626_v50 }
0x1767   :  { %v4646_v23 = vadd.f32 %v4632_v16, %v4417_v0 }
0x1768   :  { %v4645_v29 = vadd.f32 %v4627_v52, %v4416_v24  ;;  %v5312_v4 = vpop.f32.mrb[32].mxu0 }
0x1769   :  { %v4642_v14 = vadd.f32 %v5312_v4, %v4887_v22  ;;  %v4636_v36 = vpop.f32.mrb[33].mxu0  ;;  %v4652_v54 = vsel %vm290_vm0, %v4646_v23, 0.0 }
0x176a   :  { %v4637_v58 = vadd.f32 %v4887_v22, %v4636_v36  ;;  %4653 = vadd.xlane.f32.xlu0 %v4652_v54  ;;  %v4649_v59 = vsel %vm290_vm0, %v4645_v29, 0.0  ;;  %v4740_v36 = vrot.slane %v7234_v41, %v4727_v45 }
0x176b   :  { %v4648_v62 = vadd.f32 %v4642_v14, %v4419_v55  ;;  %4650 = vadd.xlane.f32.xlu1 %v4649_v59  ;;  %v4728_v14 = vrot.slane %v7229_v8, %v4727_v45 }
0x176c   :  { %v4647_v51 = vadd.f32 %v4637_v58, %v4418_v15 }
0x176d   :  { %v4658_v6 = vsel %vm290_vm0, %v4648_v62, 0.0 }
0x176e   :  { %4659 = vadd.xlane.f32.xlu0 %v4658_v6  ;;  %v4655_v28 = vsel %vm290_vm0, %v4647_v51, 0.0 }
0x176f   :  { %4656 = vadd.xlane.f32.xlu1 %v4655_v28 }
0x17f7   :  { %v4654_v7 = vpop.xlane.xlu0 %4653 }
0x17f8   :  { %v4662_v40 = vmul.f32 0.03125, %v4654_v7  ;;  %v4651_v63 = vpop.xlane.xlu1 %4650 }
0x17f9   :  { %v4661_v33 = vmul.f32 0.03125, %v4651_v63 }
0x17fa   :  { %v7269_v11 = vsub.f32 %v4646_v23, %v4662_v40 }
0x17fb   :  { %v7271_v57 = vsub.f32 %v4645_v29, %v4661_v33  ;;  %v4660_v1 = vpop.xlane.xlu0 %4659 }
0x17fc   :  { %v4664_v37 = vmul.f32 0.03125, %v4660_v1  ;;  %v4657_v60 = vpop.xlane.xlu1 %4656  ;;  %v4670_v5 = vmul.f32 %v7269_v11, %v7269_v11  ;;  %v4730_v54 = vmul.f32 %v4728_v14, %v7269_v11 }
0x17fd   :  { %v4663_v38 = vmul.f32 0.03125, %v4657_v60  ;;  %v4669_v42 = vmul.f32 %v7271_v57, %v7271_v57  ;;  %v4729_v59 = vmul.f32 %v4728_v14, %v7271_v57 }
0x17fe   :  { %v7277_v47 = vsub.f32 %v4648_v62, %v4664_v37  ;;  %v4676_v3 = vsel %vm290_vm0, %v4670_v5, 0.0 }
0x17ff   :  { %v7280_v56 = vsub.f32 %v4647_v51, %v4663_v38  ;;  %4677 = vadd.xlane.f32.xlu0 %v4676_v3  ;;  %v4673_v61 = vsel %vm290_vm0, %v4669_v42, 0.0 }
0x1800   :  { %4674 = vadd.xlane.f32.xlu1 %v4673_v61  ;;  %v4672_v44 = vmul.f32 %v7277_v47, %v7277_v47  ;;  %v4732_v28 = vmul.f32 %v4728_v14, %v7277_v47 }
0x1801   :  { %v4671_v25 = vmul.f32 %v7280_v56, %v7280_v56  ;;  %v4731_v63 = vmul.f32 %v4728_v14, %v7280_v56 }
0x1802   :  { %v4682_v20 = vsel %vm290_vm0, %v4672_v44, 0.0 }
0x1803   :  { %4683 = vadd.xlane.f32.xlu0 %v4682_v20  ;;  %v4679_v12 = vsel %vm290_vm0, %v4671_v25, 0.0 }
0x1804   :  { %4680 = vadd.xlane.f32.xlu1 %v4679_v12 }
0x188c   :  { %v4678_v26 = vpop.xlane.xlu0 %4677 }
0x188d   :  { %v4686_v24 = vmul.f32 0.032258064, %v4678_v26  ;;  %v4675_v0 = vpop.xlane.xlu1 %4674 }
0x188e   :  { %v4685_v27 = vmul.f32 0.032258064, %v4675_v0 }
0x188f   :  { %5761 = vrsqrt.f32 %v4686_v24  ;;  %vm4698_vm4 = vcmp.eq.f32.partialorder %v4686_v24, inf  ;;  %v4701_v32 = vand.u32 2147483648, %v4686_v24  ;;  %vm4700_vm5 = vcmp.eq.f32.partialorder %v4686_v24, 0.0 }
0x1890   :  { %5763 = vrsqrt.f32 %v4685_v27  ;;  %v4684_v31 = vpop.xlane.xlu0 %4683  ;;  %vm4691_vm6 = vcmp.eq.f32.partialorder %v4685_v27, inf  ;;  %v4694_v53 = vand.u32 2147483648, %v4685_v27  ;;  %vm4693_vm7 = vcmp.eq.f32.partialorder %v4685_v27, 0.0 }
0x1891   :  { %v4688_v34 = vmul.f32 0.032258064, %v4684_v31  ;;  %v4681_v15 = vpop.xlane.xlu1 %4680 }
0x1892   :  { %v4687_v55 = vmul.f32 0.032258064, %v4681_v15 }
0x1893   :  { %5765 = vrsqrt.f32 %v4688_v34  ;;  %vm4712_vm8 = vcmp.eq.f32.partialorder %v4688_v34, inf  ;;  %vm4714_vm9 = vcmp.eq.f32.partialorder %v4688_v34, 0.0  ;;  %v4715_v22 = vand.u32 2147483648, %v4688_v34 }
0x1894   :  { %5767 = vrsqrt.f32 %v4687_v55  ;;  %vm4705_vm1 = vcmp.eq.f32.partialorder %v4687_v55, inf  ;;  %v4708_v50 = vand.u32 2147483648, %v4687_v55  ;;  %vm4707_vm10 = vcmp.eq.f32.partialorder %v4687_v55, 0.0 }
0x1899   :  { %v5762_v35 = vpop.eup %5761 }
0x189a   :  { %v5764_v21 = vpop.eup %5763  ;;  %v4697_v9 = vmul.f32 %v5762_v35, %v4686_v24 }
0x189b   :  { %v4690_v10 = vmul.f32 %v5764_v21, %v4685_v27 }
0x189c   :  { %v4699_v13 = vsel %vm4698_vm4, %v4686_v24, %v4697_v9 }
0x189d   :  { %v5766_v17 = vpop.eup %5765  ;;  %v4702_v19 = vsel %vm4700_vm5, %v4701_v32, %v4699_v13  ;;  %v4692_v2 = vsel %vm4691_vm6, %v4685_v27, %v4690_v10 }
0x189e   :  { %v5768_v39 = vpop.eup %5767  ;;  %v4718_v30 = vadd.f32 1e-06, %v4702_v19  ;;  %v4695_v46 = vsel %vm4693_vm7, %v4694_v53, %v4692_v2  ;;  %v4711_v49 = vmul.f32 %v5766_v17, %v4688_v34 }
0x189f   :  { %v4717_v48 = vadd.f32 1e-06, %v4695_v46  ;;  %v4704_v43 = vmul.f32 %v5768_v39, %v4687_v55 }
0x18a0   :  { %5769 = vrcp.f32 %v4718_v30  ;;  %v4713_v16 = vsel %vm4712_vm8, %v4688_v34, %v4711_v49 }
0x18a1   :  { %5771 = vrcp.f32 %v4717_v48  ;;  %v4716_v52 = vsel %vm4714_vm9, %v4715_v22, %v4713_v16  ;;  %v4706_v23 = vsel %vm4705_vm1, %v4687_v55, %v4704_v43 }
0x18a2   :  { %v4720_v18 = vadd.f32 1e-06, %v4716_v52  ;;  %v4709_v29 = vsel %vm4707_vm10, %v4708_v50, %v4706_v23 }
0x18a3   :  { %v4719_v4 = vadd.f32 1e-06, %v4709_v29 }
0x18a4   :  { %5773 = vrcp.f32 %v4720_v18 }
0x18a5   :  { %5775 = vrcp.f32 %v4719_v4 }
0x18aa   :  { %v5770_v58 = vpop.eup %5769 }
0x18ab   :  { %v5772_v62 = vpop.eup %5771  ;;  %v4734_v51 = vmul.f32 %v5770_v58, %v4730_v54 }
0x18ac   :  { %v4733_v6 = vmul.f32 %v5772_v62, %v4729_v59 }
0x18ad   :  { %v4742_v7 = vadd.f32 %v4740_v36, %v4734_v51 }
0x18ae   :  { %v5774_v40 = vpop.eup %5773  ;;  %v4741_v33 = vadd.f32 %v4740_v36, %v4733_v6 }
0x18af   :  { %v5776_v1 = vpop.eup %5775  ;;  %v4736_v8 = vmul.f32 %v5774_v40, %v4732_v28  ;;  %4746 = vst.msk [vmem:[#allocation26 + $0x8] sm:$0xff] %vm290_vm0, %v4742_v7 }
0x18b0   :  { %v4735_v41 = vmul.f32 %v5776_v1, %v4731_v63  ;;  %4745 = vst.msk [vmem:[#allocation26] sm:$0xff] %vm290_vm0, %v4741_v33 }
0x18b1   :  { %v4744_v11 = vadd.f32 %v4740_v36, %v4736_v8 }
0x18b2   :  { %v4743_v57 = vadd.f32 %v4740_v36, %v4735_v41 }
0x18b3   :  { %4748 = vst.msk [vmem:[#allocation26 + $0x18] sm:$0xff] %vm290_vm0, %v4744_v11 }
0x18b4   :  { %4747 = vst.msk [vmem:[#allocation26 + $0x10] sm:$0xff] %vm290_vm0, %v4743_v57 }
0x18b5   :  { %6124 = shalt.err (!%p6121_p12)
}
0x18b6   :  { %s6125_s23 = scalar_lea.hbm %s7340_s25, 512 }
0x18b7   :  { %p6126_p13 = scmp.ne.s32.totalorder %s7340_s25, %s6125_s23  ;;  %p6129_p0 = scmp.lt.u32.totalorder %s6125_s23, %s7340_s25 }
0x18b9   :  { %p6131_p1 = pnand %p6129_p0, %p6126_p13 }
0x18bb   :  { %6134 = shalt.err (!%p6131_p1)
}
0x18bc   :  { %4760 = dma.vmem_to_hbm [thread:$0]  %s4755_s26, 512, %s7340_s25, [#allocation4], %s6158_s0, %s6158_s0, %s6159_s27  }
0x18bd   :  { %6151 = dma.done.wait [#allocation4], 512  }
0x18be   :  { %6152 = vsyncadd [#allocation4], 4294966784 }
0x18bf   :  { %4764 = vsyncpa [#allocation3], 1 }
0x18c0   :  { %4765 = vsyncpa [#allocation6], 1 }
0x18c1   :  { %4766 = vsyncpa [#allocation9], 1 }
0x18c2   :  { %4767 = vsyncpa [#allocation12], 1 }
0x18c3   :  { %4768 = vsyncpa [#allocation15], 1 }
0x18c4   :  { %4769 = vsyncpa [#allocation18], 1 }
0x18c5   :  { %4770 = vsyncpa [#allocation21], 1 }
0x18c6   :  { %4771 = vsyncpa [#allocation24], 1 }
0x18c7   :  { %4772 = vsyncpa [#allocation4], 1 }

</bundles_post_ra>
